<compile_context>
chip_gen: v7x
topology: tpu7x:2x2x1
jax: 0.10.0
libtpu: 0.0.40
codegen_flags: <defaults>
</compile_context>

<pallas_src>
import jax
import jax.numpy as jnp
from jax.experimental import pallas as pl
from jax.experimental.pallas import tpu as pltpu

HIDDEN_DIM = 200   # matches the PyTorch module's self.hidden_dim
LANE = 128
VMEM_LIMIT = 32 * 1024 * 1024   # conservative: safe on v7x (64 MiB physical VMEM)


# --------------------------------------------------------------------------
# Small helpers
# --------------------------------------------------------------------------
def _round_up(x, m):
    return ((x + m - 1) // m) * m


def _pad_rows(x, n_rows):
    n = x.shape[0]
    if n == n_rows:
        return x
    pad = [(0, n_rows - n)] + [(0, 0)] * (x.ndim - 1)
    return jnp.pad(x, pad)


def _pad_lanes(emb):
    """Zero-pad the feature dim to a multiple of 128 (TransE layout)."""
    n, d = emb.shape
    dp = _round_up(d, LANE)
    return jnp.pad(emb, ((0, 0), (0, dp - d)))


def _pad_complex_halves(emb):
    """Store re/im halves as two lane-aligned 128-wide slabs (ComplEx layout)."""
    n, d = emb.shape
    assert d % 2 == 0
    h = d // 2
    hp = _round_up(h, LANE)
    re = jnp.pad(emb[:, :h], ((0, 0), (0, hp - h)))
    im = jnp.pad(emb[:, h:], ((0, 0), (0, hp - h)))
    return jnp.concatenate([re, im], axis=-1)          # [n, 2*hp]


def _complex_hr(head, rel):
    """hr = head * rel in C, on the padded [., :hp]=re / [., hp:]=im layout."""
    hp = head.shape[-1] // 2
    re_h, im_h = head[:, :hp], head[:, hp:]
    re_r, im_r = rel[:, :hp], rel[:, hp:]
    return jnp.concatenate(
        [re_h * re_r - im_h * im_r, re_h * im_r + im_h * re_r], axis=-1)


# --------------------------------------------------------------------------
# Kernels
# --------------------------------------------------------------------------
def _transe_sampled_kernel(gamma_ref, head_ref, rel_ref, tail_ref, score_ref):
    # head/rel: [bt, Dp]; tail: [bt, K, Dp]; score: [K, bt] (lane-dense output)
    # TODO(synk): for K >= ~32 chunk K (or move to the sublane-reduce layout of
    # the 'all' kernel) to bound the [bt, K, Dp] broadcast intermediate.
    hr = head_ref[...] + rel_ref[...]
    s = gamma_ref[0] - jnp.sum(jnp.abs(hr[:, None, :] - tail_ref[...]), axis=-1)
    score_ref[...] = s.T


def _transe_all_kernel(gamma_ref, hr_ref, tailT_ref, score_ref):
    # hr:    [1, Dp, bt]  (hr = head+rel, pre-transposed: D on sublanes, batch on lanes)
    # tailT: [Dp, nt]     (entity table pre-transposed: D on sublanes, entities on lanes)
    # score: [bt, nt]
    # Per batch row: |hr[:, b] - tailT| is a [Dp, nt] tile reduced over the
    # SUBLANE axis -> cross-vreg VALU adds + a tiny XLU tail, instead of a
    # 128-lane XLU tree reduce over an 8 MiB broadcast intermediate.
    # TODO(synk): on v6e/v7x a bf16 entity stream (f32 partial sums) would halve
    # HBM reads and double VALU throughput; kept f32 here for exactness.
    hrT = hr_ref[0]                          # [Dp, bt]
    tailT = tailT_ref[...]                   # [Dp, nt]
    g = gamma_ref[0]
    bt = hrT.shape[-1]
    for b in range(bt):                      # static unroll; bt kept small (<= 32)
        col = hrT[:, b:b + 1]                                      # [Dp, 1]
        s = jnp.sum(jnp.abs(col - tailT), axis=0, keepdims=True)   # [1, nt]
        score_ref[b:b + 1, :] = g - s


def _complex_sampled_kernel(head_ref, rel_ref, tail_ref, score_ref):
    # head/rel: [bt, 2*hp]; tail: [bt, K, 2*hp]; score: [K, bt]
    # TODO(synk): same large-K guard as the TransE sampled kernel.
    hp = head_ref.shape[-1] // 2
    h = head_ref[...]
    r = rel_ref[...]
    re_h, im_h = h[:, :hp], h[:, hp:]
    re_r, im_r = r[:, :hp], r[:, hp:]
    re_hr = re_h * re_r - im_h * im_r
    im_hr = re_h * im_r + im_h * re_r
    t = tail_ref[...]
    s = (jnp.sum(re_hr[:, None, :] * t[:, :, :hp], axis=-1)
         + jnp.sum(im_hr[:, None, :] * t[:, :, hp:], axis=-1))
    score_ref[...] = s.T


def _complex_all_kernel(hr_ref, tail_ref, score_ref):
    # hr: [bt, 2*hp] f32 (precomputed complex head*rel); tail: [nt, 2*hp] bf16.
    # Single fused K=256 MXU contraction: sum over the 256 lanes == re.re + im.im.
    dn = (((1,), (1,)), ((), ()))
    acc = jax.lax.dot_general(hr_ref[...].astype(tail_ref.dtype), tail_ref[...],
                              dn, preferred_element_type=jnp.float32)
    score_ref[...] = acc.astype(score_ref.dtype)


# --------------------------------------------------------------------------
# pallas_call wrappers
# --------------------------------------------------------------------------
def transe_score_sampled(head, rel, tail, gamma):
    B, Dp = head.shape
    K = tail.shape[1]
    bt = 128                                          # lane-dense [K, 128] output tiles
    b_pad = _round_up(max(B, 1), bt)
    head = _pad_rows(head, b_pad)
    rel = _pad_rows(rel, b_pad)
    tail = _pad_rows(tail, b_pad)
    out = pl.pallas_call(
        _transe_sampled_kernel,
        out_shape=jax.ShapeDtypeStruct((K, b_pad), jnp.float32),
        grid=(b_pad // bt,),
        in_specs=[
            pl.BlockSpec(memory_space=pltpu.MemorySpace.SMEM),      # gamma
            pl.BlockSpec((bt, Dp), lambda i: (i, 0)),               # head
            pl.BlockSpec((bt, Dp), lambda i: (i, 0)),               # relation
            pl.BlockSpec((bt, K, Dp), lambda i: (i, 0, 0)),         # sampled tails
        ],
        out_specs=pl.BlockSpec((K, bt), lambda i: (0, i)),
        compiler_params=pltpu.CompilerParams(
            dimension_semantics=("parallel",),
            vmem_limit_bytes=VMEM_LIMIT),
    )(gamma, head, rel, tail)
    return out[:, :B].T                                             # [B, K]


def transe_score_all(head, rel, entT, gamma, n_valid, *, nt=256, bt_cap=32):
    # entT: pre-transposed entity table [Dp, N_pad] (f32).
    B, Dp = head.shape
    n_pad = entT.shape[1]
    if n_pad % nt:
        new_n = _round_up(n_pad, nt)
        entT = jnp.pad(entT, ((0, 0), (0, new_n - n_pad)))
        n_pad = new_n
    bt = min(bt_cap, _round_up(B, 8))
    b_pad = _round_up(B, bt)
    hr = _pad_rows(head + rel, b_pad)                               # [b_pad, Dp]
    hr3 = jnp.swapaxes(hr.reshape(b_pad // bt, bt, Dp), 1, 2)       # [tiles, Dp, bt]
    out = pl.pallas_call(
        _transe_all_kernel,
        out_shape=jax.ShapeDtypeStruct((b_pad, n_pad), jnp.float32),
        grid=(b_pad // bt, n_pad // nt),                            # entity axis innermost
        in_specs=[
            pl.BlockSpec(memory_space=pltpu.MemorySpace.SMEM),      # gamma
            pl.BlockSpec((1, Dp, bt), lambda i, j: (i, 0, 0)),      # hr (D on sublanes)
            pl.BlockSpec((Dp, nt), lambda i, j: (0, j)),            # streamed entity tile^T
        ],
        out_specs=pl.BlockSpec((bt, nt), lambda i, j: (i, j)),
        compiler_params=pltpu.CompilerParams(
            dimension_semantics=("parallel", "parallel"),
            vmem_limit_bytes=VMEM_LIMIT),
    )(gamma, hr3, entT)
    return out[:B, :n_valid]


def complex_score_sampled(head, rel, tail):
    B, Dp = head.shape
    K = tail.shape[1]
    bt = 128
    b_pad = _round_up(max(B, 1), bt)
    head = _pad_rows(head, b_pad)
    rel = _pad_rows(rel, b_pad)
    tail = _pad_rows(tail, b_pad)
    out = pl.pallas_call(
        _complex_sampled_kernel,
        out_shape=jax.ShapeDtypeStruct((K, b_pad), jnp.float32),
        grid=(b_pad // bt,),
        in_specs=[
            pl.BlockSpec((bt, Dp), lambda i: (i, 0)),
            pl.BlockSpec((bt, Dp), lambda i: (i, 0)),
            pl.BlockSpec((bt, K, Dp), lambda i: (i, 0, 0)),
        ],
        out_specs=pl.BlockSpec((K, bt), lambda i: (0, i)),
        compiler_params=pltpu.CompilerParams(
            dimension_semantics=("parallel",),
            vmem_limit_bytes=VMEM_LIMIT),
    )(head, rel, tail)
    return out[:, :B].T                                             # [B, K]


def complex_score_all(head, rel, ent_table, n_valid, *, nt=512, bt_cap=512,
                      out_dtype=jnp.float32):
    # ent_table: [N_pad, Dp] bf16 (halves the dominant HBM read; MXU takes bf16
    # with f32 accumulation).  out_dtype=bf16 additionally halves the score
    # writeback on this memory-bound path if downstream tolerates it.
    B, Dp = head.shape
    n_rows = ent_table.shape[0]
    if n_rows % nt:
        n_rows = _round_up(n_rows, nt)
        ent_table = _pad_rows(ent_table, n_rows)
    bt = min(bt_cap, _round_up(B, 8))
    b_pad = _round_up(B, bt)
    hr = _pad_rows(_complex_hr(head, rel), b_pad)                   # [b_pad, Dp] f32
    out = pl.pallas_call(
        _complex_all_kernel,
        out_shape=jax.ShapeDtypeStruct((b_pad, n_rows), out_dtype),
        grid=(b_pad // bt, n_rows // nt),                           # entity axis innermost
        in_specs=[
            pl.BlockSpec((bt, Dp), lambda i, j: (i, 0)),            # precomputed hr
            pl.BlockSpec((nt, Dp), lambda i, j: (j, 0)),            # bf16 entity stream
        ],
        out_specs=pl.BlockSpec((bt, nt), lambda i, j: (i, j)),
        compiler_params=pltpu.CompilerParams(
            dimension_semantics=("parallel", "parallel"),
            vmem_limit_bytes=VMEM_LIMIT),
    )(hr, ent_table)
    return out[:B, :n_valid]


# --------------------------------------------------------------------------
# Module wrapper (mirrors KGDDI_pretrain.forward)
# --------------------------------------------------------------------------
class KGDDIPretrain:
    ENT_ROW_TILE = {"TransE": 256, "ComplEx": 512}

    def __init__(self, model_name, nentity, nrelation, key, hidden_dim=HIDDEN_DIM):
        assert model_name in ("TransE", "ComplEx")
        self.model_name = model_name
        self.nentity = nentity
        self.nrelation = 2 * nrelation if model_name == "ComplEx" else nrelation
        self.hidden_dim = hidden_dim
        self.gamma = jnp.array([1.0], dtype=jnp.float32)            # non-trainable
        self.embedding_range = 0.01                                 # non-trainable
        k1, k2 = jax.random.split(key)
        # init_embedding('uniform'): U(-embedding_range, +embedding_range)
        self.entity_embedding = jax.random.uniform(
            k1, (self.nentity, hidden_dim), jnp.float32,
            -self.embedding_range, self.embedding_range)
        self.relation_embedding = jax.random.uniform(
            k2, (self.nrelation, hidden_dim), jnp.float32,
            -self.embedding_range, self.embedding_range)

        # Lane-aligned padded layouts (zero lanes / rows are score-neutral).
        pad = _pad_complex_halves if model_name == "ComplEx" else _pad_lanes
        self.entity_padded = pad(self.entity_embedding)             # [N, Dp] f32 (gathers)
        self.relation_padded = pad(self.relation_embedding)         # [R, Dp] f32
        row_tile = self.ENT_ROW_TILE[model_name]
        ent_all = _pad_rows(self.entity_padded, _round_up(self.nentity, row_tile))
        if model_name == "ComplEx":
            # bf16 stream for the MXU path (f32 accumulate).
            self.entity_all_table = ent_all.astype(jnp.bfloat16)    # [N_pad, Dp]
        else:
            # Pre-transposed so D sits on sublanes inside the 'all' kernel.
            self.entity_all_table = ent_all.T                       # [Dp, N_pad] f32
        self.ent_row_tile = row_tile
        # dropout p=0 -> identity; label-smoothing / losses are train-time only.
        # TODO(synk): 3-D relation branch of ComplEx (relation.transpose(1,0)) is not
        # reachable from forward() as written; only the 2-D relation path is implemented.

    def forward(self, sample, mode="single"):
        head_index, relation_index, tail_index = sample
        head = self.entity_padded[head_index]                       # [B, Dp]
        relation = self.relation_padded[relation_index]             # [B, Dp]
        if self.model_name == "TransE":
            if mode == "all":
                return transe_score_all(head, relation, self.entity_all_table,
                                        self.gamma, self.nentity,
                                        nt=self.ent_row_tile)
            tail = self.entity_padded[tail_index]                   # [B, K, Dp]
            return transe_score_sampled(head, relation, tail, self.gamma)
        else:  # ComplEx
            if mode == "all":
                return complex_score_all(head, relation, self.entity_all_table,
                                         self.nentity, nt=self.ent_row_tile)
            tail = self.entity_padded[tail_index]                   # [B, K, Dp]
            return complex_score_sampled(head, relation, tail)


# --------------------------------------------------------------------------
# Plain-JAX references (for correctness check)
# --------------------------------------------------------------------------
def _ref_transe(head, rel, tail, gamma):
    hr = head + rel
    if tail.ndim == 2:  # 'all'
        diff = hr[:, None, :] - tail[None, :, :]
    else:
        diff = hr[:, None, :] - tail
    return gamma[0] - jnp.sum(jnp.abs(diff), axis=-1)


def _ref_complex(head, rel, tail):
    h = head.shape[-1] // 2
    re_h, im_h = head[:, :h], head[:, h:]
    re_r, im_r = rel[:, :h], rel[:, h:]
    hr = jnp.concatenate(
        [re_h * re_r - im_h * im_r, re_h * im_r + im_h * re_r], axis=-1)
    if tail.ndim == 2:  # 'all'
        return hr @ tail.T
    return jnp.sum(hr[:, None, :] * tail, axis=-1)


# --------------------------------------------------------------------------
if __name__ == "__main__":
    key = jax.random.PRNGKey(0)
    nentity, nrelation = 64, 8
    B, K = 16, 8

    k_mod, k_h, k_r, k_t = jax.random.split(key, 4)
    head_idx = jax.random.randint(k_h, (B,), 0, nentity)
    rel_idx = jax.random.randint(k_r, (B,), 0, nrelation)
    neg_tail_idx = jax.random.randint(k_t, (B, K), 0, nentity)      # neg_sample mode
    pos_tail_idx = neg_tail_idx[:, :1]                              # single mode ([B,1])

    # ---- TransE ----
    m_t = KGDDIPretrain("TransE", nentity, nrelation, k_mod)
    s_single = m_t.forward((head_idx, rel_idx, pos_tail_idx), mode="single")
    s_neg = m_t.forward((head_idx, rel_idx, neg_tail_idx), mode="neg_sample")
    s_all = m_t.forward((head_idx, rel_idx, None), mode="all")
    jax.block_until_ready((s_single, s_neg, s_all))

    he, re_ = m_t.entity_embedding[head_idx], m_t.relation_embedding[rel_idx]
    assert s_single.shape == (B, 1) and s_neg.shape == (B, K) and s_all.shape == (B, nentity)
    assert jnp.allclose(s_neg, _ref_transe(he, re_, m_t.entity_embedding[neg_tail_idx],
                                           m_t.gamma), atol=1e-5)
    assert jnp.allclose(s_single, _ref_transe(he, re_, m_t.entity_embedding[pos_tail_idx],
                                              m_t.gamma), atol=1e-5)
    assert jnp.allclose(s_all, _ref_transe(he, re_, m_t.entity_embedding, m_t.gamma),
                        atol=1e-5)

    # ---- ComplEx ----
    m_c = KGDDIPretrain("ComplEx", nentity, nrelation, k_mod)
    c_single = m_c.forward((head_idx, rel_idx, pos_tail_idx), mode="single")
    c_neg = m_c.forward((head_idx, rel_idx, neg_tail_idx), mode="neg_sample")
    c_all = m_c.forward((head_idx, rel_idx, None), mode="all")
    jax.block_until_ready((c_single, c_neg, c_all))

    he_c, re_c = m_c.entity_embedding[head_idx], m_c.relation_embedding[rel_idx]
    assert c_single.shape == (B, 1) and c_neg.shape == (B, K) and c_all.shape == (B, nentity)
    assert jnp.allclose(c_neg, _ref_complex(he_c, re_c, m_c.entity_embedding[neg_tail_idx]),
                        atol=1e-6)
    assert jnp.allclose(c_single, _ref_complex(he_c, re_c, m_c.entity_embedding[pos_tail_idx]),
                        atol=1e-6)
    # 'all' streams a bf16 entity table; tolerance sized relative to score
    # magnitude (bf16 ~0.4% relative) plus a tiny absolute floor.
    c_all_ref = _ref_complex(he_c, re_c, m_c.entity_embedding)
    assert jnp.allclose(c_all, c_all_ref, rtol=5e-3, atol=2e-6)

    print("KERNEL_OK")
</pallas_src>

<mosaic_0001>
module attributes {stable_mosaic.version = 11 : i64} {
  func.func @_transe_sampled_kernel(%arg0: i32, %arg1: memref<1xf32, #tpu.memory_space<smem>>, %arg2: memref<128x256xf32, #tpu.memory_space<vmem>>, %arg3: memref<128x256xf32, #tpu.memory_space<vmem>>, %arg4: memref<128x1x256xf32, #tpu.memory_space<vmem>>, %arg5: memref<1x128xf32, #tpu.memory_space<vmem>>) attributes {dimension_semantics = [#tpu.dimension_semantics<parallel>], iteration_bounds = array<i64: 1>, scalar_prefetch = 0 : i64, scratch_operands = 0 : i64, tpu.core_type = #tpu.core_type<tc>, window_params = [{transform_indices = @transform_0, window_bounds = array<i64: 1>}, {transform_indices = @transform_1, window_bounds = array<i64: 128, 256>}, {transform_indices = @transform_2, window_bounds = array<i64: 128, 256>}, {transform_indices = @transform_3, window_bounds = array<i64: 128, 1, 256>}, {transform_indices = @transform_4, window_bounds = array<i64: 1, 128>}]} {
    %c0 = arith.constant 0 : index
    %c0_0 = arith.constant 0 : index
    %0 = vector.load %arg2[%c0, %c0_0] : memref<128x256xf32, #tpu.memory_space<vmem>>, vector<128x256xf32>
    %c0_1 = arith.constant 0 : index
    %c0_2 = arith.constant 0 : index
    %1 = vector.load %arg3[%c0_1, %c0_2] : memref<128x256xf32, #tpu.memory_space<vmem>>, vector<128x256xf32>
    %2 = arith.addf %0, %1 : vector<128x256xf32>
    %c0_3 = arith.constant 0 : index
    %3 = memref.load %arg1[%c0_3] : memref<1xf32, #tpu.memory_space<smem>>
    %4 = vector.shape_cast %2 : vector<128x256xf32> to vector<128x1x256xf32>
    %c0_4 = arith.constant 0 : index
    %c0_5 = arith.constant 0 : index
    %c0_6 = arith.constant 0 : index
    %5 = vector.load %arg4[%c0_4, %c0_5, %c0_6] : memref<128x1x256xf32, #tpu.memory_space<vmem>>, vector<128x1x256xf32>
    %6 = arith.subf %4, %5 : vector<128x1x256xf32>
    %7 = math.absf %6 : vector<128x1x256xf32>
    %cst = arith.constant dense<0.000000e+00> : vector<128x1xf32>
    %8 = vector.multi_reduction <add>, %7, %cst [2] : vector<128x1x256xf32> to vector<128x1xf32>
    %9 = vector.broadcast %3 : f32 to vector<128x1xf32>
    %10 = arith.subf %9, %8 : vector<128x1xf32>
    %11 = tpu.transpose %10, [1, 0] : vector<128x1xf32> -> vector<1x128xf32>
    %c0_7 = arith.constant 0 : index
    %c0_8 = arith.constant 0 : index
    %12 = vector.load %arg5[%c0_7, %c0_8] : memref<1x128xf32, #tpu.memory_space<vmem>>, vector<1x128xf32>
    tpu.vector_store %arg5[%c0_7, %c0_8], %11 {strides = array<i32>} : memref<1x128xf32, #tpu.memory_space<vmem>>, vector<1x128xf32>,
    return
  }
  func.func @transform_0(%arg0: i32) -> i32 {
    %c0_i32 = arith.constant 0 : i32
    %c0_i32_0 = arith.constant 0 : i32
    return %c0_i32 : i32
  }
  func.func @transform_1(%arg0: i32) -> (i32, i32) {
    %c0_i32 = arith.constant 0 : i32
    %c0_i32_0 = arith.constant 0 : i32
    return %arg0, %c0_i32 : i32, i32
  }
  func.func @transform_2(%arg0: i32) -> (i32, i32) {
    %c0_i32 = arith.constant 0 : i32
    %c0_i32_0 = arith.constant 0 : i32
    return %arg0, %c0_i32 : i32, i32
  }
  func.func @transform_3(%arg0: i32) -> (i32, i32, i32) {
    %c0_i32 = arith.constant 0 : i32
    %c0_i32_0 = arith.constant 0 : i32
    %c0_i32_1 = arith.constant 0 : i32
    return %arg0, %c0_i32, %c0_i32_0 : i32, i32, i32
  }
  func.func @transform_4(%arg0: i32) -> (i32, i32) {
    %c0_i32 = arith.constant 0 : i32
    %c0_i32_0 = arith.constant 0 : i32
    return %c0_i32, %arg0 : i32, i32
  }
}

</mosaic_0001>

<bundles_post_ra>
// kernel: tpu_custom_call.1
= control target key start
LH: loop header
LB: loop body
LE: loop exit
PB: predicated region body
PF: predicated region fallthrough
CT: control target
= control target key end

     0   :  { %10 = vsyncpa [#allocation4], 0  ;;  %s5678_s0 = inlined_call_operand.<no memory space> [shape: f32[1], index: 0, kind: input, shape index: {}]   ;;  %s5679_s1 = inlined_call_operand.hbm [shape: f32[128,256], index: 1, kind: input, shape index: {}]   ;;  %s5680_s2 = inlined_call_operand.hbm [shape: f32[128,256], index: 2, kind: input, shape index: {}]   ;;  %s5681_s3 = inlined_call_operand.hbm [shape: f32[128,1,256], index: 3, kind: input, shape index: {}]   ;;  %s5682_s4 = inlined_call_operand.hbm [shape: f32[1,128], index: 4, kind: output, shape index: {}]  }
   0x1   :  { %11 = vsyncpa [#allocation7], 0 }
   0x2   :  { %12 = vsyncpa [#allocation5], 0  ;;  %s4206_s15 = smov [#allocation6]   ;;  %s4207_s17 = smov [#allocation3]  }
   0x3   :  { %s32_s16 = sshll.u32 %s4206_s15, 4  ;;  %s20_s18 = sshll.u32 %s4207_s17, 4  ;;  %s33_s16 = int_to_ptr.vmem [resolvable:$true] %s32_s16  ;;  %s4240_s18 = int_to_ptr.vmem [resolvable:$true] %s20_s18 }
   0x4   :  { %s4112_s21 = scalar_lea.hbm %s5680_s2, 4096 }
   0x5   :  { %p4113_p0 = scmp.ne.s32.totalorder %s5680_s2, %s4112_s21  ;;  %p4116_p1 = scmp.lt.u32.totalorder %s4112_s21, %s5680_s2 }
   0x7   :  { %p4118_p2 = pnand %p4116_p1, %p4113_p0 }
   0x9   :  { %4121 = shalt.err (!%p4118_p2)
}
   0xa   :  { %s4122_s26 = scalar_lea.vmem %s33_s16, 4096  ;;  %p4127_p4 = scmp.lt.s32.totalorder %s33_s16, %s33_s16 }
   0xb   :  { %p4123_p3 = scmp.ne.s32.totalorder %s33_s16, %s4122_s26  ;;  %p4128_p5 = scmp.lt.s32.totalorder %s4122_s26, %s4122_s26 }
   0xd   :  { %p4129_p6 = por %p4128_p5, %p4127_p4 }
   0xf   :  { %p4130_p7 = pnand %p4129_p6, %p4123_p3 }
  0x11   :  { %4133 = shalt.err (!%p4130_p7)
}
  0x12   :  { %s4208_s27 = smov 256   ;;  %s4209_s28 = smov 16  }
  0x13   :  { %38 = dma.hbm_to_vmem [thread:$0]  %s5680_s2, 4096, %s33_s16, [#allocation7], %s4208_s27, %s4208_s27, %s4209_s28  }
  0x14   :  { %s4134_s7 = scalar_lea.hbm %s5679_s1, 4096 }
  0x15   :  { %p4135_p8 = scmp.ne.s32.totalorder %s5679_s1, %s4134_s7  ;;  %p4138_p9 = scmp.lt.u32.totalorder %s4134_s7, %s5679_s1 }
  0x17   :  { %p4140_p10 = pnand %p4138_p9, %p4135_p8 }
  0x19   :  { %4143 = shalt.err (!%p4140_p10)
}
  0x1a   :  { %s4144_s12 = scalar_lea.vmem %s4240_s18, 4096  ;;  %p4149_p12 = scmp.lt.s32.totalorder %s4240_s18, %s4240_s18 }
  0x1b   :  { %p4145_p11 = scmp.ne.s32.totalorder %s4240_s18, %s4144_s12  ;;  %p4150_p13 = scmp.lt.s32.totalorder %s4144_s12, %s4144_s12 }
  0x1d   :  { %p4151_p0 = por %p4150_p13, %p4149_p12 }
  0x1f   :  { %p4152_p1 = pnand %p4151_p0, %p4145_p11 }
  0x21   :  { %4155 = shalt.err (!%p4152_p1)
}
  0x22   :  { %26 = dma.hbm_to_vmem [thread:$0]  %s5679_s1, 4096, %s4240_s18, [#allocation4], %s4208_s27, %s4208_s27, %s4209_s28  }
  0x23   :  { %s4210_s14 = smov [#allocation8]   ;;  %s4156_s19 = scalar_lea.hbm %s5681_s3, 4096 }
  0x24   :  { %s44_s15 = sshll.u32 %s4210_s14, 4  ;;  %p4157_p2 = scmp.ne.s32.totalorder %s5681_s3, %s4156_s19  ;;  %s45_s15 = int_to_ptr.vmem [resolvable:$true] %s44_s15 }
  0x25   :  { %p4160_p3 = scmp.lt.u32.totalorder %s4156_s19, %s5681_s3 }
  0x27   :  { %p4162_p4 = pnand %p4160_p3, %p4157_p2 }
  0x29   :  { %4165 = shalt.err (!%p4162_p4)
}
  0x2a   :  { %s4166_s24 = scalar_lea.vmem %s45_s15, 4096  ;;  %p4171_p6 = scmp.lt.s32.totalorder %s45_s15, %s45_s15 }
  0x2b   :  { %p4167_p5 = scmp.ne.s32.totalorder %s45_s15, %s4166_s24  ;;  %p4172_p7 = scmp.lt.s32.totalorder %s4166_s24, %s4166_s24 }
  0x2d   :  { %p4173_p8 = por %p4172_p7, %p4171_p6 }
  0x2f   :  { %p4174_p9 = pnand %p4173_p8, %p4167_p5 }
  0x31   :  { %4177 = shalt.err (!%p4174_p9)
}
  0x32   :  { %s4211_s1 = smov 32   ;;  %s4212_s18 = smov 2  }
  0x33   :  { %50 = dma.hbm_to_vmem [thread:$0]  %s5681_s3, 4096, %s45_s15, [#allocation7], %s4211_s1, %s4211_s1, %s4212_s18  }
  0x34   :  { %4200 = dma.done.wait [#allocation4], 4096  }
  0x35   :  { %4201 = vsyncadd [#allocation4], 4294963200 }
  0x36   :  { %4202 = dma.done.wait [#allocation7], 8192  }
  0x37   :  { %4203 = vsyncadd [#allocation7], 4294959104  ;;  %v4213_v0 = vmov 1966171168   ;;  %v194_v2 = vlaneseq  ;;  %v60_v5 = vld [vmem:[#allocation3] sm:$0xff]  ;;  %v61_v6 = vld [vmem:[#allocation3 + $0x8] sm:$0xff] }
  0x38   :  { %v192_v1 = vunpack.c.l.s4 %v4213_v0  ;;  %v92_v7 = vld [vmem:[#allocation6] sm:$0xff]  ;;  %v93_v8 = vld [vmem:[#allocation6 + $0x8] sm:$0xff]  ;;  %v62_v12 = vld [vmem:[#allocation3 + $0x10] sm:$0xff]  ;;  %vm2909_vm0 = vcmask 1040384   ;;  %vm3808_vm1 = vcmask 1041409   ;;  %vm3811_vm2 = vcmask 1042434  }
  0x39   :  { %v195_v4 = vshrl.u32 %v194_v2, 7  ;;  %v124_v9 = vadd.f32 %v92_v7, %v60_v5  ;;  %v125_v10 = vadd.f32 %v93_v8, %v61_v6  ;;  %v63_v13 = vld [vmem:[#allocation3 + $0x18] sm:$0xff]  ;;  %v94_v14 = vld [vmem:[#allocation6 + $0x10] sm:$0xff]  ;;  %v1117_v24 = vld [vmem:[#allocation8] sm:$0x3]  ;;  %vm3814_vm3 = vcmask 1043459  }
  0x3a   :  { %v193_v3 = vunpack.c.0.s8 %v192_v1  ;;  %v95_v15 = vld [vmem:[#allocation6 + $0x18] sm:$0xff]  ;;  %v126_v18 = vadd.f32 %v94_v14, %v62_v12  ;;  %v1121_v26 = vld [vmem:[#allocation8 + $0x8] sm:$0x3]  ;;  %v64_v31 = vld [vmem:[#allocation3 + $0x20] sm:$0xff]  ;;  %vm3817_vm4 = vcmask 1044484   ;;  %vm3820_vm5 = vcmask 1045509  }
  0x3b   :  { %v189_v16 = vcombine.low %v124_v9, %v125_v10  ;;  %v190_v17 = vcombine.high %v124_v9, %v125_v10  ;;  %v127_v19 = vadd.f32 %v95_v15, %v63_v13  ;;  %v4289_v25 = vsub.s32 0, %v195_v4  ;;  %v96_v32 = vld [vmem:[#allocation6 + $0x20] sm:$0xff]  ;;  %v1122_v35 = vld [vmem:[#allocation8 + $0xa] sm:$0x3]  ;;  %v1125_v43 = vld [vmem:[#allocation8 + $0x10] sm:$0x3] }
  0x3c   :  { %v4283_v11 = vsub.s32 %v193_v3, %v195_v4  ;;  %v4297_v33 = vsub.s32 1, %v195_v4  ;;  %v1119_v34 = vld [vmem:[#allocation8 + $0x4] sm:$0x3]  ;;  %v4302_v38 = vadd.f32 %v96_v32, %v64_v31  ;;  %v1129_v44 = vld [vmem:[#allocation8 + $0x18] sm:$0x3]  ;;  %vm3823_vm6 = vcmask 1046534  }
  0x3d   :  { %v239_v22 = vcombine.low %v126_v18, %v127_v19  ;;  %v240_v23 = vcombine.high %v126_v18, %v127_v19  ;;  %v1126_v53 = vld [vmem:[#allocation8 + $0x12] sm:$0x3]  ;;  %v1130_v10 = vld [vmem:[#allocation8 + $0x1a] sm:$0x3]  ;;  %vm3826_vm7 = vcmask 1047559  }
  0x3e   :  { %v4286_v20 = vrot.slane %v189_v16, %v4283_v11  ;;  %v204_v21 = vrot.slane %v190_v17, %v4283_v11 }
  0x3f   :  { %v247_v30 = vrot.slane %v239_v22, %v4283_v11  ;;  %v254_v36 = vrot.slane %v240_v23, %v4283_v11 }
  0x40   :  { %v213_v27 = vrot.slane %v4286_v20, %v4283_v11  ;;  %v4294_v28 = vrot.slane %v204_v21, %v4283_v11  ;;  %v206_v29 = vcombine.high %v204_v21, %v204_v21  ;;  %v205_v37 = vcombine.high %v4286_v20, %v4286_v20  ;;  %v1118_v20 = vld [vmem:[#allocation8 + $0x2] sm:$0x3] }
  0x41   :  { %v4309_v45 = vrot.slane %v247_v30, %v4283_v11  ;;  %v255_v46 = vcombine.high %v247_v30, %v247_v30  ;;  %v4312_v47 = vrot.slane %v254_v36, %v4283_v11  ;;  %v256_v48 = vcombine.high %v254_v36, %v254_v36 }
  0x42   :  { %v1245_v39 = vsub.f32 %v213_v27, %v1117_v24  ;;  %v235_v40 = vcombine.high %v213_v27, %v213_v27  ;;  %v1249_v41 = vsub.f32 %v4294_v28, %v1121_v26  ;;  %v4306_v42 = vrot.slane %v206_v29, %v4283_v11 }
  0x43   :  { %v1253_v54 = vsub.f32 %v4309_v45, %v1125_v43  ;;  %v4317_v55 = vrot.slane %v255_v46, %v4283_v11  ;;  %v1257_v56 = vsub.f32 %v4312_v47, %v1129_v44  ;;  %v4321_v57 = vrot.slane %v256_v48, %v4283_v11  ;;  %v1120_v43 = vld [vmem:[#allocation8 + $0x6] sm:$0x3]  ;;  %v1123_v44 = vld [vmem:[#allocation8 + $0xc] sm:$0x3] }
  0x44   :  { %v1373_v49 = vand.u32 2147483647, %v1245_v39  ;;  %v1247_v50 = vsub.f32 %v235_v40, %v1119_v34  ;;  %v1377_v51 = vand.u32 2147483647, %v1249_v41  ;;  %v1250_v52 = vsub.f32 %v4306_v42, %v1122_v35 }
  0x45   :  { %v1381_v0 = vand.u32 2147483647, %v1253_v54  ;;  %v1254_v1 = vsub.f32 %v4317_v55, %v1126_v53  ;;  %v1385_v23 = vand.u32 2147483647, %v1257_v56  ;;  %v1258_v24 = vsub.f32 %v4321_v57, %v1130_v10 }
  0x46   :  { %v1632_v58 = vrot.slane %v1373_v49, %v4289_v25  ;;  %v1636_v59 = vrot.slane %v1373_v49, %v4297_v33  ;;  %v1375_v60 = vand.u32 2147483647, %v1247_v50  ;;  %v1664_v61 = vrot.slane %v1377_v51, %v4289_v25 }
  0x47   :  { %v1668_v62 = vrot.slane %v1377_v51, %v4297_v33  ;;  %v1378_v63 = vand.u32 2147483647, %v1250_v52  ;;  %v1696_v18 = vrot.slane %v1381_v0, %v4289_v25  ;;  %v1700_v19 = vrot.slane %v1381_v0, %v4297_v33 }
  0x48   :  { %v2910_v2 = vsel %vm2909_vm0, %v1632_v58, 0.0  ;;  %v2911_v3 = vsel %vm2909_vm0, %v1636_v59, 0.0  ;;  %v1648_v4 = vrot.slane %v1375_v60, %v4289_v25  ;;  %v1652_v5 = vrot.slane %v1375_v60, %v4297_v33  ;;  %v1124_v60 = vld [vmem:[#allocation8 + $0xe] sm:$0x3] }
  0x49   :  { %v2912_v6 = vadd.f32 %v2911_v3, %v2910_v2  ;;  %v2930_v7 = vsel %vm2909_vm0, %v1664_v61, 0.0  ;;  %v2931_v8 = vsel %vm2909_vm0, %v1668_v62, 0.0  ;;  %v1672_v9 = vrot.slane %v1378_v63, %v4289_v25  ;;  %v1127_v61 = vld [vmem:[#allocation8 + $0x14] sm:$0x3] }
  0x4a   :  { %v2920_v12 = vsel %vm2909_vm0, %v1648_v4, 0.0  ;;  %v2921_v13 = vsel %vm2909_vm0, %v1652_v5, 0.0  ;;  %v2932_v14 = vadd.f32 %v2931_v8, %v2930_v7  ;;  %v1676_v15 = vrot.slane %v1378_v63, %v4297_v33 }
  0x4b   :  { %2913 = vadd.xlane.f32.xlu0 %v2912_v6  ;;  %v2922_v16 = vadd.f32 %v2921_v13, %v2920_v12  ;;  %v2935_v17 = vsel %vm2909_vm0, %v1672_v9, 0.0  ;;  %v1382_v22 = vand.u32 2147483647, %v1254_v1  ;;  %v2950_v27 = vsel %vm2909_vm0, %v1696_v18, 0.0  ;;  %v1128_v9 = vld [vmem:[#allocation8 + $0x16] sm:$0x3] }
  0x4c   :  { %v2936_v21 = vsel %vm2909_vm0, %v1676_v15, 0.0  ;;  %v2951_v29 = vsel %vm2909_vm0, %v1700_v19, 0.0  ;;  %v227_v30 = vrot.slane %v205_v37, %v4283_v11  ;;  %v1728_v35 = vrot.slane %v1385_v23, %v4289_v25 }
  0x4d   :  { %2923 = vadd.xlane.f32.xlu1 %v2922_v16  ;;  %v2937_v26 = vadd.f32 %v2936_v21, %v2935_v17  ;;  %v2952_v31 = vadd.f32 %v2951_v29, %v2950_v27  ;;  %v1704_v32 = vrot.slane %v1382_v22, %v4289_v25  ;;  %v1708_v34 = vrot.slane %v1382_v22, %v4297_v33 }
  0x4e   :  { %v1732_v36 = vrot.slane %v1385_v23, %v4297_v33  ;;  %v1386_v39 = vand.u32 2147483647, %v1258_v24  ;;  %v1246_v40 = vsub.f32 %v227_v30, %v1118_v20  ;;  %v237_v41 = vcombine.high %v227_v30, %v227_v30  ;;  %v65_v24 = vld [vmem:[#allocation3 + $0x28] sm:$0xff] }
  0x4f   :  { %2933 = vadd.xlane.f32.xlu0 %v2932_v14  ;;  %v2955_v46 = vsel %vm2909_vm0, %v1704_v32, 0.0  ;;  %v2956_v48 = vsel %vm2909_vm0, %v1708_v34, 0.0  ;;  %v2970_v37 = vsel %vm2909_vm0, %v1728_v35, 0.0  ;;  %v236_v49 = vcombine.high %v4294_v28, %v4294_v28  ;;  %v1131_v32 = vld [vmem:[#allocation8 + $0x1c] sm:$0x3] }
  0x50   :  { %v2957_v50 = vadd.f32 %v2956_v48, %v2955_v46  ;;  %v2971_v51 = vsel %vm2909_vm0, %v1732_v36, 0.0  ;;  %v1736_v52 = vrot.slane %v1386_v39, %v4289_v25  ;;  %v1740_v53 = vrot.slane %v1386_v39, %v4297_v33 }
  0x51   :  { %2938 = vadd.xlane.f32.xlu1 %v2937_v26  ;;  %v2972_v54 = vadd.f32 %v2971_v51, %v2970_v37  ;;  %v1374_v56 = vand.u32 2147483647, %v1246_v40  ;;  %v1248_v58 = vsub.f32 %v237_v41, %v1120_v43  ;;  %v1251_v59 = vsub.f32 %v236_v49, %v1123_v44  ;;  %v97_v26 = vld [vmem:[#allocation6 + $0x28] sm:$0xff]  ;;  %v1132_v40 = vld [vmem:[#allocation8 + $0x1e] sm:$0x3]  ;;  %v66_v41 = vld [vmem:[#allocation3 + $0x30] sm:$0xff] }
  0x52   :  { %v2975_v62 = vsel %vm2909_vm0, %v1736_v52, 0.0  ;;  %v2976_v63 = vsel %vm2909_vm0, %v1740_v53, 0.0  ;;  %v238_v28 = vcombine.high %v4306_v42, %v4306_v42  ;;  %v285_v0 = vcombine.high %v4309_v45, %v4309_v45  ;;  %v67_v37 = vld [vmem:[#allocation3 + $0x38] sm:$0xff]  ;;  %v98_v49 = vld [vmem:[#allocation6 + $0x30] sm:$0xff] }
  0x53   :  { %2953 = vadd.xlane.f32.xlu0 %v2952_v31  ;;  %v2977_v1 = vadd.f32 %v2976_v63, %v2975_v62  ;;  %v1640_v2 = vrot.slane %v1374_v56, %v4289_v25  ;;  %v1644_v3 = vrot.slane %v1374_v56, %v4297_v33  ;;  %v1376_v4 = vand.u32 2147483647, %v1248_v58 }
  0x54   :  { %v1379_v5 = vand.u32 2147483647, %v1251_v59  ;;  %v1252_v6 = vsub.f32 %v238_v28, %v1124_v60  ;;  %v1255_v7 = vsub.f32 %v285_v0, %v1127_v61  ;;  %v287_v8 = vcombine.high %v4317_v55, %v4317_v55  ;;  %v68_v59 = vld [vmem:[#allocation3 + $0x40] sm:$0xff] }
  0x55   :  { %2958 = vadd.xlane.f32.xlu1 %v2957_v50  ;;  %v2915_v10 = vsel %vm2909_vm0, %v1640_v2, 0.0  ;;  %v2916_v42 = vsel %vm2909_vm0, %v1644_v3, 0.0  ;;  %v1656_v45 = vrot.slane %v1376_v4, %v4289_v25  ;;  %v1660_v12 = vrot.slane %v1376_v4, %v4297_v33  ;;  %v99_v50 = vld [vmem:[#allocation6 + $0x38] sm:$0xff]  ;;  %v100_v60 = vld [vmem:[#allocation6 + $0x40] sm:$0xff] }
  0x56   :  { %v2917_v13 = vadd.f32 %v2916_v42, %v2915_v10  ;;  %v1680_v14 = vrot.slane %v1379_v5, %v4289_v25  ;;  %v1684_v15 = vrot.slane %v1379_v5, %v4297_v33  ;;  %v1380_v16 = vand.u32 2147483647, %v1252_v6  ;;  %v1133_v42 = vld [vmem:[#allocation8 + $0x20] sm:$0x3] }
  0x57   :  { %2973 = vadd.xlane.f32.xlu0 %v2972_v54  ;;  %v2925_v17 = vsel %vm2909_vm0, %v1656_v45, 0.0  ;;  %v2926_v55 = vsel %vm2909_vm0, %v1660_v12, 0.0  ;;  %v1383_v18 = vand.u32 2147483647, %v1255_v7  ;;  %v1256_v19 = vsub.f32 %v287_v8, %v1128_v9 }
  0x58   :  { %v2927_v20 = vadd.f32 %v2926_v55, %v2925_v17  ;;  %v2940_v21 = vsel %vm2909_vm0, %v1680_v14, 0.0  ;;  %v2941_v22 = vsel %vm2909_vm0, %v1684_v15, 0.0  ;;  %v1688_v23 = vrot.slane %v1380_v16, %v4289_v25  ;;  %v1137_v14 = vld [vmem:[#allocation8 + $0x28] sm:$0x3] }
  0x59   :  { %2978 = vadd.xlane.f32.xlu1 %v2977_v1  ;;  %v2942_v27 = vadd.f32 %v2941_v22, %v2940_v21  ;;  %v1692_v29 = vrot.slane %v1380_v16, %v4297_v33  ;;  %v1712_v30 = vrot.slane %v1383_v18, %v4289_v25  ;;  %v1716_v31 = vrot.slane %v1383_v18, %v4297_v33 }
  0x5a   :  { %v2945_v34 = vsel %vm2909_vm0, %v1688_v23, 0.0  ;;  %v1384_v35 = vand.u32 2147483647, %v1256_v19  ;;  %v286_v36 = vcombine.high %v4312_v47, %v4312_v47  ;;  %v288_v39 = vcombine.high %v4321_v57, %v4321_v57  ;;  %v1134_v19 = vld [vmem:[#allocation8 + $0x22] sm:$0x3] }
  0x5b   :  { %2918 = vadd.xlane.f32.xlu0 %v2917_v13  ;;  %v2946_v43 = vsel %vm2909_vm0, %v1692_v29, 0.0  ;;  %v2960_v44 = vsel %vm2909_vm0, %v1712_v30, 0.0  ;;  %v2961_v46 = vsel %vm2909_vm0, %v1716_v31, 0.0  ;;  %v129_v48 = vadd.f32 %v97_v26, %v65_v24  ;;  %v1135_v24 = vld [vmem:[#allocation8 + $0x24] sm:$0x3] }
  0x5c   :  { %v2947_v51 = vadd.f32 %v2946_v43, %v2945_v34  ;;  %v2962_v52 = vadd.f32 %v2961_v46, %v2960_v44  ;;  %v1720_v47 = vrot.slane %v1384_v35, %v4289_v25  ;;  %v1724_v53 = vrot.slane %v1384_v35, %v4297_v33  ;;  %v1138_v26 = vld [vmem:[#allocation8 + $0x2a] sm:$0x3]  ;;  %v1136_v30 = vld [vmem:[#allocation8 + $0x26] sm:$0x3] }
  0x5d   :  { %2928 = vadd.xlane.f32.xlu1 %v2927_v20  ;;  %v1259_v57 = vsub.f32 %v286_v36, %v1131_v32  ;;  %v1260_v54 = vsub.f32 %v288_v39, %v1132_v40  ;;  %v289_v56 = vcombine.low %v4302_v38, %v129_v48  ;;  %v290_v58 = vcombine.high %v4302_v38, %v129_v48 }
  0x5e   :  { %v2965_v61 = vsel %vm2909_vm0, %v1720_v47, 0.0  ;;  %v2966_v62 = vsel %vm2909_vm0, %v1724_v53, 0.0  ;;  %v4396_v63 = vadd.f32 %v98_v49, %v66_v41  ;;  %v4398_v28 = vadd.f32 %v99_v50, %v67_v37 }
  0x5f   :  { %2943 = vadd.xlane.f32.xlu0 %v2942_v27  ;;  %v2967_v0 = vadd.f32 %v2966_v62, %v2965_v61  ;;  %v1387_v1 = vand.u32 2147483647, %v1259_v57  ;;  %v1388_v2 = vand.u32 2147483647, %v1260_v54  ;;  %v297_v3 = vrot.slane %v289_v56, %v4283_v11  ;;  %v1139_v27 = vld [vmem:[#allocation8 + $0x2c] sm:$0x3] }
  0x60   :  { %v304_v4 = vrot.slane %v290_v58, %v4283_v11  ;;  %v339_v38 = vcombine.low %v4396_v63, %v4398_v28  ;;  %v340_v5 = vcombine.high %v4396_v63, %v4398_v28  ;;  %v4406_v6 = vadd.f32 %v100_v60, %v68_v59 }
  0x61   :  { %2948 = vadd.xlane.f32.xlu1 %v2947_v51  ;;  %v1744_v7 = vrot.slane %v1387_v1, %v4289_v25  ;;  %v1748_v8 = vrot.slane %v1387_v1, %v4297_v33  ;;  %v1752_v9 = vrot.slane %v1388_v2, %v4289_v25  ;;  %v1756_v10 = vrot.slane %v1388_v2, %v4297_v33 }
  0x62   :  { %v313_v45 = vrot.slane %v297_v3, %v4283_v11  ;;  %v305_v12 = vcombine.high %v297_v3, %v297_v3  ;;  %v320_v13 = vrot.slane %v304_v4, %v4283_v11  ;;  %v306_v15 = vcombine.high %v304_v4, %v304_v4 }
  0x63   :  { %2963 = vadd.xlane.f32.xlu0 %v2962_v52  ;;  %v2980_v16 = vsel %vm2909_vm0, %v1744_v7, 0.0  ;;  %v2981_v17 = vsel %vm2909_vm0, %v1748_v8, 0.0  ;;  %v2985_v55 = vsel %vm2909_vm0, %v1752_v9, 0.0  ;;  %v2986_v18 = vsel %vm2909_vm0, %v1756_v10, 0.0 }
  0x64   :  { %v2982_v20 = vadd.f32 %v2981_v17, %v2980_v16  ;;  %v2987_v21 = vadd.f32 %v2986_v18, %v2985_v55  ;;  %v1261_v22 = vsub.f32 %v313_v45, %v1133_v42  ;;  %v327_v23 = vrot.slane %v305_v12, %v4283_v11  ;;  %v1140_v12 = vld [vmem:[#allocation8 + $0x2e] sm:$0x3]  ;;  %v1141_v17 = vld [vmem:[#allocation8 + $0x30] sm:$0x3] }
  0x65   :  { %2968 = vadd.xlane.f32.xlu1 %v2967_v0  ;;  %v335_v29 = vcombine.high %v313_v45, %v313_v45  ;;  %v1265_v31 = vsub.f32 %v320_v13, %v1137_v14  ;;  %v334_v32 = vrot.slane %v306_v15, %v4283_v11  ;;  %v336_v34 = vcombine.high %v320_v13, %v320_v13 }
  0x66   :  { %v1389_v35 = vand.u32 2147483647, %v1261_v22  ;;  %v1262_v36 = vsub.f32 %v327_v23, %v1134_v19  ;;  %v337_v39 = vcombine.high %v327_v23, %v327_v23  ;;  %v347_v40 = vrot.slane %v339_v38, %v4283_v11 }
  0x67   :  { %2983 = vadd.xlane.f32.xlu0 %v2982_v20  ;;  %v1263_v41 = vsub.f32 %v335_v29, %v1135_v24  ;;  %v1393_v43 = vand.u32 2147483647, %v1265_v31  ;;  %v1266_v44 = vsub.f32 %v334_v32, %v1138_v26  ;;  %v1267_v46 = vsub.f32 %v336_v34, %v1139_v27  ;;  %v1142_v26 = vld [vmem:[#allocation8 + $0x32] sm:$0x3] }
  0x68   :  { %v1760_v48 = vrot.slane %v1389_v35, %v4289_v25  ;;  %v1764_v37 = vrot.slane %v1389_v35, %v4297_v33  ;;  %v1390_v49 = vand.u32 2147483647, %v1262_v36  ;;  %v1264_v50 = vsub.f32 %v337_v39, %v1136_v30  ;;  %v1144_v39 = vld [vmem:[#allocation8 + $0x36] sm:$0x3] }
  0x69   :  { %2988 = vadd.xlane.f32.xlu1 %v2987_v21  ;;  %v1391_v51 = vand.u32 2147483647, %v1263_v41  ;;  %v1792_v52 = vrot.slane %v1393_v43, %v4289_v25  ;;  %v1796_v47 = vrot.slane %v1393_v43, %v4297_v33  ;;  %v1394_v53 = vand.u32 2147483647, %v1266_v44 }
  0x6a   :  { %v2990_v57 = vsel %vm2909_vm0, %v1760_v48, 0.0  ;;  %v2991_v54 = vsel %vm2909_vm0, %v1764_v37, 0.0  ;;  %v1768_v56 = vrot.slane %v1390_v49, %v4289_v25  ;;  %v1772_v58 = vrot.slane %v1390_v49, %v4297_v33  ;;  %v1145_v48 = vld [vmem:[#allocation8 + $0x38] sm:$0x3] }
  0x6b   :  { %v2992_v59 = vadd.f32 %v2991_v54, %v2990_v57  ;;  %v1776_v60 = vrot.slane %v1391_v51, %v4289_v25  ;;  %v1780_v61 = vrot.slane %v1391_v51, %v4297_v33  ;;  %v1392_v62 = vand.u32 2147483647, %v1264_v50 }
  0x6c   :  { %v2995_v0 = vsel %vm2909_vm0, %v1768_v56, 0.0  ;;  %v2996_v1 = vsel %vm2909_vm0, %v1772_v58, 0.0  ;;  %v3010_v2 = vsel %vm2909_vm0, %v1792_v52, 0.0  ;;  %v3011_v3 = vsel %vm2909_vm0, %v1796_v47, 0.0 }
  0x6d   :  { %2993 = vadd.xlane.f32.xlu0 %v2992_v59  ;;  %v2997_v4 = vadd.f32 %v2996_v1, %v2995_v0  ;;  %v3000_v38 = vsel %vm2909_vm0, %v1776_v60, 0.0  ;;  %v3001_v7 = vsel %vm2909_vm0, %v1780_v61, 0.0  ;;  %v1784_v8 = vrot.slane %v1392_v62, %v4289_v25 }
  0x6e   :  { %v3002_v9 = vadd.f32 %v3001_v7, %v3000_v38  ;;  %v1788_v10 = vrot.slane %v1392_v62, %v4297_v33  ;;  %v3012_v42 = vadd.f32 %v3011_v3, %v3010_v2  ;;  %v1800_v45 = vrot.slane %v1394_v53, %v4289_v25 }
  0x6f   :  { %2998 = vadd.xlane.f32.xlu1 %v2997_v4  ;;  %v3005_v13 = vsel %vm2909_vm0, %v1784_v8, 0.0  ;;  %v1804_v14 = vrot.slane %v1394_v53, %v4297_v33  ;;  %v1395_v15 = vand.u32 2147483647, %v1267_v46  ;;  %v338_v16 = vcombine.high %v334_v32, %v334_v32  ;;  %v1143_v32 = vld [vmem:[#allocation8 + $0x34] sm:$0x3] }
  0x70   :  { %v3006_v55 = vsel %vm2909_vm0, %v1788_v10, 0.0  ;;  %v3015_v18 = vsel %vm2909_vm0, %v1800_v45, 0.0  ;;  %v363_v19 = vrot.slane %v347_v40, %v4283_v11  ;;  %v355_v20 = vcombine.high %v347_v40, %v347_v40  ;;  %v1146_v10 = vld [vmem:[#allocation8 + $0x3a] sm:$0x3]  ;;  %v1147_v45 = vld [vmem:[#allocation8 + $0x3c] sm:$0x3] }
  0x71   :  { %3003 = vadd.xlane.f32.xlu0 %v3002_v9  ;;  %v3007_v21 = vadd.f32 %v3006_v55, %v3005_v13  ;;  %v3016_v22 = vsel %vm2909_vm0, %v1804_v14, 0.0  ;;  %v1808_v23 = vrot.slane %v1395_v15, %v4289_v25  ;;  %v1812_v24 = vrot.slane %v1395_v15, %v4297_v33 }
  0x72   :  { %v3017_v27 = vadd.f32 %v3016_v22, %v3015_v18  ;;  %v1268_v29 = vsub.f32 %v338_v16, %v1140_v12  ;;  %v1269_v30 = vsub.f32 %v363_v19, %v1141_v17  ;;  %v377_v31 = vrot.slane %v355_v20, %v4283_v11  ;;  %v69_v16 = vld [vmem:[#allocation3 + $0x48] sm:$0xff] }
  0x73   :  { %3008 = vadd.xlane.f32.xlu1 %v3007_v21  ;;  %v3020_v34 = vsel %vm2909_vm0, %v1808_v23, 0.0  ;;  %v3021_v35 = vsel %vm2909_vm0, %v1812_v24, 0.0  ;;  %v385_v36 = vcombine.high %v363_v19, %v363_v19  ;;  %v354_v40 = vrot.slane %v340_v5, %v4283_v11  ;;  %v101_v17 = vld [vmem:[#allocation6 + $0x48] sm:$0xff] }
  0x74   :  { %v3022_v41 = vadd.f32 %v3021_v35, %v3020_v34  ;;  %v1396_v43 = vand.u32 2147483647, %v1268_v29  ;;  %v1397_v44 = vand.u32 2147483647, %v1269_v30  ;;  %v1270_v46 = vsub.f32 %v377_v31, %v1142_v26  ;;  %v1148_v26 = vld [vmem:[#allocation8 + $0x3e] sm:$0x3] }
  0x75   :  { %3013 = vadd.xlane.f32.xlu0 %v3012_v42  ;;  %v1271_v37 = vsub.f32 %v385_v36, %v1143_v32  ;;  %v387_v49 = vcombine.high %v377_v31, %v377_v31  ;;  %v370_v50 = vrot.slane %v354_v40, %v4283_v11  ;;  %v356_v51 = vcombine.high %v354_v40, %v354_v40  ;;  %v102_v29 = vld [vmem:[#allocation6 + $0x50] sm:$0xff] }
  0x76   :  { %v1816_v52 = vrot.slane %v1396_v43, %v4289_v25  ;;  %v1820_v47 = vrot.slane %v1396_v43, %v4297_v33  ;;  %v1824_v53 = vrot.slane %v1397_v44, %v4289_v25  ;;  %v1828_v63 = vrot.slane %v1397_v44, %v4297_v33  ;;  %v103_v43 = vld [vmem:[#allocation6 + $0x58] sm:$0xff] }
  0x77   :  { %3018 = vadd.xlane.f32.xlu1 %v3017_v27  ;;  %v1398_v28 = vand.u32 2147483647, %v1270_v46  ;;  %v1399_v5 = vand.u32 2147483647, %v1271_v37  ;;  %v1272_v57 = vsub.f32 %v387_v49, %v1144_v39  ;;  %v1273_v54 = vsub.f32 %v370_v50, %v1145_v48  ;;  %v70_v27 = vld [vmem:[#allocation3 + $0x50] sm:$0xff] }
  0x78   :  { %v3025_v56 = vsel %vm2909_vm0, %v1816_v52, 0.0  ;;  %v3026_v58 = vsel %vm2909_vm0, %v1820_v47, 0.0  ;;  %v3030_v59 = vsel %vm2909_vm0, %v1824_v53, 0.0  ;;  %v3031_v60 = vsel %vm2909_vm0, %v1828_v63, 0.0 }
  0x79   :  { %3023 = vadd.xlane.f32.xlu0 %v3022_v41  ;;  %v3027_v61 = vadd.f32 %v3026_v58, %v3025_v56  ;;  %v3032_v62 = vadd.f32 %v3031_v60, %v3030_v59  ;;  %v1832_v0 = vrot.slane %v1398_v28, %v4289_v25  ;;  %v1836_v1 = vrot.slane %v1398_v28, %v4297_v33  ;;  %v71_v41 = vld [vmem:[#allocation3 + $0x58] sm:$0xff] }
  0x7a   :  { %v1840_v2 = vrot.slane %v1399_v5, %v4289_v25  ;;  %v1844_v3 = vrot.slane %v1399_v5, %v4297_v33  ;;  %v1400_v4 = vand.u32 2147483647, %v1272_v57  ;;  %v1401_v38 = vand.u32 2147483647, %v1273_v54 }
  0x7b   :  { %3028 = vadd.xlane.f32.xlu1 %v3027_v61  ;;  %v3035_v7 = vsel %vm2909_vm0, %v1832_v0, 0.0  ;;  %v3036_v8 = vsel %vm2909_vm0, %v1836_v1, 0.0  ;;  %v384_v9 = vrot.slane %v356_v51, %v4283_v11  ;;  %v386_v42 = vcombine.high %v370_v50, %v370_v50  ;;  %v1149_v61 = vld [vmem:[#allocation8 + $0x40] sm:$0x3] }
  0x7c   :  { %v3037_v12 = vadd.f32 %v3036_v8, %v3035_v7  ;;  %v3040_v13 = vsel %vm2909_vm0, %v1840_v2, 0.0  ;;  %v3041_v14 = vsel %vm2909_vm0, %v1844_v3, 0.0  ;;  %v1848_v15 = vrot.slane %v1400_v4, %v4289_v25  ;;  %v1153_v2 = vld [vmem:[#allocation8 + $0x48] sm:$0x3]  ;;  %v1150_v7 = vld [vmem:[#allocation8 + $0x42] sm:$0x3] }
  0x7d   :  { %3033 = vadd.xlane.f32.xlu0 %v3032_v62  ;;  %v3042_v55 = vadd.f32 %v3041_v14, %v3040_v13  ;;  %v1852_v18 = vrot.slane %v1400_v4, %v4297_v33  ;;  %v1856_v19 = vrot.slane %v1401_v38, %v4289_v25  ;;  %v1860_v20 = vrot.slane %v1401_v38, %v4297_v33  ;;  %v1151_v8 = vld [vmem:[#allocation8 + $0x44] sm:$0x3]  ;;  %v1154_v14 = vld [vmem:[#allocation8 + $0x4a] sm:$0x3] }
  0x7e   :  { %v3045_v21 = vsel %vm2909_vm0, %v1848_v15, 0.0  ;;  %v1274_v22 = vsub.f32 %v384_v9, %v1146_v10  ;;  %v1275_v23 = vsub.f32 %v386_v42, %v1147_v45  ;;  %v388_v24 = vcombine.high %v384_v9, %v384_v9  ;;  %v1155_v15 = vld [vmem:[#allocation8 + $0x4c] sm:$0x3] }
  0x7f   :  { %3038 = vadd.xlane.f32.xlu1 %v3037_v12  ;;  %v3046_v30 = vsel %vm2909_vm0, %v1852_v18, 0.0  ;;  %v3050_v31 = vsel %vm2909_vm0, %v1856_v19, 0.0  ;;  %v3051_v32 = vsel %vm2909_vm0, %v1860_v20, 0.0  ;;  %v133_v34 = vadd.f32 %v101_v17, %v69_v16 }
  0x80   :  { %v3047_v35 = vadd.f32 %v3046_v30, %v3045_v21  ;;  %v3052_v36 = vadd.f32 %v3051_v32, %v3050_v31  ;;  %v1402_v39 = vand.u32 2147483647, %v1274_v22  ;;  %v1403_v40 = vand.u32 2147483647, %v1275_v23  ;;  %v1152_v23 = vld [vmem:[#allocation8 + $0x46] sm:$0x3] }
  0x81   :  { %3043 = vadd.xlane.f32.xlu0 %v3042_v55  ;;  %v1276_v44 = vsub.f32 %v388_v24, %v1148_v26  ;;  %v389_v46 = vcombine.low %v4406_v6, %v133_v34  ;;  %v390_v48 = vcombine.high %v4406_v6, %v133_v34  ;;  %v4483_v37 = vadd.f32 %v102_v29, %v70_v27 }
  0x82   :  { %v1864_v49 = vrot.slane %v1402_v39, %v4289_v25  ;;  %v1868_v50 = vrot.slane %v1402_v39, %v4297_v33  ;;  %v1872_v51 = vrot.slane %v1403_v40, %v4289_v25  ;;  %v1876_v52 = vrot.slane %v1403_v40, %v4297_v33 }
  0x83   :  { %3048 = vadd.xlane.f32.xlu1 %v3047_v35  ;;  %v1404_v47 = vand.u32 2147483647, %v1276_v44  ;;  %v397_v53 = vrot.slane %v389_v46, %v4283_v11  ;;  %v404_v63 = vrot.slane %v390_v48, %v4283_v11  ;;  %v4491_v28 = vadd.f32 %v103_v43, %v71_v41 }
  0x84   :  { %v3055_v6 = vsel %vm2909_vm0, %v1864_v49, 0.0  ;;  %v3056_v5 = vsel %vm2909_vm0, %v1868_v50, 0.0  ;;  %v3060_v57 = vsel %vm2909_vm0, %v1872_v51, 0.0  ;;  %v3061_v54 = vsel %vm2909_vm0, %v1876_v52, 0.0 }
  0x85   :  { %3053 = vadd.xlane.f32.xlu0 %v3052_v36  ;;  %v3057_v56 = vadd.f32 %v3056_v5, %v3055_v6  ;;  %v3062_v58 = vadd.f32 %v3061_v54, %v3060_v57  ;;  %v1880_v59 = vrot.slane %v1404_v47, %v4289_v25  ;;  %v1884_v60 = vrot.slane %v1404_v47, %v4297_v33  ;;  %v1156_v6 = vld [vmem:[#allocation8 + $0x4e] sm:$0x3] }
  0x86   :  { %v413_v62 = vrot.slane %v397_v53, %v4283_v11  ;;  %v405_v0 = vcombine.high %v397_v53, %v397_v53  ;;  %v420_v1 = vrot.slane %v404_v63, %v4283_v11  ;;  %v406_v3 = vcombine.high %v404_v63, %v404_v63 }
  0x87   :  { %3058 = vadd.xlane.f32.xlu1 %v3057_v56  ;;  %v3065_v4 = vsel %vm2909_vm0, %v1880_v59, 0.0  ;;  %v3066_v38 = vsel %vm2909_vm0, %v1884_v60, 0.0  ;;  %v439_v9 = vcombine.low %v4483_v37, %v4491_v28  ;;  %v440_v10 = vcombine.high %v4483_v37, %v4491_v28 }
  0x88   :  { %v3067_v42 = vadd.f32 %v3066_v38, %v3065_v4  ;;  %v1277_v45 = vsub.f32 %v413_v62, %v1149_v61  ;;  %v427_v12 = vrot.slane %v405_v0, %v4283_v11  ;;  %v435_v13 = vcombine.high %v413_v62, %v413_v62 }
  0x89   :  { %3063 = vadd.xlane.f32.xlu0 %v3062_v58  ;;  %v1281_v16 = vsub.f32 %v420_v1, %v1153_v2  ;;  %v434_v17 = vrot.slane %v406_v3, %v4283_v11  ;;  %v436_v55 = vcombine.high %v420_v1, %v420_v1  ;;  %v447_v18 = vrot.slane %v439_v9, %v4283_v11  ;;  %v1157_v3 = vld [vmem:[#allocation8 + $0x50] sm:$0x3] }
  0x8a   :  { %v1405_v19 = vand.u32 2147483647, %v1277_v45  ;;  %v1278_v20 = vsub.f32 %v427_v12, %v1150_v7  ;;  %v1279_v21 = vsub.f32 %v435_v13, %v1151_v8  ;;  %v437_v22 = vcombine.high %v427_v12, %v427_v12 }
  0x8b   :  { %3068 = vadd.xlane.f32.xlu1 %v3067_v42  ;;  %v1409_v24 = vand.u32 2147483647, %v1281_v16  ;;  %v1282_v26 = vsub.f32 %v434_v17, %v1154_v14  ;;  %v1283_v27 = vsub.f32 %v436_v55, %v1155_v15  ;;  %v438_v29 = vcombine.high %v434_v17, %v434_v17  ;;  %v1158_v17 = vld [vmem:[#allocation8 + $0x52] sm:$0x3]  ;;  %v1159_v55 = vld [vmem:[#allocation8 + $0x54] sm:$0x3] }
  0x8c   :  { %v1888_v30 = vrot.slane %v1405_v19, %v4289_v25  ;;  %v1892_v31 = vrot.slane %v1405_v19, %v4297_v33  ;;  %v1406_v32 = vand.u32 2147483647, %v1278_v20  ;;  %v1407_v34 = vand.u32 2147483647, %v1279_v21 }
  0x8d   :  { %v1280_v35 = vsub.f32 %v437_v22, %v1152_v23  ;;  %v1920_v36 = vrot.slane %v1409_v24, %v4289_v25  ;;  %v1924_v39 = vrot.slane %v1409_v24, %v4297_v33  ;;  %v1410_v40 = vand.u32 2147483647, %v1282_v26 }
  0x8e   :  { %v3070_v41 = vsel %vm2909_vm0, %v1888_v30, 0.0  ;;  %v3071_v43 = vsel %vm2909_vm0, %v1892_v31, 0.0  ;;  %v1896_v44 = vrot.slane %v1406_v32, %v4289_v25  ;;  %v1900_v46 = vrot.slane %v1406_v32, %v4297_v33 }
  0x8f   :  { %v3072_v48 = vadd.f32 %v3071_v43, %v3070_v41  ;;  %v1904_v49 = vrot.slane %v1407_v34, %v4289_v25  ;;  %v1908_v50 = vrot.slane %v1407_v34, %v4297_v33  ;;  %v1408_v51 = vand.u32 2147483647, %v1280_v35  ;;  %v1161_v34 = vld [vmem:[#allocation8 + $0x58] sm:$0x3] }
  0x90   :  { %v3075_v52 = vsel %vm2909_vm0, %v1896_v44, 0.0  ;;  %v3076_v47 = vsel %vm2909_vm0, %v1900_v46, 0.0  ;;  %v3090_v53 = vsel %vm2909_vm0, %v1920_v36, 0.0  ;;  %v3091_v63 = vsel %vm2909_vm0, %v1924_v39, 0.0 }
  0x91   :  { %3073 = vadd.xlane.f32.xlu0 %v3072_v48  ;;  %v3077_v5 = vadd.f32 %v3076_v47, %v3075_v52  ;;  %v3080_v57 = vsel %vm2909_vm0, %v1904_v49, 0.0  ;;  %v3081_v54 = vsel %vm2909_vm0, %v1908_v50, 0.0  ;;  %v1912_v56 = vrot.slane %v1408_v51, %v4289_v25 }
  0x92   :  { %v3082_v58 = vadd.f32 %v3081_v54, %v3080_v57  ;;  %v1916_v59 = vrot.slane %v1408_v51, %v4297_v33  ;;  %v3092_v60 = vadd.f32 %v3091_v63, %v3090_v53  ;;  %v1928_v61 = vrot.slane %v1410_v40, %v4289_v25 }
  0x93   :  { %3078 = vadd.xlane.f32.xlu1 %v3077_v5  ;;  %v3085_v62 = vsel %vm2909_vm0, %v1912_v56, 0.0  ;;  %v1932_v0 = vrot.slane %v1410_v40, %v4297_v33  ;;  %v1411_v1 = vand.u32 2147483647, %v1283_v27  ;;  %v1284_v2 = vsub.f32 %v438_v29, %v1156_v6  ;;  %v1160_v27 = vld [vmem:[#allocation8 + $0x56] sm:$0x3] }
  0x94   :  { %v3086_v4 = vsel %vm2909_vm0, %v1916_v59, 0.0  ;;  %v3095_v38 = vsel %vm2909_vm0, %v1928_v61, 0.0  ;;  %v463_v7 = vrot.slane %v447_v18, %v4283_v11  ;;  %v455_v8 = vcombine.high %v447_v18, %v447_v18  ;;  %v1162_v5 = vld [vmem:[#allocation8 + $0x5a] sm:$0x3]  ;;  %v1163_v59 = vld [vmem:[#allocation8 + $0x5c] sm:$0x3] }
  0x95   :  { %3083 = vadd.xlane.f32.xlu0 %v3082_v58  ;;  %v3087_v9 = vadd.f32 %v3086_v4, %v3085_v62  ;;  %v3096_v42 = vsel %vm2909_vm0, %v1932_v0, 0.0  ;;  %v1936_v45 = vrot.slane %v1411_v1, %v4289_v25  ;;  %v1940_v12 = vrot.slane %v1411_v1, %v4297_v33  ;;  %v72_v1 = vld [vmem:[#allocation3 + $0x60] sm:$0xff] }
  0x96   :  { %v3097_v13 = vadd.f32 %v3096_v42, %v3095_v38  ;;  %v1412_v14 = vand.u32 2147483647, %v1284_v2  ;;  %v1285_v15 = vsub.f32 %v463_v7, %v1157_v3  ;;  %v477_v16 = vrot.slane %v455_v8, %v4283_v11  ;;  %v73_v8 = vld [vmem:[#allocation3 + $0x68] sm:$0xff] }
  0x97   :  { %3088 = vadd.xlane.f32.xlu1 %v3087_v9  ;;  %v3100_v19 = vsel %vm2909_vm0, %v1936_v45, 0.0  ;;  %v3101_v18 = vsel %vm2909_vm0, %v1940_v12, 0.0  ;;  %v485_v20 = vcombine.high %v463_v7, %v463_v7  ;;  %v454_v21 = vrot.slane %v440_v10, %v4283_v11  ;;  %v1164_v7 = vld [vmem:[#allocation8 + $0x5e] sm:$0x3]  ;;  %v104_v9 = vld [vmem:[#allocation6 + $0x60] sm:$0xff] }
  0x98   :  { %v3102_v22 = vadd.f32 %v3101_v18, %v3100_v19  ;;  %v1944_v23 = vrot.slane %v1412_v14, %v4289_v25  ;;  %v1948_v24 = vrot.slane %v1412_v14, %v4297_v33  ;;  %v1413_v26 = vand.u32 2147483647, %v1285_v15  ;;  %v105_v14 = vld [vmem:[#allocation6 + $0x68] sm:$0xff]  ;;  %v74_v15 = vld [vmem:[#allocation3 + $0x70] sm:$0xff] }
  0x99   :  { %3093 = vadd.xlane.f32.xlu0 %v3092_v60  ;;  %v1286_v29 = vsub.f32 %v477_v16, %v1158_v17  ;;  %v1287_v30 = vsub.f32 %v485_v20, %v1159_v55  ;;  %v487_v31 = vcombine.high %v477_v16, %v477_v16  ;;  %v470_v32 = vrot.slane %v454_v21, %v4283_v11  ;;  %v106_v16 = vld [vmem:[#allocation6 + $0x70] sm:$0xff]  ;;  %v75_v20 = vld [vmem:[#allocation3 + $0x78] sm:$0xff] }
  0x9a   :  { %v3105_v35 = vsel %vm2909_vm0, %v1944_v23, 0.0  ;;  %v3106_v36 = vsel %vm2909_vm0, %v1948_v24, 0.0  ;;  %v1952_v37 = vrot.slane %v1413_v26, %v4289_v25  ;;  %v1956_v28 = vrot.slane %v1413_v26, %v4297_v33 }
  0x9b   :  { %3098 = vadd.xlane.f32.xlu1 %v3097_v13  ;;  %v3107_v10 = vadd.f32 %v3106_v36, %v3105_v35  ;;  %v1414_v39 = vand.u32 2147483647, %v1286_v29  ;;  %v1415_v40 = vand.u32 2147483647, %v1287_v30  ;;  %v1288_v41 = vsub.f32 %v487_v31, %v1160_v27 }
  0x9c   :  { %v3110_v43 = vsel %vm2909_vm0, %v1952_v37, 0.0  ;;  %v3111_v44 = vsel %vm2909_vm0, %v1956_v28, 0.0  ;;  %v1289_v46 = vsub.f32 %v470_v32, %v1161_v34  ;;  %v456_v48 = vcombine.high %v454_v21, %v454_v21  ;;  %v107_v21 = vld [vmem:[#allocation6 + $0x78] sm:$0xff] }
  0x9d   :  { %3103 = vadd.xlane.f32.xlu0 %v3102_v22  ;;  %v3112_v49 = vadd.f32 %v3111_v44, %v3110_v43  ;;  %v1960_v50 = vrot.slane %v1414_v39, %v4289_v25  ;;  %v1964_v51 = vrot.slane %v1414_v39, %v4297_v33  ;;  %v1968_v52 = vrot.slane %v1415_v40, %v4289_v25 }
  0x9e   :  { %v1972_v47 = vrot.slane %v1415_v40, %v4297_v33  ;;  %v1416_v53 = vand.u32 2147483647, %v1288_v41  ;;  %v1417_v63 = vand.u32 2147483647, %v1289_v46  ;;  %v484_v6 = vrot.slane %v456_v48, %v4283_v11  ;;  %v76_v40 = vld [vmem:[#allocation3 + $0x80] sm:$0xff] }
  0x9f   :  { %3108 = vadd.xlane.f32.xlu1 %v3107_v10  ;;  %v3115_v57 = vsel %vm2909_vm0, %v1960_v50, 0.0  ;;  %v3116_v54 = vsel %vm2909_vm0, %v1964_v51, 0.0  ;;  %v3120_v56 = vsel %vm2909_vm0, %v1968_v52, 0.0  ;;  %v486_v58 = vcombine.high %v470_v32, %v470_v32  ;;  %v108_v41 = vld [vmem:[#allocation6 + $0x80] sm:$0xff] }
  0xa0   :  { %v3117_v60 = vadd.f32 %v3116_v54, %v3115_v57  ;;  %v3121_v61 = vsel %vm2909_vm0, %v1972_v47, 0.0  ;;  %v1976_v62 = vrot.slane %v1416_v53, %v4289_v25  ;;  %v1980_v0 = vrot.slane %v1416_v53, %v4297_v33  ;;  %v1165_v53 = vld [vmem:[#allocation8 + $0x60] sm:$0x3] }
  0xa1   :  { %3113 = vadd.xlane.f32.xlu0 %v3112_v49  ;;  %v3122_v2 = vadd.f32 %v3121_v61, %v3120_v56  ;;  %v1984_v3 = vrot.slane %v1417_v63, %v4289_v25  ;;  %v1988_v4 = vrot.slane %v1417_v63, %v4297_v33  ;;  %v1290_v38 = vsub.f32 %v484_v6, %v1162_v5  ;;  %v1169_v63 = vld [vmem:[#allocation8 + $0x68] sm:$0x3]  ;;  %v1166_v61 = vld [vmem:[#allocation8 + $0x62] sm:$0x3] }
  0xa2   :  { %v3125_v42 = vsel %vm2909_vm0, %v1976_v62, 0.0  ;;  %v3126_v45 = vsel %vm2909_vm0, %v1980_v0, 0.0  ;;  %v1291_v12 = vsub.f32 %v486_v58, %v1163_v59  ;;  %v488_v13 = vcombine.high %v484_v6, %v484_v6  ;;  %v1167_v62 = vld [vmem:[#allocation8 + $0x64] sm:$0x3] }
  0xa3   :  { %3118 = vadd.xlane.f32.xlu1 %v3117_v60  ;;  %v3127_v17 = vadd.f32 %v3126_v45, %v3125_v42  ;;  %v3130_v55 = vsel %vm2909_vm0, %v1984_v3, 0.0  ;;  %v3131_v19 = vsel %vm2909_vm0, %v1988_v4, 0.0  ;;  %v1418_v18 = vand.u32 2147483647, %v1290_v38 }
  0xa4   :  { %v3132_v22 = vadd.f32 %v3131_v19, %v3130_v55  ;;  %v1419_v23 = vand.u32 2147483647, %v1291_v12  ;;  %v1292_v24 = vsub.f32 %v488_v13, %v1164_v7  ;;  %v136_v26 = vadd.f32 %v104_v9, %v72_v1  ;;  %v1171_v9 = vld [vmem:[#allocation8 + $0x6c] sm:$0x3]  ;;  %v1168_v55 = vld [vmem:[#allocation8 + $0x66] sm:$0x3] }
  0xa5   :  { %3123 = vadd.xlane.f32.xlu0 %v3122_v2  ;;  %v1992_v27 = vrot.slane %v1418_v18, %v4289_v25  ;;  %v1996_v29 = vrot.slane %v1418_v18, %v4297_v33  ;;  %v137_v30 = vadd.f32 %v105_v14, %v73_v8  ;;  %v138_v31 = vadd.f32 %v106_v16, %v74_v15  ;;  %v1170_v8 = vld [vmem:[#allocation8 + $0x6a] sm:$0x3] }
  0xa6   :  { %v2000_v32 = vrot.slane %v1419_v23, %v4289_v25  ;;  %v2004_v34 = vrot.slane %v1419_v23, %v4297_v33  ;;  %v1420_v35 = vand.u32 2147483647, %v1292_v24  ;;  %v139_v36 = vadd.f32 %v107_v21, %v75_v20 }
  0xa7   :  { %3128 = vadd.xlane.f32.xlu1 %v3127_v17  ;;  %v3135_v37 = vsel %vm2909_vm0, %v1992_v27, 0.0  ;;  %v3136_v28 = vsel %vm2909_vm0, %v1996_v29, 0.0  ;;  %v489_v10 = vcombine.low %v136_v26, %v137_v30  ;;  %v490_v39 = vcombine.high %v136_v26, %v137_v30 }
  0xa8   :  { %v3137_v43 = vadd.f32 %v3136_v28, %v3135_v37  ;;  %v3140_v44 = vsel %vm2909_vm0, %v2000_v32, 0.0  ;;  %v3141_v46 = vsel %vm2909_vm0, %v2004_v34, 0.0  ;;  %v2008_v48 = vrot.slane %v1420_v35, %v4289_v25 }
  0xa9   :  { %3133 = vadd.xlane.f32.xlu0 %v3132_v22  ;;  %v3142_v49 = vadd.f32 %v3141_v46, %v3140_v44  ;;  %v2012_v50 = vrot.slane %v1420_v35, %v4297_v33  ;;  %v497_v51 = vrot.slane %v489_v10, %v4283_v11  ;;  %v504_v52 = vrot.slane %v490_v39, %v4283_v11  ;;  %v1172_v46 = vld [vmem:[#allocation8 + $0x6e] sm:$0x3] }
  0xaa   :  { %v3145_v47 = vsel %vm2909_vm0, %v2008_v48, 0.0  ;;  %v539_v6 = vcombine.low %v138_v31, %v139_v36  ;;  %v540_v5 = vcombine.high %v138_v31, %v139_v36  ;;  %v4583_v57 = vadd.f32 %v108_v41, %v76_v40 }
  0xab   :  { %3138 = vadd.xlane.f32.xlu1 %v3137_v43  ;;  %v3146_v54 = vsel %vm2909_vm0, %v2012_v50, 0.0  ;;  %v513_v56 = vrot.slane %v497_v51, %v4283_v11  ;;  %v505_v58 = vcombine.high %v497_v51, %v497_v51  ;;  %v520_v59 = vrot.slane %v504_v52, %v4283_v11 }
  0xac   :  { %v3147_v60 = vadd.f32 %v3146_v54, %v3145_v47  ;;  %v506_v0 = vcombine.high %v504_v52, %v504_v52  ;;  %v4589_v1 = vrot.slane %v539_v6, %v4283_v11  ;;  %v4592_v2 = vrot.slane %v540_v5, %v4283_v11  ;;  %v1173_v52 = vld [vmem:[#allocation8 + $0x70] sm:$0x3] }
  0xad   :  { %3143 = vadd.xlane.f32.xlu0 %v3142_v49  ;;  %v1293_v3 = vsub.f32 %v513_v56, %v1165_v53  ;;  %v527_v4 = vrot.slane %v505_v58, %v4283_v11  ;;  %v535_v38 = vcombine.high %v513_v56, %v513_v56  ;;  %v1297_v7 = vsub.f32 %v520_v59, %v1169_v63 }
  0xae   :  { %v534_v42 = vrot.slane %v506_v0, %v4283_v11  ;;  %v536_v45 = vcombine.high %v520_v59, %v520_v59  ;;  %v4598_v12 = vrot.slane %v4589_v1, %v4283_v11  ;;  %v555_v13 = vcombine.high %v4589_v1, %v4589_v1  ;;  %v1174_v59 = vld [vmem:[#allocation8 + $0x72] sm:$0x3] }
  0xaf   :  { %3148 = vadd.xlane.f32.xlu1 %v3147_v60  ;;  %v1421_v14 = vand.u32 2147483647, %v1293_v3  ;;  %v1294_v15 = vsub.f32 %v527_v4, %v1166_v61  ;;  %v1295_v16 = vsub.f32 %v535_v38, %v1167_v62  ;;  %v537_v17 = vcombine.high %v527_v4, %v527_v4 }
  0xb0   :  { %v1425_v19 = vand.u32 2147483647, %v1297_v7  ;;  %v1298_v18 = vsub.f32 %v534_v42, %v1170_v8  ;;  %v1299_v20 = vsub.f32 %v536_v45, %v1171_v9  ;;  %v538_v21 = vcombine.high %v534_v42, %v534_v42  ;;  %v1175_v7 = vld [vmem:[#allocation8 + $0x74] sm:$0x3] }
  0xb1   :  { %v2016_v22 = vrot.slane %v1421_v14, %v4289_v25  ;;  %v2020_v23 = vrot.slane %v1421_v14, %v4297_v33  ;;  %v1422_v24 = vand.u32 2147483647, %v1294_v15  ;;  %v1423_v26 = vand.u32 2147483647, %v1295_v16  ;;  %v1176_v14 = vld [vmem:[#allocation8 + $0x76] sm:$0x3] }
  0xb2   :  { %v1296_v27 = vsub.f32 %v537_v17, %v1168_v55  ;;  %v2048_v29 = vrot.slane %v1425_v19, %v4289_v25  ;;  %v2052_v30 = vrot.slane %v1425_v19, %v4297_v33  ;;  %v1426_v31 = vand.u32 2147483647, %v1298_v18 }
  0xb3   :  { %v3150_v32 = vsel %vm2909_vm0, %v2016_v22, 0.0  ;;  %v3151_v34 = vsel %vm2909_vm0, %v2020_v23, 0.0  ;;  %v2024_v35 = vrot.slane %v1422_v24, %v4289_v25  ;;  %v2028_v36 = vrot.slane %v1422_v24, %v4297_v33 }
  0xb4   :  { %v3152_v37 = vadd.f32 %v3151_v34, %v3150_v32  ;;  %v2032_v28 = vrot.slane %v1423_v26, %v4289_v25  ;;  %v2036_v10 = vrot.slane %v1423_v26, %v4297_v33  ;;  %v1424_v39 = vand.u32 2147483647, %v1296_v27  ;;  %v1177_v26 = vld [vmem:[#allocation8 + $0x78] sm:$0x3] }
  0xb5   :  { %v3155_v40 = vsel %vm2909_vm0, %v2024_v35, 0.0  ;;  %v3156_v41 = vsel %vm2909_vm0, %v2028_v36, 0.0  ;;  %v3170_v43 = vsel %vm2909_vm0, %v2048_v29, 0.0  ;;  %v3171_v44 = vsel %vm2909_vm0, %v2052_v30, 0.0 }
  0xb6   :  { %3153 = vadd.xlane.f32.xlu0 %v3152_v37  ;;  %v3157_v48 = vadd.f32 %v3156_v41, %v3155_v40  ;;  %v3160_v49 = vsel %vm2909_vm0, %v2032_v28, 0.0  ;;  %v3161_v50 = vsel %vm2909_vm0, %v2036_v10, 0.0  ;;  %v2040_v51 = vrot.slane %v1424_v39, %v4289_v25 }
  0xb7   :  { %v3162_v47 = vadd.f32 %v3161_v50, %v3160_v49  ;;  %v2044_v53 = vrot.slane %v1424_v39, %v4297_v33  ;;  %v3172_v63 = vadd.f32 %v3171_v44, %v3170_v43  ;;  %v2056_v6 = vrot.slane %v1426_v31, %v4289_v25  ;;  %v1179_v39 = vld [vmem:[#allocation8 + $0x7c] sm:$0x3] }
  0xb8   :  { %3158 = vadd.xlane.f32.xlu1 %v3157_v48  ;;  %v3165_v5 = vsel %vm2909_vm0, %v2040_v51, 0.0  ;;  %v2060_v54 = vrot.slane %v1426_v31, %v4297_v33  ;;  %v1427_v56 = vand.u32 2147483647, %v1299_v20  ;;  %v1300_v58 = vsub.f32 %v538_v21, %v1172_v46  ;;  %v77_v46 = vld [vmem:[#allocation3 + $0x88] sm:$0xff] }
  0xb9   :  { %v3166_v60 = vsel %vm2909_vm0, %v2044_v53, 0.0  ;;  %v3175_v61 = vsel %vm2909_vm0, %v2056_v6, 0.0  ;;  %v1301_v62 = vsub.f32 %v4598_v12, %v1173_v52  ;;  %v577_v0 = vrot.slane %v555_v13, %v4283_v11  ;;  %v109_v48 = vld [vmem:[#allocation6 + $0x88] sm:$0xff]  ;;  %v1178_v6 = vld [vmem:[#allocation8 + $0x7a] sm:$0x3] }
  0xba   :  { %3163 = vadd.xlane.f32.xlu0 %v3162_v47  ;;  %v3167_v1 = vadd.f32 %v3166_v60, %v3165_v5  ;;  %v3176_v3 = vsel %vm2909_vm0, %v2060_v54, 0.0  ;;  %v2064_v4 = vrot.slane %v1427_v56, %v4289_v25  ;;  %v2068_v38 = vrot.slane %v1427_v56, %v4297_v33 }
  0xbb   :  { %v3177_v8 = vadd.f32 %v3176_v3, %v3175_v61  ;;  %v1428_v9 = vand.u32 2147483647, %v1300_v58  ;;  %v1429_v42 = vand.u32 2147483647, %v1301_v62  ;;  %v1302_v45 = vsub.f32 %v577_v0, %v1174_v59 }
  0xbc   :  { %3168 = vadd.xlane.f32.xlu1 %v3167_v1  ;;  %v3180_v15 = vsel %vm2909_vm0, %v2064_v4, 0.0  ;;  %v3181_v16 = vsel %vm2909_vm0, %v2068_v38, 0.0  ;;  %v585_v13 = vcombine.high %v4598_v12, %v4598_v12  ;;  %v587_v17 = vcombine.high %v577_v0, %v577_v0  ;;  %v1180_v38 = vld [vmem:[#allocation8 + $0x7e] sm:$0x3] }
  0xbd   :  { %v3182_v55 = vadd.f32 %v3181_v16, %v3180_v15  ;;  %v2072_v19 = vrot.slane %v1428_v9, %v4289_v25  ;;  %v2076_v18 = vrot.slane %v1428_v9, %v4297_v33  ;;  %v2080_v20 = vrot.slane %v1429_v42, %v4289_v25 }
  0xbe   :  { %3173 = vadd.xlane.f32.xlu0 %v3172_v63  ;;  %v2084_v21 = vrot.slane %v1429_v42, %v4297_v33  ;;  %v1430_v22 = vand.u32 2147483647, %v1302_v45  ;;  %v1303_v23 = vsub.f32 %v585_v13, %v1175_v7  ;;  %v1304_v24 = vsub.f32 %v587_v17, %v1176_v14 }
  0xbf   :  { %v3185_v27 = vsel %vm2909_vm0, %v2072_v19, 0.0  ;;  %v3186_v29 = vsel %vm2909_vm0, %v2076_v18, 0.0  ;;  %v3190_v12 = vsel %vm2909_vm0, %v2080_v20, 0.0  ;;  %v570_v30 = vrot.slane %v4592_v2, %v4283_v11 }
  0xc0   :  { %3178 = vadd.xlane.f32.xlu1 %v3177_v8  ;;  %v3187_v31 = vadd.f32 %v3186_v29, %v3185_v27  ;;  %v3191_v32 = vsel %vm2909_vm0, %v2084_v21, 0.0  ;;  %v2088_v34 = vrot.slane %v1430_v22, %v4289_v25  ;;  %v2092_v35 = vrot.slane %v1430_v22, %v4297_v33  ;;  %v1181_v21 = vld [vmem:[#allocation8 + $0x80] sm:$0x3]  ;;  %v1185_v27 = vld [vmem:[#allocation8 + $0x88] sm:$0x3] }
  0xc1   :  { %v3192_v36 = vadd.f32 %v3191_v32, %v3190_v12  ;;  %v1431_v37 = vand.u32 2147483647, %v1303_v23  ;;  %v1432_v28 = vand.u32 2147483647, %v1304_v24  ;;  %v1305_v10 = vsub.f32 %v570_v30, %v1177_v26 }
  0xc2   :  { %3183 = vadd.xlane.f32.xlu0 %v3182_v55  ;;  %v3195_v40 = vsel %vm2909_vm0, %v2088_v34, 0.0  ;;  %v3196_v41 = vsel %vm2909_vm0, %v2092_v35, 0.0  ;;  %v556_v43 = vcombine.high %v4592_v2, %v4592_v2  ;;  %v586_v44 = vcombine.high %v570_v30, %v570_v30 }
  0xc3   :  { %v3197_v49 = vadd.f32 %v3196_v41, %v3195_v40  ;;  %v2096_v50 = vrot.slane %v1431_v37, %v4289_v25  ;;  %v2100_v51 = vrot.slane %v1431_v37, %v4297_v33  ;;  %v2104_v52 = vrot.slane %v1432_v28, %v4289_v25  ;;  %v1182_v37 = vld [vmem:[#allocation8 + $0x82] sm:$0x3]  ;;  %v1184_v40 = vld [vmem:[#allocation8 + $0x86] sm:$0x3] }
  0xc4   :  { %3188 = vadd.xlane.f32.xlu1 %v3187_v31  ;;  %v2108_v47 = vrot.slane %v1432_v28, %v4297_v33  ;;  %v1433_v53 = vand.u32 2147483647, %v1305_v10  ;;  %v584_v63 = vrot.slane %v556_v43, %v4283_v11  ;;  %v1307_v5 = vsub.f32 %v586_v44, %v1179_v39  ;;  %v1183_v28 = vld [vmem:[#allocation8 + $0x84] sm:$0x3]  ;;  %v1186_v44 = vld [vmem:[#allocation8 + $0x8a] sm:$0x3] }
  0xc5   :  { %v3200_v2 = vsel %vm2909_vm0, %v2096_v50, 0.0  ;;  %v3201_v54 = vsel %vm2909_vm0, %v2100_v51, 0.0  ;;  %v3205_v56 = vsel %vm2909_vm0, %v2104_v52, 0.0  ;;  %v141_v58 = vadd.f32 %v109_v48, %v77_v46  ;;  %v1187_v51 = vld [vmem:[#allocation8 + $0x8c] sm:$0x3] }
  0xc6   :  { %3193 = vadd.xlane.f32.xlu0 %v3192_v36  ;;  %v3202_v59 = vadd.f32 %v3201_v54, %v3200_v2  ;;  %v3206_v60 = vsel %vm2909_vm0, %v2108_v47, 0.0  ;;  %v2112_v61 = vrot.slane %v1433_v53, %v4289_v25  ;;  %v2116_v62 = vrot.slane %v1433_v53, %v4297_v33 }
  0xc7   :  { %v3207_v0 = vadd.f32 %v3206_v60, %v3205_v56  ;;  %v1306_v1 = vsub.f32 %v584_v63, %v1178_v6  ;;  %v1435_v3 = vand.u32 2147483647, %v1307_v5  ;;  %v588_v4 = vcombine.high %v584_v63, %v584_v63 }
  0xc8   :  { %3198 = vadd.xlane.f32.xlu1 %v3197_v49  ;;  %v3210_v7 = vsel %vm2909_vm0, %v2112_v61, 0.0  ;;  %v3211_v8 = vsel %vm2909_vm0, %v2116_v62, 0.0  ;;  %v589_v9 = vcombine.low %v4583_v57, %v141_v58  ;;  %v590_v42 = vcombine.high %v4583_v57, %v141_v58 }
  0xc9   :  { %v1434_v45 = vand.u32 2147483647, %v1306_v1  ;;  %v2128_v14 = vrot.slane %v1435_v3, %v4289_v25  ;;  %v2132_v15 = vrot.slane %v1435_v3, %v4297_v33  ;;  %v3212_v16 = vadd.f32 %v3211_v8, %v3210_v7 }
  0xca   :  { %3203 = vadd.xlane.f32.xlu0 %v3202_v59  ;;  %v1308_v13 = vsub.f32 %v588_v4, %v1180_v38  ;;  %v597_v17 = vrot.slane %v589_v9, %v4283_v11  ;;  %v604_v55 = vrot.slane %v590_v42, %v4283_v11 }
  0xcb   :  { %v2120_v19 = vrot.slane %v1434_v45, %v4289_v25  ;;  %v2124_v18 = vrot.slane %v1434_v45, %v4297_v33  ;;  %v3220_v20 = vsel %vm2909_vm0, %v2128_v14, 0.0  ;;  %v3221_v57 = vsel %vm2909_vm0, %v2132_v15, 0.0 }
  0xcc   :  { %3208 = vadd.xlane.f32.xlu1 %v3207_v0  ;;  %v3222_v22 = vadd.f32 %v3221_v57, %v3220_v20  ;;  %v1436_v23 = vand.u32 2147483647, %v1308_v13  ;;  %v613_v24 = vrot.slane %v597_v17, %v4283_v11  ;;  %v605_v26 = vcombine.high %v597_v17, %v597_v17  ;;  %v1188_v20 = vld [vmem:[#allocation8 + $0x8e] sm:$0x3] }
  0xcd   :  { %v3215_v29 = vsel %vm2909_vm0, %v2120_v19, 0.0  ;;  %v3216_v12 = vsel %vm2909_vm0, %v2124_v18, 0.0  ;;  %v620_v30 = vrot.slane %v604_v55, %v4283_v11  ;;  %v606_v31 = vcombine.high %v604_v55, %v604_v55 }
  0xce   :  { %3213 = vadd.xlane.f32.xlu0 %v3212_v16  ;;  %v3217_v32 = vadd.f32 %v3216_v12, %v3215_v29  ;;  %v2136_v34 = vrot.slane %v1436_v23, %v4289_v25  ;;  %v2140_v35 = vrot.slane %v1436_v23, %v4297_v33  ;;  %v1309_v36 = vsub.f32 %v613_v24, %v1181_v21 }
  0xcf   :  { %v627_v10 = vrot.slane %v605_v26, %v4283_v11  ;;  %v635_v39 = vcombine.high %v613_v24, %v613_v24  ;;  %v1313_v41 = vsub.f32 %v620_v30, %v1185_v27  ;;  %v4681_v43 = vrot.slane %v606_v31, %v4283_v11  ;;  %v78_v24 = vld [vmem:[#allocation3 + $0x90] sm:$0xff]  ;;  %v79_v31 = vld [vmem:[#allocation3 + $0x98] sm:$0xff] }
  0xd0   :  { %3218 = vadd.xlane.f32.xlu1 %v3217_v32  ;;  %v3225_v46 = vsel %vm2909_vm0, %v2136_v34, 0.0  ;;  %v3226_v48 = vsel %vm2909_vm0, %v2140_v35, 0.0  ;;  %v1437_v49 = vand.u32 2147483647, %v1309_v36  ;;  %v636_v50 = vcombine.high %v620_v30, %v620_v30  ;;  %v110_v26 = vld [vmem:[#allocation6 + $0x90] sm:$0xff]  ;;  %v111_v32 = vld [vmem:[#allocation6 + $0x98] sm:$0xff] }
  0xd1   :  { %v3227_v52 = vadd.f32 %v3226_v48, %v3225_v46  ;;  %v1310_v47 = vsub.f32 %v627_v10, %v1182_v37  ;;  %v1311_v53 = vsub.f32 %v635_v39, %v1183_v28  ;;  %v637_v63 = vcombine.high %v627_v10, %v627_v10 }
  0xd2   :  { %3223 = vadd.xlane.f32.xlu0 %v3222_v22  ;;  %v2144_v6 = vrot.slane %v1437_v49, %v4289_v25  ;;  %v2148_v5 = vrot.slane %v1437_v49, %v4297_v33  ;;  %v1441_v2 = vand.u32 2147483647, %v1313_v41  ;;  %v1314_v54 = vsub.f32 %v4681_v43, %v1186_v44 }
  0xd3   :  { %v1438_v56 = vand.u32 2147483647, %v1310_v47  ;;  %v1439_v58 = vand.u32 2147483647, %v1311_v53  ;;  %v1312_v59 = vsub.f32 %v637_v63, %v1184_v40  ;;  %v1315_v60 = vsub.f32 %v636_v50, %v1187_v51 }
  0xd4   :  { %3228 = vadd.xlane.f32.xlu1 %v3227_v52  ;;  %v3230_v61 = vsel %vm2909_vm0, %v2144_v6, 0.0  ;;  %v3231_v62 = vsel %vm2909_vm0, %v2148_v5, 0.0  ;;  %v2176_v0 = vrot.slane %v1441_v2, %v4289_v25  ;;  %v2180_v1 = vrot.slane %v1441_v2, %v4297_v33 }
  0xd5   :  { %v3232_v3 = vadd.f32 %v3231_v62, %v3230_v61  ;;  %v2152_v4 = vrot.slane %v1438_v56, %v4289_v25  ;;  %v2156_v38 = vrot.slane %v1438_v56, %v4297_v33  ;;  %v2160_v7 = vrot.slane %v1439_v58, %v4289_v25 }
  0xd6   :  { %v2164_v8 = vrot.slane %v1439_v58, %v4297_v33  ;;  %v1440_v9 = vand.u32 2147483647, %v1312_v59  ;;  %v3250_v42 = vsel %vm2909_vm0, %v2176_v0, 0.0  ;;  %v3251_v16 = vsel %vm2909_vm0, %v2180_v1, 0.0  ;;  %v1189_v59 = vld [vmem:[#allocation8 + $0x90] sm:$0x3] }
  0xd7   :  { %3233 = vadd.xlane.f32.xlu0 %v3232_v3  ;;  %v3235_v45 = vsel %vm2909_vm0, %v2152_v4, 0.0  ;;  %v3236_v14 = vsel %vm2909_vm0, %v2156_v38, 0.0  ;;  %v3240_v15 = vsel %vm2909_vm0, %v2160_v7, 0.0  ;;  %v1442_v21 = vand.u32 2147483647, %v1314_v54 }
  0xd8   :  { %v4701_v13 = vpop.xlane.xlu0 %2913  ;;  %v3237_v17 = vadd.f32 %v3236_v14, %v3235_v45  ;;  %v3241_v55 = vsel %vm2909_vm0, %v2164_v8, 0.0  ;;  %v2168_v19 = vrot.slane %v1440_v9, %v4289_v25  ;;  %v2172_v18 = vrot.slane %v1440_v9, %v4297_v33  ;;  %v1190_v3 = vld [vmem:[#allocation8 + $0x92] sm:$0x3]  ;;  %v1191_v4 = vld [vmem:[#allocation8 + $0x94] sm:$0x3]  ;;  %v80_v14 = vld [vmem:[#allocation3 + $0xa0] sm:$0xff] }
  0xd9   :  { %v3242_v57 = vadd.f32 %v3241_v55, %v3240_v15  ;;  %v1443_v22 = vand.u32 2147483647, %v1315_v60  ;;  %v3252_v12 = vadd.f32 %v3251_v16, %v3250_v42  ;;  %v638_v30 = vcombine.high %v4681_v43, %v4681_v43  ;;  %v1193_v42 = vld [vmem:[#allocation8 + $0x98] sm:$0x3]  ;;  %v112_v15 = vld [vmem:[#allocation6 + $0xa0] sm:$0xff] }
  0xda   :  { %v4706_v23 = vpop.xlane.xlu1 %2923  ;;  %3238 = vadd.xlane.f32.xlu1 %v3237_v17  ;;  %v3245_v27 = vsel %vm2909_vm0, %v2168_v19, 0.0  ;;  %v3246_v29 = vsel %vm2909_vm0, %v2172_v18, 0.0  ;;  %v2184_v35 = vrot.slane %v1442_v21, %v4289_v25  ;;  %v2188_v36 = vrot.slane %v1442_v21, %v4297_v33  ;;  %v1192_v16 = vld [vmem:[#allocation8 + $0x96] sm:$0x3]  ;;  %v1195_v21 = vld [vmem:[#allocation8 + $0x9c] sm:$0x3] }
  0xdb   :  { %3243 = vadd.xlane.f32.xlu0 %v3242_v57  ;;  %v3247_v34 = vadd.f32 %v3246_v29, %v3245_v27  ;;  %v2192_v37 = vrot.slane %v1443_v22, %v4289_v25  ;;  %v2196_v10 = vrot.slane %v1443_v22, %v4297_v33  ;;  %v1316_v39 = vsub.f32 %v638_v30, %v1188_v20  ;;  %v1194_v57 = vld [vmem:[#allocation8 + $0x9a] sm:$0x3] }
  0xdc   :  { %v4715_v28 = vpop.xlane.xlu0 %2933  ;;  %v142_v40 = vadd.f32 %v110_v26, %v78_v24  ;;  %v3255_v41 = vsel %vm2909_vm0, %v2184_v35, 0.0  ;;  %v3256_v43 = vsel %vm2909_vm0, %v2188_v36, 0.0  ;;  %v143_v46 = vadd.f32 %v111_v32, %v79_v31 }
  0xdd   :  { %v3260_v44 = vsel %vm2909_vm0, %v2192_v37, 0.0  ;;  %v3257_v49 = vadd.f32 %v3256_v43, %v3255_v41  ;;  %v3261_v50 = vsel %vm2909_vm0, %v2196_v10, 0.0  ;;  %v1444_v51 = vand.u32 2147483647, %v1316_v39 }
  0xde   :  { %v4721_v48 = vpop.xlane.xlu1 %2938  ;;  %3248 = vadd.xlane.f32.xlu1 %v3247_v34  ;;  %v3262_v52 = vadd.f32 %v3261_v50, %v3260_v44  ;;  %v639_v47 = vcombine.low %v142_v40, %v143_v46  ;;  %v640_v54 = vcombine.high %v142_v40, %v143_v46  ;;  %v4744_v29 = vadd.f32 %v112_v15, %v80_v14 }
  0xdf   :  { %3253 = vadd.xlane.f32.xlu0 %v3252_v12  ;;  %v2200_v63 = vrot.slane %v1444_v51, %v4289_v25  ;;  %v2204_v6 = vrot.slane %v1444_v51, %v4297_v33 }
  0xe0   :  { %v4724_v53 = vpop.xlane.xlu0 %2953  ;;  %v647_v5 = vrot.slane %v639_v47, %v4283_v11  ;;  %v654_v0 = vrot.slane %v640_v54, %v4283_v11  ;;  %v113_v54 = vld [vmem:[#allocation6 + $0xa8] sm:$0xff] }
  0xe1   :  { %v3265_v56 = vsel %vm2909_vm0, %v2200_v63, 0.0  ;;  %v3266_v58 = vsel %vm2909_vm0, %v2204_v6, 0.0 }
  0xe2   :  { %v4729_v2 = vpop.xlane.xlu1 %2958  ;;  %3258 = vadd.xlane.f32.xlu1 %v3257_v49  ;;  %v3267_v60 = vadd.f32 %v3266_v58, %v3265_v56  ;;  %v663_v61 = vrot.slane %v647_v5, %v4283_v11  ;;  %v655_v62 = vcombine.high %v647_v5, %v647_v5  ;;  %v670_v9 = vrot.slane %v654_v0, %v4283_v11  ;;  %v81_v5 = vld [vmem:[#allocation3 + $0xa8] sm:$0xff] }
  0xe3   :  { %3263 = vadd.xlane.f32.xlu0 %v3262_v52  ;;  %v656_v17 = vcombine.high %v654_v0, %v654_v0  ;;  %v145_v14 = vadd.f32 %v113_v54, %v81_v5 }
  0xe4   :  { %v4735_v1 = vpop.xlane.xlu0 %2973  ;;  %v1317_v38 = vsub.f32 %v663_v61, %v1189_v59  ;;  %v677_v7 = vrot.slane %v655_v62, %v4283_v11  ;;  %v685_v8 = vcombine.high %v663_v61, %v663_v61  ;;  %v1321_v24 = vsub.f32 %v670_v9, %v1193_v42 }
  0xe5   :  { %5683 = vst [vmem:[#allocation13_spill] sm:$0xff] %v4735_v1  ;;  %v684_v26 = vrot.slane %v656_v17, %v4283_v11  ;;  %v686_v27 = vcombine.high %v670_v9, %v670_v9  ;;  %v123_v1 = vld [vmem:[#allocation6 + $0xf8] sm:$0xff] }
  0xe6   :  { %v4739_v45 = vpop.xlane.xlu1 %2978  ;;  %3268 = vadd.xlane.f32.xlu1 %v3267_v60  ;;  %v1445_v55 = vand.u32 2147483647, %v1317_v38  ;;  %v1318_v19 = vsub.f32 %v677_v7, %v1190_v3  ;;  %v1319_v18 = vsub.f32 %v685_v8, %v1191_v4  ;;  %v687_v20 = vcombine.high %v677_v7, %v677_v7  ;;  %v1196_v38 = vld [vmem:[#allocation8 + $0x9e] sm:$0x3] }
  0xe7   :  { %5684 = vst [vmem:[#allocation14_spill] sm:$0xff] %v4739_v45  ;;  %v1449_v36 = vand.u32 2147483647, %v1321_v24  ;;  %v1322_v37 = vsub.f32 %v684_v26, %v1194_v57  ;;  %v1323_v10 = vsub.f32 %v686_v27, %v1195_v21  ;;  %v688_v17 = vcombine.high %v684_v26, %v684_v26 }
  0xe8   :  { %v4741_v22 = vpop.xlane.xlu0 %2918  ;;  %v2208_v12 = vrot.slane %v1445_v55, %v4289_v25  ;;  %v2212_v30 = vrot.slane %v1445_v55, %v4297_v33  ;;  %v1446_v31 = vand.u32 2147483647, %v1318_v19  ;;  %v1447_v32 = vand.u32 2147483647, %v1319_v18 }
  0xe9   :  { %v1320_v35 = vsub.f32 %v687_v20, %v1192_v16  ;;  %v2240_v63 = vrot.slane %v1449_v36, %v4289_v25  ;;  %v2244_v6 = vrot.slane %v1449_v36, %v4297_v33  ;;  %v1450_v9 = vand.u32 2147483647, %v1322_v37 }
  0xea   :  { %v4748_v34 = vpop.xlane.xlu1 %2928  ;;  %v3270_v39 = vsel %vm2909_vm0, %v2208_v12, 0.0  ;;  %v3271_v40 = vsel %vm2909_vm0, %v2212_v30, 0.0  ;;  %v2216_v41 = vrot.slane %v1446_v31, %v4289_v25  ;;  %v2220_v43 = vrot.slane %v1446_v31, %v4297_v33 }
  0xeb   :  { %v3272_v46 = vadd.f32 %v3271_v40, %v3270_v39  ;;  %v2224_v49 = vrot.slane %v1447_v32, %v4289_v25  ;;  %v2228_v50 = vrot.slane %v1447_v32, %v4297_v33  ;;  %v1448_v51 = vand.u32 2147483647, %v1320_v35 }
  0xec   :  { %v4754_v44 = vpop.xlane.xlu0 %2943  ;;  %v3275_v52 = vsel %vm2909_vm0, %v2216_v41, 0.0  ;;  %v3276_v47 = vsel %vm2909_vm0, %v2220_v43, 0.0  ;;  %v3290_v3 = vsel %vm2909_vm0, %v2240_v63, 0.0  ;;  %v3291_v4 = vsel %vm2909_vm0, %v2244_v6, 0.0  ;;  %v1197_v43 = vld [vmem:[#allocation8 + $0xa0] sm:$0x3] }
  0xed   :  { %5685 = vst [vmem:[#allocation15_spill] sm:$0xff] %v4754_v44  ;;  %3273 = vadd.xlane.f32.xlu0 %v3272_v46  ;;  %v3277_v58 = vadd.f32 %v3276_v47, %v3275_v52  ;;  %v3280_v59 = vsel %vm2909_vm0, %v2224_v49, 0.0  ;;  %v3281_v60 = vsel %vm2909_vm0, %v2228_v50, 0.0  ;;  %v2232_v61 = vrot.slane %v1448_v51, %v4289_v25  ;;  %v1198_v52 = vld [vmem:[#allocation8 + $0xa2] sm:$0x3] }
  0xee   :  { %v4762_v56 = vpop.xlane.xlu1 %2948  ;;  %v3282_v62 = vadd.f32 %v3281_v60, %v3280_v59  ;;  %v2236_v0 = vrot.slane %v1448_v51, %v4297_v33  ;;  %v1451_v42 = vand.u32 2147483647, %v1323_v10  ;;  %v3292_v16 = vadd.f32 %v3291_v4, %v3290_v3  ;;  %v1199_v47 = vld [vmem:[#allocation8 + $0xa4] sm:$0x3]  ;;  %v1200_v3 = vld [vmem:[#allocation8 + $0xa6] sm:$0x3] }
  0xef   :  { %5686 = vst [vmem:[#allocation16_spill] sm:$0xff] %v4762_v56  ;;  %3278 = vadd.xlane.f32.xlu1 %v3277_v58  ;;  %v3285_v8 = vsel %vm2909_vm0, %v2232_v61, 0.0  ;;  %v2248_v18 = vrot.slane %v1450_v9, %v4289_v25  ;;  %v2252_v20 = vrot.slane %v1450_v9, %v4297_v33  ;;  %v1324_v24 = vsub.f32 %v688_v17, %v1196_v38  ;;  %v121_v56 = vld [vmem:[#allocation6 + $0xe8] sm:$0xff]  ;;  %v1232_v44 = vld [vmem:[#allocation8 + $0xe6] sm:$0x3] }
  0xf0   :  { %v4770_v7 = vpop.xlane.xlu0 %2963  ;;  %v3286_v15 = vsel %vm2909_vm0, %v2236_v0, 0.0  ;;  %v2256_v57 = vrot.slane %v1451_v42, %v4289_v25  ;;  %v2260_v21 = vrot.slane %v1451_v42, %v4297_v33  ;;  %v689_v30 = vcombine.low %v4744_v29, %v145_v14 }
  0xf1   :  { %3283 = vadd.xlane.f32.xlu0 %v3282_v62  ;;  %v3287_v19 = vadd.f32 %v3286_v15, %v3285_v8  ;;  %v3295_v27 = vsel %vm2909_vm0, %v2248_v18, 0.0  ;;  %v3296_v12 = vsel %vm2909_vm0, %v2252_v20, 0.0  ;;  %v1452_v36 = vand.u32 2147483647, %v1324_v24 }
  0xf2   :  { %v4774_v55 = vpop.xlane.xlu1 %2968  ;;  %v3300_v26 = vsel %vm2909_vm0, %v2256_v57, 0.0  ;;  %v3297_v32 = vadd.f32 %v3296_v12, %v3295_v27  ;;  %v3301_v35 = vsel %vm2909_vm0, %v2260_v21, 0.0  ;;  %v697_v10 = vrot.slane %v689_v30, %v4283_v11 }
  0xf3   :  { %3288 = vadd.xlane.f32.xlu1 %v3287_v19  ;;  %v3302_v37 = vadd.f32 %v3301_v35, %v3300_v26  ;;  %v2264_v40 = vrot.slane %v1452_v36, %v4289_v25  ;;  %v2268_v41 = vrot.slane %v1452_v36, %v4297_v33  ;;  %v690_v59 = vcombine.high %v4744_v29, %v145_v14  ;;  %v1201_v14 = vld [vmem:[#allocation8 + $0xa8] sm:$0x3] }
  0xf4   :  { %v4784_v31 = vpop.xlane.xlu0 %2983  ;;  %v713_v46 = vrot.slane %v697_v10, %v4283_v11  ;;  %v705_v49 = vcombine.high %v697_v10, %v697_v10 }
  0xf5   :  { %5687 = vst [vmem:[#allocation17_spill] sm:$0xff] %v4784_v31  ;;  %3293 = vadd.xlane.f32.xlu0 %v3292_v16  ;;  %v3305_v50 = vsel %vm2909_vm0, %v2264_v40, 0.0  ;;  %v3306_v51 = vsel %vm2909_vm0, %v2268_v41, 0.0  ;;  %v704_v38 = vrot.slane %v690_v59, %v4283_v11 }
  0xf6   :  { %v4788_v39 = vpop.xlane.xlu1 %2988  ;;  %v3307_v63 = vadd.f32 %v3306_v51, %v3305_v50  ;;  %v1325_v6 = vsub.f32 %v713_v46, %v1197_v43  ;;  %v727_v5 = vrot.slane %v705_v49, %v4283_v11  ;;  %v735_v54 = vcombine.high %v713_v46, %v713_v46 }
  0xf7   :  { %5688 = vst [vmem:[#allocation18_spill] sm:$0xff] %v4788_v39  ;;  %3298 = vadd.xlane.f32.xlu1 %v3297_v32  ;;  %v720_v29 = vrot.slane %v704_v38, %v4283_v11  ;;  %v706_v19 = vcombine.high %v704_v38, %v704_v38  ;;  %v1202_v32 = vld [vmem:[#allocation8 + $0xaa] sm:$0x3] }
  0xf8   :  { %v1453_v60 = vand.u32 2147483647, %v1325_v6  ;;  %v1326_v61 = vsub.f32 %v727_v5, %v1198_v52  ;;  %v1327_v62 = vsub.f32 %v735_v54, %v1199_v47  ;;  %v737_v0 = vcombine.high %v727_v5, %v727_v5 }
  0xf9   :  { %3303 = vadd.xlane.f32.xlu0 %v3302_v37  ;;  %v1329_v37 = vsub.f32 %v720_v29, %v1201_v14  ;;  %v734_v10 = vrot.slane %v706_v19, %v4283_v11  ;;  %v736_v54 = vcombine.high %v720_v29, %v720_v29  ;;  %v115_v14 = vld [vmem:[#allocation6 + $0xb8] sm:$0xff] }
  0xfa   :  { %v4796_v58 = vpop.xlane.xlu0 %2993  ;;  %v2272_v8 = vrot.slane %v1453_v60, %v4289_v25  ;;  %v2276_v9 = vrot.slane %v1453_v60, %v4297_v33  ;;  %v1454_v42 = vand.u32 2147483647, %v1326_v61  ;;  %v1455_v15 = vand.u32 2147483647, %v1327_v62 }
  0xfb   :  { %5689 = vst [vmem:[#allocation19_spill] sm:$0xff] %v4796_v58  ;;  %3308 = vadd.xlane.f32.xlu1 %v3307_v63  ;;  %v1328_v17 = vsub.f32 %v737_v0, %v1200_v3  ;;  %v1457_v52 = vand.u32 2147483647, %v1329_v37  ;;  %v1330_v47 = vsub.f32 %v734_v10, %v1202_v32  ;;  %v1203_v63 = vld [vmem:[#allocation8 + $0xac] sm:$0x3]  ;;  %v82_v3 = vld [vmem:[#allocation3 + $0xb0] sm:$0xff] }
  0xfc   :  { %v4799_v4 = vpop.xlane.xlu1 %2998  ;;  %v3310_v18 = vsel %vm2909_vm0, %v2272_v8, 0.0  ;;  %v3311_v20 = vsel %vm2909_vm0, %v2276_v9, 0.0  ;;  %v2280_v57 = vrot.slane %v1454_v42, %v4289_v25  ;;  %v2284_v21 = vrot.slane %v1454_v42, %v4297_v33  ;;  %v1204_v0 = vld [vmem:[#allocation8 + $0xae] sm:$0x3] }
  0xfd   :  { %v3312_v27 = vadd.f32 %v3311_v20, %v3310_v18  ;;  %v2288_v12 = vrot.slane %v1455_v15, %v4289_v25  ;;  %v2292_v26 = vrot.slane %v1455_v15, %v4297_v33  ;;  %v1456_v30 = vand.u32 2147483647, %v1328_v17  ;;  %v83_v15 = vld [vmem:[#allocation3 + $0xb8] sm:$0xff]  ;;  %v114_v17 = vld [vmem:[#allocation6 + $0xb0] sm:$0xff] }
  0xfe   :  { %v4804_v16 = vpop.xlane.xlu0 %3003  ;;  %v3315_v35 = vsel %vm2909_vm0, %v2280_v57, 0.0  ;;  %v3316_v36 = vsel %vm2909_vm0, %v2284_v21, 0.0  ;;  %v2304_v60 = vrot.slane %v1457_v52, %v4289_v25  ;;  %v2308_v61 = vrot.slane %v1457_v52, %v4297_v33 }
  0xff   :  { %3313 = vadd.xlane.f32.xlu0 %v3312_v27  ;;  %v3317_v41 = vadd.f32 %v3316_v36, %v3315_v35  ;;  %v3320_v43 = vsel %vm2909_vm0, %v2288_v12, 0.0  ;;  %v3321_v46 = vsel %vm2909_vm0, %v2292_v26, 0.0  ;;  %v2296_v49 = vrot.slane %v1456_v30, %v4289_v25 }
 0x100   :  { %v4811_v24 = vpop.xlane.xlu1 %3008  ;;  %v3322_v50 = vadd.f32 %v3321_v46, %v3320_v43  ;;  %v2300_v51 = vrot.slane %v1456_v30, %v4297_v33  ;;  %v1458_v62 = vand.u32 2147483647, %v1330_v47  ;;  %v1331_v9 = vsub.f32 %v736_v54, %v1203_v63  ;;  %v84_v54 = vld [vmem:[#allocation3 + $0xc0] sm:$0xff] }
 0x101   :  { %5690 = vst [vmem:[#allocation20_spill] sm:$0xff] %v4811_v24  ;;  %3318 = vadd.xlane.f32.xlu1 %v3317_v41  ;;  %v3325_v5 = vsel %vm2909_vm0, %v2296_v49, 0.0  ;;  %v738_v42 = vcombine.high %v734_v10, %v734_v10  ;;  %v3330_v29 = vsel %vm2909_vm0, %v2304_v60, 0.0  ;;  %v3331_v19 = vsel %vm2909_vm0, %v2308_v61, 0.0 }
 0x102   :  { %v4818_v40 = vpop.xlane.xlu0 %3013  ;;  %v3326_v59 = vsel %vm2909_vm0, %v2300_v51, 0.0  ;;  %v2312_v18 = vrot.slane %v1458_v62, %v4289_v25  ;;  %v2316_v20 = vrot.slane %v1458_v62, %v4297_v33  ;;  %v3332_v21 = vadd.f32 %v3331_v19, %v3330_v29  ;;  %v1207_v29 = vld [vmem:[#allocation8 + $0xb4] sm:$0x3] }
 0x103   :  { %5691 = vst [vmem:[#allocation21_spill] sm:$0xff] %v4818_v40  ;;  %3323 = vadd.xlane.f32.xlu0 %v3322_v50  ;;  %v3327_v8 = vadd.f32 %v3326_v59, %v3325_v5  ;;  %v1459_v27 = vand.u32 2147483647, %v1331_v9  ;;  %v1332_v12 = vsub.f32 %v738_v42, %v1204_v0  ;;  %v146_v32 = vadd.f32 %v114_v17, %v82_v3  ;;  %v116_v59 = vld [vmem:[#allocation6 + $0xc0] sm:$0xff]  ;;  %v1205_v0 = vld [vmem:[#allocation8 + $0xb0] sm:$0x3] }
 0x104   :  { %v4824_v6 = vpop.xlane.xlu1 %3018  ;;  %v3335_v26 = vsel %vm2909_vm0, %v2312_v18, 0.0  ;;  %v3336_v30 = vsel %vm2909_vm0, %v2316_v20, 0.0  ;;  %v147_v35 = vadd.f32 %v115_v14, %v83_v15  ;;  %v85_v3 = vld [vmem:[#allocation3 + $0xc8] sm:$0xff]  ;;  %v1206_v14 = vld [vmem:[#allocation8 + $0xb2] sm:$0x3]  ;;  %v4858_v19 = vadd.f32 %v116_v59, %v84_v54 }
 0x105   :  { %5692 = vst [vmem:[#allocation22_spill] sm:$0xff] %v4824_v6  ;;  %3328 = vadd.xlane.f32.xlu1 %v3327_v8  ;;  %v3337_v37 = vadd.f32 %v3336_v30, %v3335_v26  ;;  %v2320_v10 = vrot.slane %v1459_v27, %v4289_v25  ;;  %v2324_v41 = vrot.slane %v1459_v27, %v4297_v33  ;;  %v1460_v43 = vand.u32 2147483647, %v1332_v12  ;;  %v117_v8 = vld [vmem:[#allocation6 + $0xc8] sm:$0xff] }
 0x106   :  { %v4830_v38 = vpop.xlane.xlu0 %3023  ;;  %v739_v46 = vcombine.low %v146_v32, %v147_v35  ;;  %v4861_v27 = vadd.f32 %v117_v8, %v85_v3  ;;  %v740_v26 = vcombine.high %v146_v32, %v147_v35 }
 0x107   :  { %5693 = vst [vmem:[#allocation23_spill] sm:$0xff] %v4830_v38  ;;  %3333 = vadd.xlane.f32.xlu0 %v3332_v21  ;;  %v3340_v50 = vsel %vm2909_vm0, %v2320_v10, 0.0  ;;  %v3341_v51 = vsel %vm2909_vm0, %v2324_v41, 0.0  ;;  %v2328_v52 = vrot.slane %v1460_v43, %v4289_v25  ;;  %v2332_v47 = vrot.slane %v1460_v43, %v4297_v33  ;;  %v1208_v43 = vld [vmem:[#allocation8 + $0xb6] sm:$0x3] }
 0x108   :  { %v4836_v57 = vpop.xlane.xlu1 %3028  ;;  %v3342_v63 = vadd.f32 %v3341_v51, %v3340_v50  ;;  %v747_v5 = vrot.slane %v739_v46, %v4283_v11  ;;  %v789_v50 = vcombine.low %v4858_v19, %v4861_v27  ;;  %v754_v51 = vrot.slane %v740_v26, %v4283_v11 }
 0x109   :  { %5694 = vst [vmem:[#allocation24_spill] sm:$0xff] %v4836_v57  ;;  %3338 = vadd.xlane.f32.xlu1 %v3337_v37  ;;  %v3345_v61 = vsel %vm2909_vm0, %v2328_v52, 0.0  ;;  %v3346_v62 = vsel %vm2909_vm0, %v2332_v47, 0.0 }
 0x10a   :  { %v4840_v36 = vpop.xlane.xlu0 %3033  ;;  %v3347_v9 = vadd.f32 %v3346_v62, %v3345_v61  ;;  %v763_v42 = vrot.slane %v747_v5, %v4283_v11  ;;  %v755_v15 = vcombine.high %v747_v5, %v747_v5  ;;  %v797_v32 = vrot.slane %v789_v50, %v4283_v11 }
 0x10b   :  { %5695 = vst [vmem:[#allocation25_spill] sm:$0xff] %v4840_v36  ;;  %3343 = vadd.xlane.f32.xlu0 %v3342_v63  ;;  %v4874_v35 = vrot.slane %v754_v51, %v4283_v11 }
 0x10c   :  { %v4844_v49 = vpop.xlane.xlu1 %3038  ;;  %v1333_v18 = vsub.f32 %v763_v42, %v1205_v0  ;;  %v777_v20 = vrot.slane %v755_v15, %v4283_v11  ;;  %v785_v21 = vcombine.high %v763_v42, %v763_v42 }
 0x10d   :  { %5696 = vst [vmem:[#allocation26_spill] sm:$0xff] %v4844_v49  ;;  %3348 = vadd.xlane.f32.xlu1 %v3347_v9 }
 0x10e   :  { %v4851_v60 = vpop.xlane.xlu0 %3043  ;;  %v1461_v30 = vand.u32 2147483647, %v1333_v18  ;;  %v1334_v37 = vsub.f32 %v777_v20, %v1206_v14  ;;  %v1335_v10 = vsub.f32 %v785_v21, %v1207_v29  ;;  %v787_v41 = vcombine.high %v777_v20, %v777_v20  ;;  %v1209_v14 = vld [vmem:[#allocation8 + $0xb8] sm:$0x3] }
 0x10f   :  { %5697 = vst [vmem:[#allocation27_spill] sm:$0xff] %v4851_v60  ;;  %v805_v20 = vcombine.high %v797_v32, %v797_v32  ;;  %v1224_v60 = vld [vmem:[#allocation8 + $0xd6] sm:$0x3] }
 0x110   :  { %v4856_v17 = vpop.xlane.xlu1 %3048  ;;  %v2336_v52 = vrot.slane %v1461_v30, %v4289_v25  ;;  %v2340_v47 = vrot.slane %v1461_v30, %v4297_v33  ;;  %v1462_v63 = vand.u32 2147483647, %v1334_v37  ;;  %v1463_v5 = vand.u32 2147483647, %v1335_v10 }
 0x111   :  { %5698 = vst [vmem:[#allocation28_spill] sm:$0xff] %v4856_v17  ;;  %v1336_v54 = vsub.f32 %v787_v41, %v1208_v43  ;;  %v1214_v41 = vld [vmem:[#allocation8 + $0xc2] sm:$0x3] }
 0x112   :  { %v4863_v12 = vpop.xlane.xlu0 %3053  ;;  %v3350_v59 = vsel %vm2909_vm0, %v2336_v52, 0.0  ;;  %v3351_v61 = vsel %vm2909_vm0, %v2340_v47, 0.0  ;;  %v2344_v62 = vrot.slane %v1462_v63, %v4289_v25  ;;  %v2348_v0 = vrot.slane %v1462_v63, %v4297_v33  ;;  %v1213_v63 = vld [vmem:[#allocation8 + $0xc0] sm:$0x3] }
 0x113   :  { %5699 = vst [vmem:[#allocation29_spill] sm:$0xff] %v4863_v12  ;;  %v3352_v8 = vadd.f32 %v3351_v61, %v3350_v59  ;;  %v2352_v9 = vrot.slane %v1463_v5, %v4289_v25  ;;  %v2356_v42 = vrot.slane %v1463_v5, %v4297_v33  ;;  %v1464_v15 = vand.u32 2147483647, %v1336_v54  ;;  %v1215_v59 = vld [vmem:[#allocation8 + $0xc4] sm:$0x3] }
 0x114   :  { %v4865_v46 = vpop.xlane.xlu1 %3058  ;;  %v3355_v29 = vsel %vm2909_vm0, %v2344_v62, 0.0  ;;  %v3356_v18 = vsel %vm2909_vm0, %v2348_v0, 0.0  ;;  %v4893_v52 = vrot.slane %v805_v20, %v4283_v11  ;;  %v1337_v47 = vsub.f32 %v4874_v35, %v1209_v14  ;;  %v120_v17 = vld [vmem:[#allocation6 + $0xe0] sm:$0xff] }
 0x115   :  { %5700 = vst [vmem:[#allocation30_spill] sm:$0xff] %v4865_v46  ;;  %3353 = vadd.xlane.f32.xlu0 %v3352_v8  ;;  %v3357_v26 = vadd.f32 %v3356_v18, %v3355_v29  ;;  %v3360_v30 = vsel %vm2909_vm0, %v2352_v9, 0.0  ;;  %v3361_v37 = vsel %vm2909_vm0, %v2356_v42, 0.0  ;;  %v2360_v10 = vrot.slane %v1464_v15, %v4289_v25  ;;  %v1210_v9 = vld [vmem:[#allocation8 + $0xba] sm:$0x3] }
 0x116   :  { %v4880_v3 = vpop.xlane.xlu0 %3063  ;;  %v3362_v43 = vadd.f32 %v3361_v37, %v3360_v30  ;;  %v2364_v50 = vrot.slane %v1464_v15, %v4297_v33  ;;  %v813_v54 = vrot.slane %v797_v32, %v4283_v11  ;;  %v756_v61 = vcombine.high %v754_v51, %v754_v51 }
 0x117   :  { %5701 = vst [vmem:[#allocation31_spill] sm:$0xff] %v4880_v3  ;;  %3358 = vadd.xlane.f32.xlu1 %v3357_v26  ;;  %v3365_v5 = vsel %vm2909_vm0, %v2360_v10, 0.0  ;;  %v1342_v0 = vsub.f32 %v4893_v52, %v1214_v41  ;;  %v1465_v8 = vand.u32 2147483647, %v1337_v47  ;;  %v837_v3 = vcombine.high %v4893_v52, %v4893_v52 }
 0x118   :  { %v4886_v21 = vpop.xlane.xlu1 %3068  ;;  %v3366_v62 = vsel %vm2909_vm0, %v2364_v50, 0.0  ;;  %v835_v29 = vcombine.high %v813_v54, %v813_v54  ;;  %v4903_v14 = vrot.slane %v756_v61, %v4283_v11  ;;  %v1341_v18 = vsub.f32 %v813_v54, %v1213_v63 }
 0x119   :  { %5702 = vst [vmem:[#allocation32_spill] sm:$0xff] %v4886_v21  ;;  %3363 = vadd.xlane.f32.xlu0 %v3362_v43  ;;  %v3367_v15 = vadd.f32 %v3366_v62, %v3365_v5  ;;  %v1470_v20 = vand.u32 2147483647, %v1342_v0  ;;  %v2368_v32 = vrot.slane %v1465_v8, %v4289_v25  ;;  %v2372_v51 = vrot.slane %v1465_v8, %v4297_v33 }
 0x11a   :  { %v1343_v30 = vsub.f32 %v835_v29, %v1215_v59  ;;  %v1338_v37 = vsub.f32 %v4903_v14, %v1210_v9  ;;  %v1469_v10 = vand.u32 2147483647, %v1341_v18  ;;  %v790_v52 = vcombine.high %v4858_v19, %v4861_v27 }
 0x11b   :  { %3368 = vadd.xlane.f32.xlu1 %v3367_v15  ;;  %v2408_v41 = vrot.slane %v1470_v20, %v4289_v25  ;;  %v2412_v43 = vrot.slane %v1470_v20, %v4297_v33  ;;  %v3370_v50 = vsel %vm2909_vm0, %v2368_v32, 0.0  ;;  %v3371_v47 = vsel %vm2909_vm0, %v2372_v51, 0.0  ;;  %v86_v32 = vld [vmem:[#allocation3 + $0xd0] sm:$0xff]  ;;  %v87_v51 = vld [vmem:[#allocation3 + $0xd8] sm:$0xff] }
 0x11c   :  { %v3372_v5 = vadd.f32 %v3371_v47, %v3370_v50  ;;  %v1471_v54 = vand.u32 2147483647, %v1343_v30  ;;  %v1466_v61 = vand.u32 2147483647, %v1338_v37  ;;  %v2400_v0 = vrot.slane %v1469_v10, %v4289_v25 }
 0x11d   :  { %v3395_v62 = vsel %vm2909_vm0, %v2408_v41, 0.0  ;;  %v3396_v59 = vsel %vm2909_vm0, %v2412_v43, 0.0  ;;  %v2404_v8 = vrot.slane %v1469_v10, %v4297_v33  ;;  %v786_v30 = vcombine.high %v4874_v35, %v4874_v35  ;;  %v1216_v41 = vld [vmem:[#allocation8 + $0xc6] sm:$0x3]  ;;  %v118_v43 = vld [vmem:[#allocation6 + $0xd0] sm:$0xff]  ;;  %v119_v10 = vld [vmem:[#allocation6 + $0xd8] sm:$0xff] }
 0x11e   :  { %v4900_v42 = vpop.xlane.xlu0 %3073  ;;  %v3397_v15 = vadd.f32 %v3396_v59, %v3395_v62  ;;  %v2416_v29 = vrot.slane %v1471_v54, %v4289_v25  ;;  %v2420_v18 = vrot.slane %v1471_v54, %v4297_v33  ;;  %v2376_v20 = vrot.slane %v1466_v61, %v4289_v25  ;;  %v1211_v59 = vld [vmem:[#allocation8 + $0xbc] sm:$0x3] }
 0x11f   :  { %3373 = vadd.xlane.f32.xlu1 %v3372_v5  ;;  %v2380_v37 = vrot.slane %v1466_v61, %v4297_v33  ;;  %v3390_v62 = vsel %vm2909_vm0, %v2400_v0, 0.0  ;;  %v3391_v61 = vsel %vm2909_vm0, %v2404_v8, 0.0  ;;  %v4940_v46 = vadd.f32 %v118_v43, %v86_v32  ;;  %v1217_v43 = vld [vmem:[#allocation8 + $0xc8] sm:$0x3] }
 0x120   :  { %v4907_v26 = vpop.xlane.xlu1 %3078  ;;  %3398 = vadd.xlane.f32.xlu0 %v3397_v15  ;;  %v3400_v47 = vsel %vm2909_vm0, %v2416_v29, 0.0  ;;  %v3401_v5 = vsel %vm2909_vm0, %v2420_v18, 0.0  ;;  %v3375_v54 = vsel %vm2909_vm0, %v2376_v20, 0.0  ;;  %v4942_v29 = vadd.f32 %v119_v10, %v87_v51 }
 0x121   :  { %v3402_v21 = vadd.f32 %v3401_v5, %v3400_v47  ;;  %v3376_v35 = vsel %vm2909_vm0, %v2380_v37, 0.0  ;;  %v1344_v18 = vsub.f32 %v837_v3, %v1216_v41  ;;  %v1339_v20 = vsub.f32 %v786_v30, %v1211_v59 }
 0x122   :  { %v4914_v63 = vpop.xlane.xlu0 %3083  ;;  %v3377_v15 = vadd.f32 %v3376_v35, %v3375_v54  ;;  %v3392_v0 = vadd.f32 %v3391_v61, %v3390_v62  ;;  %v839_v8 = vcombine.low %v4940_v46, %v4942_v29  ;;  %v804_v3 = vrot.slane %v790_v52, %v4283_v11  ;;  %v1212_v62 = vld [vmem:[#allocation8 + $0xbe] sm:$0x3]  ;;  %v1222_v35 = vld [vmem:[#allocation8 + $0xd2] sm:$0x3] }
 0x123   :  { %v1472_v37 = vand.u32 2147483647, %v1344_v18  ;;  %v1467_v47 = vand.u32 2147483647, %v1339_v20  ;;  %v788_v51 = vcombine.high %v4903_v14, %v4903_v14 }
 0x124   :  { %v4920_v9 = vpop.xlane.xlu1 %3088  ;;  %3403 = vadd.xlane.f32.xlu0 %v3402_v21  ;;  %3378 = vadd.xlane.f32.xlu1 %v3377_v15  ;;  %v847_v32 = vrot.slane %v839_v8, %v4283_v11  ;;  %v4963_v54 = vrot.slane %v804_v3, %v4283_v11 }
 0x125   :  { %v2424_v21 = vrot.slane %v1472_v37, %v4289_v25  ;;  %v2428_v30 = vrot.slane %v1472_v37, %v4297_v33  ;;  %v2384_v41 = vrot.slane %v1467_v47, %v4289_v25  ;;  %v2388_v27 = vrot.slane %v1467_v47, %v4297_v33  ;;  %v1223_v37 = vld [vmem:[#allocation8 + $0xd4] sm:$0x3] }
 0x126   :  { %v4928_v50 = vpop.xlane.xlu0 %3093  ;;  %v855_v19 = vcombine.high %v847_v32, %v847_v32  ;;  %v4969_v15 = vrot.slane %v847_v32, %v4283_v11  ;;  %v1345_v52 = vsub.f32 %v4963_v54, %v1217_v43  ;;  %v4981_v47 = vstv %s5678_s0  ;;  %s4214_s0 = smov [#allocation9]  }
 0x127   :  { %v3405_v59 = vsel %vm2909_vm0, %v2424_v21, 0.0  ;;  %v3406_v14 = vsel %vm2909_vm0, %v2428_v30, 0.0  ;;  %v3380_v61 = vsel %vm2909_vm0, %v2384_v41, 0.0  ;;  %v3381_v8 = vsel %vm2909_vm0, %v2388_v27, 0.0  ;;  %s4093_s28 = sshll.u32 %s4214_s0, 4  ;;  %s4094_s28 = int_to_ptr.vmem [resolvable:$true] %s4093_s28 }
 0x128   :  { %v4938_v57 = vpop.xlane.xlu1 %3098  ;;  %3393 = vadd.xlane.f32.xlu0 %v3392_v0  ;;  %v3407_v20 = vadd.f32 %v3406_v14, %v3405_v59  ;;  %v4974_v0 = vrot.slane %v855_v19, %v4283_v11  ;;  %v885_v32 = vcombine.high %v4969_v15, %v4969_v15  ;;  %v1340_v21 = vsub.f32 %v788_v51, %v1212_v62  ;;  %s4178_s29 = scalar_lea.vmem %s4094_s28, 16  ;;  %s4182_s30 = scalar_lea.vmem %s4094_s28, 32 }
 0x129   :  { %v3382_v19 = vadd.f32 %v3381_v8, %v3380_v61  ;;  %v1473_v27 = vand.u32 2147483647, %v1345_v52  ;;  %v806_v59 = vcombine.high %v804_v3, %v804_v3  ;;  %v3583_v39 = vsub.f32 %v4981_v47, %v4900_v42  ;;  %v1218_v8 = vld [vmem:[#allocation8 + $0xca] sm:$0x3]  ;;  %p4179_p10 = scmp.ne.s32.totalorder %s4094_s28, %s4178_s29  ;;  %p4183_p11 = scmp.lt.s32.totalorder %s4094_s28, %s4094_s28 }
 0x12a   :  { %v4944_v38 = vpop.xlane.xlu0 %3103  ;;  %3408 = vadd.xlane.f32.xlu1 %v3407_v20  ;;  %v1350_v41 = vsub.f32 %v4974_v0, %v1222_v35  ;;  %v1351_v43 = vsub.f32 %v885_v32, %v1223_v37  ;;  %v1468_v14 = vand.u32 2147483647, %v1340_v21  ;;  %v3584_v12 = vsub.f32 %v4981_v47, %v4907_v26  ;;  %p4184_p12 = scmp.lt.s32.totalorder %s4182_s30, %s4178_s29 }
 0x12b   :  { %v2432_v51 = vrot.slane %v1473_v27, %v4289_v25  ;;  %v2436_v62 = vrot.slane %v1473_v27, %v4297_v33  ;;  %v4997_v35 = vrot.slane %v806_v59, %v4283_v11 }
 0x12c   :  { %v4950_v5 = vpop.xlane.xlu1 %3108  ;;  %v1478_v31 = vand.u32 2147483647, %v1350_v41  ;;  %v1479_v61 = vand.u32 2147483647, %v1351_v43  ;;  %v2392_v3 = vrot.slane %v1468_v14, %v4289_v25  ;;  %v2396_v20 = vrot.slane %v1468_v14, %v4297_v33  ;;  %v1221_v43 = vld [vmem:[#allocation8 + $0xd0] sm:$0x3]  ;;  %p4185_p13 = por %p4184_p12, %p4183_p11 }
 0x12d   :  { %v3870_v42 = vrot.slane %v3584_v12, 7  ;;  %v3410_v37 = vsel %vm2909_vm0, %v2432_v51, 0.0  ;;  %v3411_v32 = vsel %vm2909_vm0, %v2436_v62, 0.0  ;;  %v1346_v51 = vsub.f32 %v4997_v35, %v1218_v8  ;;  %v88_v62 = vld [vmem:[#allocation3 + $0xe0] sm:$0xff] }
 0x12e   :  { %v4959_v10 = vpop.xlane.xlu0 %3113  ;;  %v2472_v26 = vrot.slane %v1478_v31, %v4289_v25  ;;  %v2476_v52 = vrot.slane %v1478_v31, %v4297_v33  ;;  %3383 = vadd.xlane.f32.xlu1 %v3382_v19  ;;  %v3412_v41 = vadd.f32 %v3411_v32, %v3410_v37  ;;  %v2480_v27 = vrot.slane %v1479_v61, %v4289_v25  ;;  %p4186_p0 = pnand %p4185_p13, %p4179_p10 }
 0x12f   :  { %v2484_v59 = vrot.slane %v1479_v61, %v4297_v33  ;;  %v3385_v12 = vsel %vm2909_vm0, %v2392_v3, 0.0  ;;  %v3386_v19 = vsel %vm2909_vm0, %v2396_v20, 0.0  ;;  %v89_v3 = vld [vmem:[#allocation3 + $0xe8] sm:$0xff]  ;;  %v1349_v20 = vsub.f32 %v4969_v15, %v1221_v43 }
 0x130   :  { %v4971_v18 = vpop.xlane.xlu1 %3118  ;;  %v3435_v14 = vsel %vm2909_vm0, %v2472_v26, 0.0  ;;  %v3436_v31 = vsel %vm2909_vm0, %v2476_v52, 0.0  ;;  %v3440_v32 = vsel %vm2909_vm0, %v2480_v27, 0.0  ;;  %v3387_v40 = vadd.f32 %v3386_v19, %v3385_v12 }
 0x131   :  { %v3437_v37 = vadd.f32 %v3436_v31, %v3435_v14  ;;  %v3441_v61 = vsel %vm2909_vm0, %v2484_v59, 0.0  ;;  %v1474_v26 = vand.u32 2147483647, %v1346_v51  ;;  %v3871_v52 = vsel %vm3808_vm1, %v3870_v42, %v3583_v39 }
 0x132   :  { %v4985_v30 = vpop.xlane.xlu0 %3123  ;;  %v3442_v45 = vadd.f32 %v3441_v61, %v3440_v32  ;;  %v3585_v8 = vsub.f32 %v4981_v47, %v4914_v63  ;;  %v887_v14 = vcombine.high %v4974_v0, %v4974_v0  ;;  %v3586_v27 = vsub.f32 %v4981_v47, %v4920_v9 }
 0x133   :  { %3438 = vadd.xlane.f32.xlu0 %v3437_v37  ;;  %v5026_v59 = vadd.f32 %v120_v17, %v88_v62  ;;  %v2440_v12 = vrot.slane %v1474_v26, %v4289_v25  ;;  %v2444_v39 = vrot.slane %v1474_v26, %v4297_v33  ;;  %v1477_v42 = vand.u32 2147483647, %v1349_v20 }
 0x134   :  { %v4992_v6 = vpop.xlane.xlu1 %3128  ;;  %3443 = vadd.xlane.f32.xlu1 %v3442_v45  ;;  %v5030_v15 = vadd.f32 %v121_v56, %v89_v3  ;;  %v3872_v31 = vrot.slane %v3585_v8, 6  ;;  %v1352_v63 = vsub.f32 %v887_v14, %v1224_v60  ;;  %v3874_v19 = vrot.slane %v3586_v27, 5 }
 0x135   :  { %v3587_v0 = vsub.f32 %v4981_v47, %v4928_v50  ;;  %v3415_v9 = vsel %vm2909_vm0, %v2440_v12, 0.0  ;;  %v3416_v17 = vsel %vm2909_vm0, %v2444_v39, 0.0  ;;  %v2464_v45 = vrot.slane %v1477_v42, %v4289_v25 }
 0x136   :  { %v5005_v21 = vpop.xlane.xlu0 %3133  ;;  %v2468_v51 = vrot.slane %v1477_v42, %v4297_v33  ;;  %v3417_v56 = vadd.f32 %v3416_v17, %v3415_v9  ;;  %v3873_v37 = vsel %vm3811_vm2, %v3872_v31, %v3871_v52  ;;  %v1480_v32 = vand.u32 2147483647, %v1352_v63  ;;  %v1219_v52 = vld [vmem:[#allocation8 + $0xcc] sm:$0x3]  ;;  %v1230_v17 = vld [vmem:[#allocation8 + $0xe2] sm:$0x3] }
 0x137   :  { %3413 = vadd.xlane.f32.xlu0 %v3412_v41  ;;  %v889_v60 = vcombine.low %v5026_v59, %v5030_v15  ;;  %v3430_v50 = vsel %vm2909_vm0, %v2464_v45, 0.0  ;;  %v3875_v3 = vsel %vm3814_vm3, %v3874_v19, %v3873_v37  ;;  %v3876_v26 = vrot.slane %v3587_v0, 4  ;;  %v1220_v37 = vld [vmem:[#allocation8 + $0xce] sm:$0x3] }
 0x138   :  { %v5014_v36 = vpop.xlane.xlu1 %3138  ;;  %v3431_v61 = vsel %vm2909_vm0, %v2468_v51, 0.0  ;;  %3418 = vadd.xlane.f32.xlu1 %v3417_v56  ;;  %v2488_v20 = vrot.slane %v1480_v32, %v4289_v25  ;;  %v2492_v41 = vrot.slane %v1480_v32, %v4297_v33  ;;  %v836_v12 = vcombine.high %v4963_v54, %v4963_v54 }
 0x139   :  { %v897_v8 = vrot.slane %v889_v60, %v4283_v11  ;;  %v3432_v14 = vadd.f32 %v3431_v61, %v3430_v50  ;;  %v3877_v27 = vsel %vm3817_vm4, %v3876_v26, %v3875_v3  ;;  %v3588_v39 = vsub.f32 %v4981_v47, %v4938_v57  ;;  %v1231_v60 = vld [vmem:[#allocation8 + $0xe4] sm:$0x3] }
 0x13a   :  { %v5032_v43 = vpop.xlane.xlu0 %3143  ;;  %v3445_v31 = vsel %vm2909_vm0, %v2488_v20, 0.0  ;;  %v3446_v63 = vsel %vm2909_vm0, %v2492_v41, 0.0  ;;  %v840_v0 = vcombine.high %v4940_v46, %v4942_v29  ;;  %v1347_v45 = vsub.f32 %v836_v12, %v1219_v52  ;;  %v1225_v29 = vld [vmem:[#allocation8 + $0xd8] sm:$0x3] }
 0x13b   :  { %3388 = vadd.xlane.f32.xlu0 %v3387_v40  ;;  %v905_v19 = vcombine.high %v897_v8, %v897_v8  ;;  %v3447_v9 = vadd.f32 %v3446_v63, %v3445_v31  ;;  %v3878_v51 = vrot.slane %v3588_v39, 3  ;;  %v5069_v57 = vrot.slane %v897_v8, %v4283_v11 }
 0x13c   :  { %v5040_v62 = vpop.xlane.xlu1 %3148  ;;  %v854_v40 = vrot.slane %v840_v0, %v4283_v11  ;;  %v1475_v32 = vand.u32 2147483647, %v1347_v45  ;;  %v838_v50 = vcombine.high %v4997_v35, %v4997_v35 }
 0x13d   :  { %v5065_v54 = vrot.slane %v905_v19, %v4283_v11  ;;  %3448 = vadd.xlane.f32.xlu1 %v3447_v9  ;;  %v5072_v46 = vsel %vm3820_vm5, %v3878_v51, %v3877_v27  ;;  %v935_v20 = vcombine.high %v5069_v57, %v5069_v57  ;;  %v3591_v27 = vsub.f32 %v4981_v47, %v4959_v10 }
 0x13e   :  { %v5080_v26 = vrot.slane %v854_v40, %v4283_v11  ;;  %v2448_v41 = vrot.slane %v1475_v32, %v4289_v25  ;;  %v2452_v8 = vrot.slane %v1475_v32, %v4297_v33  ;;  %v1348_v52 = vsub.f32 %v838_v50, %v1220_v37  ;;  %v1226_v50 = vld [vmem:[#allocation8 + $0xda] sm:$0x3] }
 0x13f   :  { %3433 = vadd.xlane.f32.xlu0 %v3432_v14  ;;  %v1358_v3 = vsub.f32 %v5065_v54, %v1230_v17  ;;  %v1359_v39 = vsub.f32 %v935_v20, %v1231_v60  ;;  %v856_v31 = vcombine.high %v854_v40, %v854_v40  ;;  %v3592_v9 = vsub.f32 %v4981_v47, %v4971_v18 }
 0x140   :  { %v1353_v14 = vsub.f32 %v5080_v26, %v1225_v29  ;;  %v3420_v63 = vsel %vm2909_vm0, %v2448_v41, 0.0  ;;  %v3421_v19 = vsel %vm2909_vm0, %v2452_v8, 0.0  ;;  %v1476_v0 = vand.u32 2147483647, %v1348_v52 }
 0x141   :  { %v1486_v12 = vand.u32 2147483647, %v1358_v3  ;;  %v3422_v51 = vadd.f32 %v3421_v19, %v3420_v63  ;;  %v1487_v32 = vand.u32 2147483647, %v1359_v39  ;;  %v5102_v60 = vrot.slane %v856_v31, %v4283_v11  ;;  %v1229_v31 = vld [vmem:[#allocation8 + $0xe0] sm:$0x3] }
 0x142   :  { %v1481_v37 = vand.u32 2147483647, %v1353_v14  ;;  %v2456_v29 = vrot.slane %v1476_v0, %v4289_v25  ;;  %v2460_v40 = vrot.slane %v1476_v0, %v4297_v33  ;;  %v3884_v49 = vrot.slane %v3592_v9, 7 }
 0x143   :  { %v5056_v42 = vpop.xlane.xlu0 %3153  ;;  %v2536_v45 = vrot.slane %v1486_v12, %v4289_v25  ;;  %v2540_v10 = vrot.slane %v1486_v12, %v4297_v33  ;;  %3423 = vadd.xlane.f32.xlu1 %v3422_v51  ;;  %v2544_v12 = vrot.slane %v1487_v32, %v4289_v25  ;;  %v2548_v14 = vrot.slane %v1487_v32, %v4297_v33  ;;  %v90_v51 = vld [vmem:[#allocation3 + $0xf0] sm:$0xff] }
 0x144   :  { %v2496_v41 = vrot.slane %v1481_v37, %v4289_v25  ;;  %v2500_v8 = vrot.slane %v1481_v37, %v4297_v33  ;;  %v3425_v39 = vsel %vm2909_vm0, %v2456_v29, 0.0  ;;  %v122_v37 = vld [vmem:[#allocation6 + $0xf0] sm:$0xff] }
 0x145   :  { %v5062_v56 = vpop.xlane.xlu1 %3158  ;;  %v3475_v18 = vsel %vm2909_vm0, %v2536_v45, 0.0  ;;  %v3476_v20 = vsel %vm2909_vm0, %v2540_v10, 0.0  ;;  %v3426_v45 = vsel %vm2909_vm0, %v2460_v40, 0.0  ;;  %v1354_v10 = vsub.f32 %v5102_v60, %v1226_v50  ;;  %v91_v40 = vld [vmem:[#allocation3 + $0xf8] sm:$0xff] }
 0x146   :  { %v3477_v52 = vadd.f32 %v3476_v20, %v3475_v18  ;;  %v3450_v19 = vsel %vm2909_vm0, %v2496_v41, 0.0  ;;  %v3451_v0 = vsel %vm2909_vm0, %v2500_v8, 0.0  ;;  %v3480_v20 = vsel %vm2909_vm0, %v2544_v12, 0.0 }
 0x147   :  { %v5076_v61 = vpop.xlane.xlu0 %3163  ;;  %v3452_v18 = vadd.f32 %v3451_v0, %v3450_v19  ;;  %v3481_v32 = vsel %vm2909_vm0, %v2548_v14, 0.0  ;;  %v3427_v29 = vadd.f32 %v3426_v45, %v3425_v39  ;;  %v1482_v41 = vand.u32 2147483647, %v1354_v10 }
 0x148   :  { %3478 = vadd.xlane.f32.xlu0 %v3477_v52  ;;  %v3482_v58 = vadd.f32 %v3481_v32, %v3480_v20  ;;  %v1357_v8 = vsub.f32 %v5069_v57, %v1229_v31  ;;  %v3593_v50 = vsub.f32 %v4981_v47, %v4985_v30  ;;  %v937_v52 = vcombine.high %v5065_v54, %v5065_v54 }
 0x149   :  { %v5088_v35 = vpop.xlane.xlu1 %3168  ;;  %v3594_v12 = vsub.f32 %v4981_v47, %v4992_v6  ;;  %v5130_v14 = vadd.f32 %v122_v37, %v90_v51  ;;  %v2504_v9 = vrot.slane %v1482_v41, %v4289_v25  ;;  %v2508_v57 = vrot.slane %v1482_v41, %v4297_v33 }
 0x14a   :  { %3483 = vadd.xlane.f32.xlu1 %v3482_v58  ;;  %v3885_v31 = vsel %vm3808_vm1, %v3884_v49, %v3591_v27  ;;  %v1485_v19 = vand.u32 2147483647, %v1357_v8  ;;  %v3886_v30 = vrot.slane %v3593_v50, 6  ;;  %v1360_v0 = vsub.f32 %v937_v52, %v1232_v44 }
 0x14b   :  { %v5095_v17 = vpop.xlane.xlu0 %3173  ;;  %v3888_v45 = vrot.slane %v3594_v12, 5  ;;  %v5137_v54 = vadd.f32 %v123_v1, %v91_v40  ;;  %v3455_v6 = vsel %vm2909_vm0, %v2504_v9, 0.0  ;;  %v3456_v51 = vsel %vm2909_vm0, %v2508_v57, 0.0  ;;  %v1227_v12 = vld [vmem:[#allocation8 + $0xdc] sm:$0x3] }
 0x14c   :  { %3453 = vadd.xlane.f32.xlu0 %v3452_v18  ;;  %v2528_v58 = vrot.slane %v1485_v19, %v4289_v25  ;;  %v2532_v37 = vrot.slane %v1485_v19, %v4297_v33  ;;  %v3457_v20 = vadd.f32 %v3456_v51, %v3455_v6  ;;  %v3887_v49 = vsel %vm3811_vm2, %v3886_v30, %v3885_v31 }
 0x14d   :  { %v5104_v3 = vpop.xlane.xlu1 %3178  ;;  %v1488_v27 = vand.u32 2147483647, %v1360_v0  ;;  %v939_v44 = vcombine.low %v5130_v14, %v5137_v54  ;;  %v3889_v41 = vsel %vm3814_vm3, %v3888_v45, %v3887_v49  ;;  %v3595_v8 = vsub.f32 %v4981_v47, %v5005_v21 }
 0x14e   :  { %v3470_v1 = vsel %vm2909_vm0, %v2528_v58, 0.0  ;;  %v3471_v32 = vsel %vm2909_vm0, %v2532_v37, 0.0  ;;  %3458 = vadd.xlane.f32.xlu1 %v3457_v20  ;;  %v886_v19 = vcombine.high %v5080_v26, %v5080_v26  ;;  %v3596_v30 = vsub.f32 %v4981_v47, %v5014_v36  ;;  %v1238_v20 = vld [vmem:[#allocation8 + $0xf2] sm:$0x3]  ;;  %v1233_v36 = vld [vmem:[#allocation8 + $0xe8] sm:$0x3] }
 0x14f   :  { %v5113_v63 = vpop.xlane.xlu0 %3183  ;;  %v3472_v40 = vadd.f32 %v3471_v32, %v3470_v1  ;;  %v2552_v50 = vrot.slane %v1488_v27, %v4289_v25  ;;  %v2556_v52 = vrot.slane %v1488_v27, %v4297_v33  ;;  %v947_v57 = vrot.slane %v939_v44, %v4283_v11  ;;  %v1239_v1 = vld [vmem:[#allocation8 + $0xf4] sm:$0x3] }
 0x150   :  { %3428 = vadd.xlane.f32.xlu0 %v3427_v29  ;;  %v3890_v31 = vrot.slane %v3595_v8, 4  ;;  %v890_v0 = vcombine.high %v5026_v59, %v5030_v15  ;;  %v1355_v37 = vsub.f32 %v886_v19, %v1227_v12  ;;  %v3892_v26 = vrot.slane %v3596_v30, 3 }
 0x151   :  { %v5121_v24 = vpop.xlane.xlu1 %3188  ;;  %v3485_v21 = vsel %vm2909_vm0, %v2552_v50, 0.0  ;;  %v3486_v29 = vsel %vm2909_vm0, %v2556_v52, 0.0  ;;  %v955_v51 = vcombine.high %v947_v57, %v947_v57  ;;  %v5173_v27 = vrot.slane %v947_v57, %v4283_v11 }
 0x152   :  { %v3487_v6 = vadd.f32 %v3486_v29, %v3485_v21  ;;  %v3891_v58 = vsel %vm3817_vm4, %v3890_v31, %v3889_v41  ;;  %v904_v49 = vrot.slane %v890_v0, %v4283_v11  ;;  %v1483_v15 = vand.u32 2147483647, %v1355_v37  ;;  %v1228_v41 = vld [vmem:[#allocation8 + $0xde] sm:$0x3] }
 0x153   :  { %v5132_v39 = vpop.xlane.xlu0 %3193  ;;  %v5178_v59 = vrot.slane %v955_v51, %v4283_v11  ;;  %v888_v32 = vcombine.high %v5102_v60, %v5102_v60  ;;  %v5183_v8 = vsel %vm3820_vm5, %v3892_v26, %v3891_v58  ;;  %v985_v50 = vcombine.high %v5173_v27, %v5173_v27 }
 0x154   :  { %3473 = vadd.xlane.f32.xlu0 %v3472_v40  ;;  %3488 = vadd.xlane.f32.xlu1 %v3487_v6  ;;  %v5186_v40 = vrot.slane %v904_v49, %v4283_v11  ;;  %v2512_v57 = vrot.slane %v1483_v15, %v4289_v25  ;;  %v2516_v31 = vrot.slane %v1483_v15, %v4297_v33 }
 0x155   :  { %v5139_v10 = vpop.xlane.xlu1 %3198  ;;  %v1366_v12 = vsub.f32 %v5178_v59, %v1238_v20  ;;  %v3599_v60 = vsub.f32 %v4981_v47, %v5056_v42  ;;  %v1367_v30 = vsub.f32 %v985_v50, %v1239_v1  ;;  %v1356_v21 = vsub.f32 %v888_v32, %v1228_v41 }
 0x156   :  { %v1361_v19 = vsub.f32 %v5186_v40, %v1233_v36  ;;  %v906_v29 = vcombine.high %v904_v49, %v904_v49  ;;  %v3460_v51 = vsel %vm2909_vm0, %v2512_v57, 0.0  ;;  %v3461_v58 = vsel %vm2909_vm0, %v2516_v31, 0.0 }
 0x157   :  { %v5148_v18 = vpop.xlane.xlu0 %3203  ;;  %v1494_v6 = vand.u32 2147483647, %v1366_v12  ;;  %v3600_v37 = vsub.f32 %v4981_v47, %v5062_v56  ;;  %v3462_v20 = vadd.f32 %v3461_v58, %v3460_v51  ;;  %v1495_v15 = vand.u32 2147483647, %v1367_v30 }
 0x158   :  { %v1489_v26 = vand.u32 2147483647, %v1361_v19  ;;  %v5207_v49 = vrot.slane %v906_v29, %v4283_v11 }
 0x159   :  { %v5157_v9 = vpop.xlane.xlu1 %3208  ;;  %v2600_v42 = vrot.slane %v1494_v6, %v4289_v25  ;;  %v2604_v36 = vrot.slane %v1494_v6, %v4297_v33  ;;  %v3898_v1 = vrot.slane %v3600_v37, 7  ;;  %3463 = vadd.xlane.f32.xlu1 %v3462_v20  ;;  %v2608_v56 = vrot.slane %v1495_v15, %v4289_v25  ;;  %v1237_v37 = vld [vmem:[#allocation8 + $0xf0] sm:$0x3] }
 0x15a   :  { %v2560_v41 = vrot.slane %v1489_v26, %v4289_v25  ;;  %v2564_v50 = vrot.slane %v1489_v26, %v4297_v33  ;;  %v2612_v12 = vrot.slane %v1495_v15, %v4297_v33 }
 0x15b   :  { %v5168_v45 = vpop.xlane.xlu0 %3213  ;;  %v3515_v57 = vsel %vm2909_vm0, %v2600_v42, 0.0  ;;  %v3516_v31 = vsel %vm2909_vm0, %v2604_v36, 0.0  ;;  %v3520_v58 = vsel %vm2909_vm0, %v2608_v56, 0.0  ;;  %v1365_v56 = vsub.f32 %v5173_v27, %v1237_v37 }
 0x15c   :  { %v3517_v29 = vadd.f32 %v3516_v31, %v3515_v57  ;;  %v3490_v6 = vsel %vm2909_vm0, %v2560_v41, 0.0  ;;  %v3491_v51 = vsel %vm2909_vm0, %v2564_v50, 0.0  ;;  %v3521_v15 = vsel %vm2909_vm0, %v2612_v12, 0.0  ;;  %v1240_v50 = vld [vmem:[#allocation8 + $0xf6] sm:$0x3] }
 0x15d   :  { %v5175_v44 = vpop.xlane.xlu1 %3218  ;;  %v3492_v26 = vadd.f32 %v3491_v51, %v3490_v6  ;;  %v3899_v41 = vsel %vm3808_vm1, %v3898_v1, %v3599_v60  ;;  %v3601_v6 = vsub.f32 %v4981_v47, %v5076_v61  ;;  %v987_v12 = vcombine.high %v5178_v59, %v5178_v59 }
 0x15e   :  { %3518 = vadd.xlane.f32.xlu0 %v3517_v29  ;;  %v936_v60 = vcombine.high %v5186_v40, %v5186_v40  ;;  %v3603_v1 = vsub.f32 %v4981_v47, %v5095_v17  ;;  %v940_v27 = vcombine.high %v5130_v14, %v5137_v54  ;;  %v1493_v61 = vand.u32 2147483647, %v1365_v56 }
 0x15f   :  { %v5190_v52 = vpop.xlane.xlu0 %3223  ;;  %v3900_v51 = vrot.slane %v3601_v6, 6  ;;  %v1368_v59 = vsub.f32 %v987_v12, %v1240_v50 }
 0x160   :  { %5703 = vst [vmem:[#allocation33_spill] sm:$0xff] %v5190_v52  ;;  %v1484_v52 = vand.u32 2147483647, %v1356_v21  ;;  %v1234_v21 = vld [vmem:[#allocation8 + $0xea] sm:$0x3]  ;;  %v2592_v40 = vrot.slane %v1493_v61, %v4289_v25  ;;  %v2596_v17 = vrot.slane %v1493_v61, %v4297_v33 }
 0x161   :  { %v5198_v0 = vpop.xlane.xlu1 %3228  ;;  %v1362_v57 = vsub.f32 %v5207_v49, %v1234_v21  ;;  %v1496_v14 = vand.u32 2147483647, %v1368_v59  ;;  %v954_v59 = vrot.slane %v940_v27, %v4283_v11 }
 0x162   :  { %5704 = vst [vmem:[#allocation34_spill] sm:$0xff] %v5198_v0  ;;  %v2520_v19 = vrot.slane %v1484_v52, %v4289_v25  ;;  %v2524_v30 = vrot.slane %v1484_v52, %v4297_v33  ;;  %v3522_v52 = vadd.f32 %v3521_v15, %v3520_v58  ;;  %3493 = vadd.xlane.f32.xlu0 %v3492_v26  ;;  %v3510_v6 = vsel %vm2909_vm0, %v2592_v40, 0.0  ;;  %v1241_v40 = vld [vmem:[#allocation8 + $0xf8] sm:$0x3] }
 0x163   :  { %v1490_v29 = vand.u32 2147483647, %v1362_v57  ;;  %v3511_v12 = vsel %vm2909_vm0, %v2596_v17, 0.0  ;;  %v938_v17 = vcombine.high %v5207_v49, %v5207_v49 }
 0x164   :  { %v5209_v32 = vpop.xlane.xlu0 %3233  ;;  %v3465_v42 = vsel %vm2909_vm0, %v2520_v19, 0.0  ;;  %v3466_v36 = vsel %vm2909_vm0, %v2524_v30, 0.0  ;;  %v3602_v19 = vsub.f32 %v4981_v47, %v5088_v35  ;;  %v1235_v30 = vld [vmem:[#allocation8 + $0xec] sm:$0x3]  ;;  %3523 = vadd.xlane.f32.xlu1 %v3522_v52 }
 0x165   :  { %v3467_v0 = vadd.f32 %v3466_v36, %v3465_v42  ;;  %v2568_v35 = vrot.slane %v1490_v29, %v4289_v25  ;;  %v2572_v37 = vrot.slane %v1490_v29, %v4297_v33  ;;  %v1363_v15 = vsub.f32 %v936_v60, %v1235_v30 }
 0x166   :  { %v3902_v58 = vrot.slane %v3602_v19, 5  ;;  %v3904_v42 = vrot.slane %v3603_v1, 4  ;;  %v3901_v36 = vsel %vm3811_vm2, %v3900_v51, %v3899_v41  ;;  %v2616_v19 = vrot.slane %v1496_v14, %v4289_v25 }
 0x167   :  { %v5222_v20 = vpop.xlane.xlu1 %3238  ;;  %v3495_v54 = vsel %vm2909_vm0, %v2568_v35, 0.0  ;;  %v3496_v52 = vsel %vm2909_vm0, %v2572_v37, 0.0  ;;  %v1491_v26 = vand.u32 2147483647, %v1363_v15  ;;  %3468 = vadd.xlane.f32.xlu0 %v3467_v0  ;;  %v3512_v30 = vadd.f32 %v3511_v12, %v3510_v6  ;;  %v1236_v0 = vld [vmem:[#allocation8 + $0xee] sm:$0x3] }
 0x168   :  { %v5229_v31 = vpop.xlane.xlu0 %3243  ;;  %v3903_v57 = vsel %vm3814_vm3, %v3902_v58, %v3901_v36  ;;  %v3497_v56 = vadd.f32 %v3496_v52, %v3495_v54  ;;  %v2620_v41 = vrot.slane %v1496_v14, %v4297_v33  ;;  %v3525_v61 = vsel %vm2909_vm0, %v2616_v19, 0.0  ;;  %v1242_v6 = vld [vmem:[#allocation8 + $0xfa] sm:$0x3] }
 0x169   :  { %v2576_v29 = vrot.slane %v1491_v26, %v4289_v25  ;;  %v2580_v60 = vrot.slane %v1491_v26, %v4297_v33  ;;  %v3905_v51 = vsel %vm3817_vm4, %v3904_v42, %v3903_v57  ;;  %v3604_v58 = vsub.f32 %v4981_v47, %v5104_v3  ;;  %v1243_v3 = vld [vmem:[#allocation8 + $0xfc] sm:$0x3] }
 0x16a   :  { %3498 = vadd.xlane.f32.xlu1 %v3497_v56  ;;  %v3526_v35 = vsel %vm2909_vm0, %v2620_v41, 0.0  ;;  %v970_v14 = vrot.slane %v954_v59, %v4283_v11  ;;  %v1364_v54 = vsub.f32 %v938_v17, %v1236_v0  ;;  %v956_v52 = vcombine.high %v954_v59, %v954_v59 }
 0x16b   :  { %v5244_v21 = vpop.xlane.xlu1 %3248  ;;  %v3500_v37 = vsel %vm2909_vm0, %v2576_v29, 0.0  ;;  %v3501_v15 = vsel %vm2909_vm0, %v2580_v60, 0.0  ;;  %v3527_v36 = vadd.f32 %v3526_v35, %v3525_v61  ;;  %v3906_v42 = vrot.slane %v3604_v58, 3  ;;  %3513 = vadd.xlane.f32.xlu0 %v3512_v30  ;;  %v1244_v61 = vld [vmem:[#allocation8 + $0xfe] sm:$0x3] }
 0x16c   :  { %v5254_v50 = vpop.xlane.xlu0 %3253  ;;  %v3502_v27 = vadd.f32 %v3501_v15, %v3500_v37  ;;  %v1369_v26 = vsub.f32 %v970_v14, %v1241_v40  ;;  %v986_v12 = vcombine.high %v970_v14, %v970_v14  ;;  %v1492_v19 = vand.u32 2147483647, %v1364_v54 }
 0x16d   :  { %v5278_v56 = vsel %vm3820_vm5, %v3906_v42, %v3905_v51  ;;  %v984_v49 = vrot.slane %v956_v52, %v4283_v11  ;;  %v3607_v41 = vsub.f32 %v4981_v47, %v5132_v39  ;;  %v3608_v59 = vsub.f32 %v4981_v47, %v5139_v10 }
 0x16e   :  { %3528 = vadd.xlane.f32.xlu1 %v3527_v36  ;;  %v1497_v29 = vand.u32 2147483647, %v1369_v26  ;;  %v1371_v60 = vsub.f32 %v986_v12, %v1243_v3  ;;  %v3609_v51 = vsub.f32 %v4981_v47, %v5148_v18  ;;  %v2584_v58 = vrot.slane %v1492_v19, %v4289_v25 }
 0x16f   :  { %v5262_v1 = vpop.xlane.xlu1 %3258  ;;  %3503 = vadd.xlane.f32.xlu0 %v3502_v27  ;;  %v2588_v0 = vrot.slane %v1492_v19, %v4297_v33  ;;  %v1370_v11 = vsub.f32 %v984_v49, %v1242_v6  ;;  %v988_v35 = vcombine.high %v984_v49, %v984_v49  ;;  %v3912_v40 = vrot.slane %v3608_v59, 7 }
 0x170   :  { %v5275_v57 = vpop.xlane.xlu0 %3263  ;;  %v2624_v39 = vrot.slane %v1497_v29, %v4289_v25  ;;  %v2628_v37 = vrot.slane %v1497_v29, %v4297_v33  ;;  %v1499_v15 = vand.u32 2147483647, %v1371_v60  ;;  %v3505_v17 = vsel %vm2909_vm0, %v2584_v58, 0.0 }
 0x171   :  { %v3506_v10 = vsel %vm2909_vm0, %v2588_v0, 0.0  ;;  %v1498_v36 = vand.u32 2147483647, %v1370_v11  ;;  %v1372_v14 = vsub.f32 %v988_v35, %v1244_v61  ;;  %v3913_v60 = vsel %vm3808_vm1, %v3912_v40, %v3607_v41 }
 0x172   :  { %v3530_v42 = vsel %vm2909_vm0, %v2624_v39, 0.0  ;;  %v3531_v27 = vsel %vm2909_vm0, %v2628_v37, 0.0  ;;  %v3507_v54 = vadd.f32 %v3506_v10, %v3505_v17  ;;  %v2640_v52 = vrot.slane %v1499_v15, %v4289_v25 }
 0x173   :  { %v5283_v30 = vpop.xlane.xlu1 %3268  ;;  %v3532_v3 = vadd.f32 %v3531_v27, %v3530_v42  ;;  %v2632_v26 = vrot.slane %v1498_v36, %v4289_v25  ;;  %v2636_v6 = vrot.slane %v1498_v36, %v4297_v33  ;;  %v2644_v12 = vrot.slane %v1499_v15, %v4297_v33 }
 0x174   :  { %3508 = vadd.xlane.f32.xlu0 %v3507_v54  ;;  %v3540_v49 = vsel %vm2909_vm0, %v2640_v52, 0.0  ;;  %v1500_v29 = vand.u32 2147483647, %v1372_v14  ;;  %v3914_v61 = vrot.slane %v3609_v51, 6  ;;  %v3610_v11 = vsub.f32 %v4981_v47, %v5157_v9 }
 0x175   :  { %3533 = vadd.xlane.f32.xlu1 %v3532_v3  ;;  %v3535_v59 = vsel %vm2909_vm0, %v2632_v26, 0.0  ;;  %v3536_v58 = vsel %vm2909_vm0, %v2636_v6, 0.0  ;;  %v3541_v0 = vsel %vm2909_vm0, %v2644_v12, 0.0  ;;  %v3611_v51 = vsub.f32 %v4981_v47, %v5168_v45 }
 0x176   :  { %v3537_v35 = vadd.f32 %v3536_v58, %v3535_v59  ;;  %v3542_v39 = vadd.f32 %v3541_v0, %v3540_v49  ;;  %v2648_v37 = vrot.slane %v1500_v29, %v4289_v25  ;;  %v2652_v15 = vrot.slane %v1500_v29, %v4297_v33 }
 0x177   :  { %v3915_v17 = vsel %vm3811_vm2, %v3914_v61, %v3913_v60  ;;  %v3916_v41 = vrot.slane %v3610_v11, 5  ;;  %v3918_v33 = vrot.slane %v3611_v51, 4  ;;  %v3589_v54 = vsub.f32 %v4981_v47, %v4944_v38 }
 0x178   :  { %3543 = vadd.xlane.f32.xlu0 %v3542_v39  ;;  %v3545_v36 = vsel %vm2909_vm0, %v2648_v37, 0.0  ;;  %v3546_v9 = vsel %vm2909_vm0, %v2652_v15, 0.0  ;;  %v3597_v52 = vsub.f32 %v4981_v47, %v5032_v43  ;;  %v3590_v3 = vsub.f32 %v4981_v47, %v4950_v5 }
 0x179   :  { %3538 = vadd.xlane.f32.xlu1 %v3537_v35  ;;  %v3547_v14 = vadd.f32 %v3546_v9, %v3545_v36  ;;  %v3917_v25 = vsel %vm3814_vm3, %v3916_v41, %v3915_v17  ;;  %v3598_v26 = vsub.f32 %v4981_v47, %v5040_v62  ;;  %v3605_v6 = vsub.f32 %v4981_v47, %v5113_v63 }
 0x17a   :  { %v5295_v18 = vpop.xlane.xlu0 %3273  ;;  %v5325_v42 = vsel %vm3817_vm4, %v3918_v33, %v3917_v25  ;;  %v3606_v49 = vsub.f32 %v4981_v47, %v5121_v24  ;;  %v3880_v38 = vrot.slane %v3589_v54, 2  ;;  %v3894_v60 = vrot.slane %v3597_v52, 2 }
 0x17b   :  { %v3882_v61 = vrot.slane %v3590_v3, 1  ;;  %v3896_v43 = vrot.slane %v3598_v26, 1  ;;  %v3908_v59 = vrot.slane %v3605_v6, 2  ;;  %v3552_v35 = vsub.f32 %v4981_v47, %v4741_v22  ;;  %v5705_v3 = vld [vmem:[#allocation13_spill] sm:$0xff]  ;;  %v5706_v6 = vld [vmem:[#allocation26_spill] sm:$0xff] }
 0x17c   :  { %v5303_v19 = vpop.xlane.xlu1 %3278  ;;  %v3910_v58 = vrot.slane %v3606_v49, 1  ;;  %v3881_v62 = vsel %vm3823_vm6, %v3880_v38, %v5072_v46  ;;  %v3895_v63 = vsel %vm3823_vm6, %v3894_v60, %v5183_v8  ;;  %v3553_v8 = vsub.f32 %v4981_v47, %v4706_v23 }
 0x17d   :  { %3548 = vadd.xlane.f32.xlu1 %v3547_v14  ;;  %v5356_v24 = vsel %vm3826_vm7, %v3882_v61, %v3881_v62  ;;  %v5359_v11 = vsel %vm3826_vm7, %v3896_v43, %v3895_v63  ;;  %v3909_v39 = vsel %vm3823_vm6, %v3908_v59, %v5278_v56  ;;  %v3807_v46 = vrot.slane %v3552_v35, 7  ;;  %v5707_v43 = vld [vmem:[#allocation19_spill] sm:$0xff]  ;;  %v5708_v59 = vld [vmem:[#allocation20_spill] sm:$0xff] }
 0x17e   :  { %v5317_v40 = vpop.xlane.xlu0 %3283  ;;  %v5366_v37 = vsel %vm3826_vm7, %v3910_v58, %v3909_v39  ;;  %v3560_v17 = vsub.f32 %v4981_v47, %v4729_v2  ;;  %v3551_v22 = vsub.f32 %v4981_v47, %v4701_v13  ;;  %v3554_v56 = vsub.f32 %v4981_v47, %v4748_v34  ;;  %v5710_v39 = vld [vmem:[#allocation27_spill] sm:$0xff] }
 0x17f   :  { %v3561_v51 = vsub.f32 %v4981_v47, %v4770_v7  ;;  %v3568_v9 = vsub.f32 %v4981_v47, %v4799_v4  ;;  %v3810_v23 = vrot.slane %v3553_v8, 6  ;;  %v3555_v2 = vsub.f32 %v4981_v47, %v4715_v28 }
 0x180   :  { %v5319_v10 = vpop.xlane.xlu1 %3288  ;;  %v3809_v36 = vsel %vm3808_vm1, %v3807_v46, %v3551_v22  ;;  %v3828_v14 = vrot.slane %v3560_v17, 7  ;;  %v3813_v25 = vrot.slane %v3554_v56, 5  ;;  %v3562_v13 = vsub.f32 %v4981_v47, %v4774_v55 }
 0x181   :  { %v3559_v34 = vsub.f32 %v4981_v47, %v4724_v53  ;;  %v3812_v7 = vsel %vm3811_vm2, %v3810_v23, %v3809_v36  ;;  %v3830_v54 = vrot.slane %v3561_v51, 6  ;;  %v3569_v4 = vsub.f32 %v4981_v47, %v4804_v16  ;;  %v5711_v36 = vld [vmem:[#allocation14_spill] sm:$0xff]  ;;  %v5712_v23 = vld [vmem:[#allocation16_spill] sm:$0xff] }
 0x182   :  { %v5329_v45 = vpop.xlane.xlu0 %3293  ;;  %v3556_v28 = vsub.f32 %v4981_v47, %v4721_v48  ;;  %v3563_v26 = vsub.f32 %v4981_v47, %v5705_v3  ;;  %v3842_v55 = vrot.slane %v3568_v9, 7  ;;  %v3576_v49 = vsub.f32 %v4981_v47, %v5706_v6  ;;  %v5709_v48 = vld [vmem:[#allocation15_spill] sm:$0xff]  ;;  %v5715_v3 = vld [vmem:[#allocation28_spill] sm:$0xff]  ;;  %v5716_v6 = vld [vmem:[#allocation17_spill] sm:$0xff] }
 0x183   :  { %v3816_v38 = vrot.slane %v3555_v2, 4  ;;  %v3829_v53 = vsel %vm3808_vm1, %v3828_v14, %v3559_v34  ;;  %v3815_v60 = vsel %vm3814_vm3, %v3813_v25, %v3812_v7  ;;  %v3832_v61 = vrot.slane %v3562_v13, 5  ;;  %v5713_v14 = vld [vmem:[#allocation21_spill] sm:$0xff] }
 0x184   :  { %v5327_v27 = vpop.xlane.xlu1 %3298  ;;  %v3567_v16 = vsub.f32 %v4981_v47, %v5707_v43  ;;  %v3570_v58 = vsub.f32 %v4981_v47, %v5708_v59  ;;  %v3557_v62 = vsub.f32 %v4981_v47, %v5709_v48  ;;  %v3831_v63 = vsel %vm3811_vm2, %v3830_v54, %v3829_v53  ;;  %v5718_v48 = vld [vmem:[#allocation29_spill] sm:$0xff] }
 0x185   :  { %v3844_v35 = vrot.slane %v3569_v4, 6  ;;  %v3577_v46 = vsub.f32 %v4981_v47, %v5710_v39  ;;  %v3819_v8 = vrot.slane %v3556_v28, 3  ;;  %v3834_v17 = vrot.slane %v3563_v26, 4  ;;  %v5714_v4 = vld [vmem:[#allocation25_spill] sm:$0xff] }
 0x186   :  { %v5345_v29 = vpop.xlane.xlu0 %3303  ;;  %v3843_v22 = vsel %vm3808_vm1, %v3842_v55, %v3567_v16  ;;  %v3856_v56 = vrot.slane %v3576_v49, 7  ;;  %v3564_v9 = vsub.f32 %v4981_v47, %v5711_v36  ;;  %v3558_v2 = vsub.f32 %v4981_v47, %v5712_v23  ;;  %v5717_v16 = vld [vmem:[#allocation22_spill] sm:$0xff] }
 0x187   :  { %v3571_v25 = vsub.f32 %v4981_v47, %v5713_v14  ;;  %v3818_v13 = vsel %vm3817_vm4, %v3816_v38, %v3815_v60  ;;  %v3833_v7 = vsel %vm3814_vm3, %v3832_v61, %v3831_v63  ;;  %v3846_v54 = vrot.slane %v3570_v58, 5  ;;  %v5719_v36 = vld [vmem:[#allocation18_spill] sm:$0xff] }
 0x188   :  { %v5341_v12 = vpop.xlane.xlu1 %3308  ;;  %v3575_v28 = vsub.f32 %v4981_v47, %v5714_v4  ;;  %v3578_v26 = vsub.f32 %v4981_v47, %v5715_v3  ;;  %v3822_v55 = vrot.slane %v3557_v62, 2  ;;  %v3565_v49 = vsub.f32 %v4981_v47, %v5716_v6 }
 0x189   :  { %v3845_v53 = vsel %vm3811_vm2, %v3844_v35, %v3843_v22  ;;  %v3858_v43 = vrot.slane %v3577_v46, 6  ;;  %v3572_v38 = vsub.f32 %v4981_v47, %v5717_v16  ;;  %v3821_v61 = vsel %vm3820_vm5, %v3819_v8, %v3818_v13  ;;  %v5723_v16 = vld [vmem:[#allocation31_spill] sm:$0xff] }
 0x18a   :  { %v3857_v60 = vsel %vm3808_vm1, %v3856_v56, %v3575_v28  ;;  %v3836_v59 = vrot.slane %v3564_v9, 3  ;;  %v3848_v58 = vrot.slane %v3571_v25, 4  ;;  %v3579_v63 = vsub.f32 %v4981_v47, %v5718_v48  ;;  %v5720_v56 = vld [vmem:[#allocation23_spill] sm:$0xff] }
 0x18b   :  { %v3835_v62 = vsel %vm3817_vm4, %v3834_v17, %v3833_v7  ;;  %v3825_v39 = vrot.slane %v3558_v2, 1  ;;  %v3566_v23 = vsub.f32 %v4981_v47, %v5719_v36  ;;  %v3847_v35 = vsel %vm3814_vm3, %v3846_v54, %v3845_v53  ;;  %v5721_v2 = vld [vmem:[#allocation30_spill] sm:$0xff] }
 0x18c   :  { %v5353_v0 = vpop.xlane.xlu0 %3313  ;;  %v3860_v46 = vrot.slane %v3578_v26, 5  ;;  %v3838_v14 = vrot.slane %v3565_v49, 2  ;;  %v3573_v8 = vsub.f32 %v4981_v47, %v5720_v56  ;;  %v3859_v9 = vsel %vm3811_vm2, %v3858_v43, %v3857_v60  ;;  %v5722_v26 = vld [vmem:[#allocation24_spill] sm:$0xff] }
 0x18d   :  { %v3824_v25 = vsel %vm3823_vm6, %v3822_v55, %v3821_v61  ;;  %v3850_v17 = vrot.slane %v3572_v38, 3  ;;  %v3580_v7 = vsub.f32 %v4981_v47, %v5721_v2  ;;  %v3837_v4 = vsel %vm3820_vm5, %v3836_v59, %v3835_v62  ;;  %v5724_v62 = vld [vmem:[#allocation32_spill] sm:$0xff] }
 0x18e   :  { %v5347_v5 = vpop.xlane.xlu1 %3318  ;;  %v3849_v54 = vsel %vm3817_vm4, %v3848_v58, %v3847_v35  ;;  %v3862_v28 = vrot.slane %v3579_v63, 4  ;;  %v3840_v3 = vrot.slane %v3566_v23, 1  ;;  %v3574_v6 = vsub.f32 %v4981_v47, %v5722_v26 }
 0x18f   :  { %v3861_v49 = vsel %vm3814_vm3, %v3860_v46, %v3859_v9  ;;  %v3827_v53 = vsel %vm3826_vm7, %v3825_v39, %v3824_v25  ;;  %v3852_v43 = vrot.slane %v3573_v8, 2  ;;  %v3581_v38 = vsub.f32 %v4981_v47, %v5723_v16 }
 0x190   :  { %v5374_v41 = vpop.xlane.xlu0 %3323  ;;  %v3839_v60 = vsel %vm3823_vm6, %v3838_v14, %v3837_v4  ;;  %v3864_v61 = vrot.slane %v3580_v7, 3  ;;  %v3851_v59 = vsel %vm3820_vm5, %v3850_v17, %v3849_v54  ;;  %v3863_v58 = vsel %vm3817_vm4, %v3862_v28, %v3861_v49 }
 0x191   :  { %v3854_v63 = vrot.slane %v3574_v6, 1  ;;  %v3582_v39 = vsub.f32 %v4981_v47, %v5724_v62  ;;  %v3841_v36 = vsel %vm3826_vm7, %v3840_v3, %v3839_v60  ;;  %v3866_v23 = vrot.slane %v3581_v38, 2  ;;  %v5725_v38 = vld [vmem:[#allocation33_spill] sm:$0xff] }
 0x192   :  { %v5368_v15 = vpop.xlane.xlu1 %3328  ;;  %v3853_v35 = vsel %vm3823_vm6, %v3852_v43, %v3851_v59  ;;  %v3616_v46 = vsub.f32 %v4981_v47, %v5222_v20  ;;  %v3865_v14 = vsel %vm3820_vm5, %v3864_v61, %v3863_v58  ;;  %v3617_v25 = vsub.f32 %v4981_v47, %v5229_v31 }
 0x193   :  { %v3868_v8 = vrot.slane %v3582_v39, 1  ;;  %v3855_v9 = vsel %vm3826_vm7, %v3854_v63, %v3853_v35  ;;  %v3867_v17 = vsel %vm3823_vm6, %v3866_v23, %v3865_v14  ;;  %v3624_v4 = vsub.f32 %v4981_v47, %v5303_v19 }
 0x194   :  { %v5396_v52 = vpop.xlane.xlu0 %3333  ;;  %v3926_v7 = vrot.slane %v3616_v46, 7  ;;  %v3615_v20 = vsub.f32 %v4981_v47, %v5209_v32  ;;  %v3618_v54 = vsub.f32 %v4981_v47, %v5244_v21  ;;  %v3928_v31 = vrot.slane %v3617_v25, 6 }
 0x195   :  { %v3869_v28 = vsel %vm3826_vm7, %v3868_v8, %v3867_v17  ;;  %v3625_v26 = vsub.f32 %v4981_v47, %v5317_v40  ;;  %v3612_v6 = vsub.f32 %v4981_v47, %v5175_v44  ;;  %v3940_v49 = vrot.slane %v3624_v4, 7 }
 0x196   :  { %v5389_v33 = vpop.xlane.xlu1 %3338  ;;  %v3927_v19 = vsel %vm3808_vm1, %v3926_v7, %v3615_v20  ;;  %v3632_v32 = vsub.f32 %v4981_v47, %v5347_v5  ;;  %v3619_v21 = vsub.f32 %v4981_v47, %v5254_v50  ;;  %v3930_v43 = vrot.slane %v3618_v54, 5 }
 0x197   :  { %v3623_v16 = vsub.f32 %v4981_v47, %v5295_v18  ;;  %v3626_v40 = vsub.f32 %v4981_v47, %v5319_v10  ;;  %v3613_v44 = vsub.f32 %v4981_v47, %v5725_v38  ;;  %v3929_v60 = vsel %vm3811_vm2, %v3928_v31, %v3927_v19  ;;  %v5726_v10 = vld [vmem:[#allocation34_spill] sm:$0xff] }
 0x198   :  { %v5425_v34 = vpop.xlane.xlu0 %3343  ;;  %v3942_v61 = vrot.slane %v3625_v26, 6  ;;  %v3633_v5 = vsub.f32 %v4981_v47, %v5374_v41  ;;  %v3920_v50 = vrot.slane %v3612_v6, 3  ;;  %v3620_v59 = vsub.f32 %v4981_v47, %v5262_v1 }
 0x199   :  { %v3941_v18 = vsel %vm3808_vm1, %v3940_v49, %v3623_v16  ;;  %v3954_v58 = vrot.slane %v3632_v32, 7  ;;  %v3614_v62 = vsub.f32 %v4981_v47, %v5726_v10  ;;  %v3932_v39 = vrot.slane %v3619_v21, 4 }
 0x19a   :  { %v5416_v51 = vpop.xlane.xlu1 %3348  ;;  %v3931_v41 = vsel %vm3814_vm3, %v3930_v43, %v3929_v60  ;;  %v3944_v23 = vrot.slane %v3626_v40, 5  ;;  %v3634_v1 = vsub.f32 %v4981_v47, %v5368_v15  ;;  %v3922_v35 = vrot.slane %v3613_v44, 2 }
 0x19b   :  { %v3621_v46 = vsub.f32 %v4981_v47, %v5275_v57  ;;  %v3943_v14 = vsel %vm3811_vm2, %v3942_v61, %v3941_v18  ;;  %v3956_v8 = vrot.slane %v3633_v5, 6  ;;  %v3934_v25 = vrot.slane %v3620_v59, 3 }
 0x19c   :  { %v3924_v7 = vrot.slane %v3614_v62, 1  ;;  %v3933_v57 = vsel %vm3817_vm4, %v3932_v39, %v3931_v41  ;;  %v3635_v20 = vsub.f32 %v4981_v47, %v5396_v52  ;;  %v3945_v54 = vsel %vm3814_vm3, %v3944_v23, %v3943_v14 }
 0x19d   :  { %v3629_v31 = vsub.f32 %v4981_v47, %v5345_v29  ;;  %v3935_v52 = vsel %vm3820_vm5, %v3934_v25, %v3933_v57  ;;  %v3637_v44 = vsub.f32 %v4981_v47, %v5425_v34  ;;  %v3638_v10 = vsub.f32 %v4981_v47, %v5416_v51 }
 0x19e   :  { %v3960_v32 = vrot.slane %v3635_v20, 4 }
 0x1a2   :  { %v5451_v13 = vpop.xlane.xlu0 %3353 }
 0x1a3   :  { %v3639_v61 = vsub.f32 %v4981_v47, %v5451_v13 }
 0x1a4   :  { %v5445_v22 = vpop.xlane.xlu1 %3358 }
 0x1a5   :  { %4054 = vxpose.xlu0.b32.start [1/16] (narrow) %v3827_v53, 8 }
 0x1a6   :  { %v5468_v48 = vpop.xlane.xlu0 %3363 }
 0x1a7   :  { %v3641_v29 = vsub.f32 %v4981_v47, %v5468_v48 }
 0x1a8   :  { %v5461_v55 = vpop.xlane.xlu1 %3368 }
 0x1a9   :  { %4055 = vxpose.xlu0.b32.cont [2/16] (narrow) %v3841_v36, 8  ;;  %v3627_v36 = vsub.f32 %v4981_v47, %v5329_v45  ;;  %v3921_v45 = vsel %vm3820_vm5, %v3920_v50, %v5325_v42  ;;  %v3958_v42 = vrot.slane %v3634_v1, 5  ;;  %v3642_v5 = vsub.f32 %v4981_v47, %v5461_v55 }
 0x1aa   :  { %v3923_v6 = vsel %vm3823_vm6, %v3922_v35, %v3921_v45  ;;  %v3970_v18 = vrot.slane %v3641_v29, 6 }
 0x1ab   :  { %v3946_v4 = vrot.slane %v3627_v36, 4  ;;  %v3925_v40 = vsel %vm3826_vm7, %v3924_v7, %v3923_v6  ;;  %v3964_v36 = vrot.slane %v3637_v44, 2 }
 0x1ac   :  { %v5477_v56 = vpop.xlane.xlu1 %3373 }
 0x1ad   :  { %4056 = vxpose.xlu0.b32.cont [3/16] (narrow) %v3855_v9, 8  ;;  %v5483_v2 = vpop.xlane.xlu0 %3398  ;;  %v3947_v49 = vsel %vm3817_vm4, %v3946_v4, %v3945_v54 }
 0x1b1   :  { %v5492_v3 = vpop.xlane.xlu1 %3378  ;;  %4057 = vxpose.xlu0.b32.cont [4/16] (narrow) %v3869_v28, 8  ;;  %v5503_v53 = vpop.xlane.xlu0 %3403  ;;  %v3640_v28 = vsub.f32 %v4981_v47, %v5445_v22  ;;  %v3630_v22 = vsub.f32 %v4981_v47, %v5341_v12 }
 0x1b2   :  { %v3644_v13 = vsub.f32 %v4981_v47, %v5492_v3  ;;  %v3649_v6 = vsub.f32 %v4981_v47, %v5503_v53 }
 0x1b3   :  { %v3968_v16 = vrot.slane %v3640_v28, 7  ;;  %v3952_v50 = vrot.slane %v3630_v22, 1  ;;  %v3648_v28 = vsub.f32 %v4981_v47, %v5483_v2 }
 0x1b4   :  { %v3976_v14 = vrot.slane %v3644_v13, 3 }
 0x1b5   :  { %4058 = vxpose.xlu0.b32.cont [5/16] (narrow) %v5356_v24, 8  ;;  %v3631_v24 = vsub.f32 %v4981_v47, %v5353_v0  ;;  %v5533_v9 = vpop.xlane.xlu0 %3393  ;;  %v3628_v0 = vsub.f32 %v4981_v47, %v5327_v27  ;;  %v3936_v27 = vrot.slane %v3621_v46, 2  ;;  %v3969_v62 = vsel %vm3808_vm1, %v3968_v16, %v3639_v61 }
 0x1b6   :  { %v3971_v1 = vsel %vm3811_vm2, %v3970_v18, %v3969_v62  ;;  %v3966_v46 = vrot.slane %v3638_v10, 1 }
 0x1b7   :  { %v5518_v63 = vpop.xlane.xlu1 %3408  ;;  %v3955_v15 = vsel %vm3808_vm1, %v3954_v58, %v3631_v24  ;;  %v3948_v19 = vrot.slane %v3628_v0, 3  ;;  %v3937_v12 = vsel %vm3823_vm6, %v3936_v27, %v3935_v52  ;;  %v3643_v58 = vsub.f32 %v4981_v47, %v5477_v56 }
 0x1b8   :  { %v3957_v26 = vsel %vm3811_vm2, %v3956_v8, %v3955_v15  ;;  %v3972_v56 = vrot.slane %v3642_v5, 5 }
 0x1b9   :  { %4059 = vxpose.xlu0.b32.cont [6/16] (narrow) %v5359_v11, 8  ;;  %v3622_v11 = vsub.f32 %v4981_v47, %v5283_v30  ;;  %v3636_v30 = vsub.f32 %v4981_v47, %v5389_v33  ;;  %v3959_v43 = vsel %vm3814_vm3, %v3958_v42, %v3957_v26  ;;  %v3950_v33 = vrot.slane %v3629_v31, 2 }
 0x1ba   :  { %v3949_v60 = vsel %vm3820_vm5, %v3948_v19, %v3947_v49  ;;  %v3961_v59 = vsel %vm3817_vm4, %v3960_v32, %v3959_v43  ;;  %v3974_v51 = vrot.slane %v3643_v58, 4  ;;  %v3973_v0 = vsel %vm3814_vm3, %v3972_v56, %v3971_v1 }
 0x1bb   :  { %v3384_v17 = vpop.xlane.xlu1 %3383  ;;  %v3962_v48 = vrot.slane %v3636_v30, 3  ;;  %v3951_v55 = vsel %vm3823_vm6, %v3950_v33, %v3949_v60  ;;  %v3647_v31 = vsub.f32 %v4981_v47, %v5533_v9  ;;  %v3650_v26 = vsub.f32 %v4981_v47, %v5518_v63 }
 0x1bc   :  { %v3645_v41 = vsub.f32 %v4981_v47, %v3384_v17  ;;  %v3953_v8 = vsel %vm3826_vm7, %v3952_v50, %v3951_v55  ;;  %v3975_v17 = vsel %vm3817_vm4, %v3974_v51, %v3973_v0  ;;  %v3982_v19 = vrot.slane %v3648_v28, 7 }
 0x1bd   :  { %4060 = vxpose.xlu0.b32.cont [7/16] (narrow) %v5366_v37, 8  ;;  %v3938_v37 = vrot.slane %v3622_v11, 1  ;;  %v3963_v23 = vsel %vm3820_vm5, %v3962_v48, %v3961_v59  ;;  %v3977_v7 = vsel %vm3820_vm5, %v3976_v14, %v3975_v17  ;;  %v3986_v29 = vrot.slane %v3650_v26, 5 }
 0x1be   :  { %v3965_v45 = vsel %vm3823_vm6, %v3964_v36, %v3963_v23  ;;  %v3978_v25 = vrot.slane %v3645_v41, 2  ;;  %v3983_v32 = vsel %vm3808_vm1, %v3982_v19, %v3647_v31 }
 0x1bf   :  { %v3939_v39 = vsel %vm3826_vm7, %v3938_v37, %v3937_v12  ;;  %v3967_v57 = vsel %vm3826_vm7, %v3966_v46, %v3965_v45  ;;  %v3984_v37 = vrot.slane %v3649_v6, 6 }
 0x1c0   :  { %v5561_v21 = vpop.xlane.xlu0 %3438  ;;  %v3979_v20 = vsel %vm3823_vm6, %v3978_v25, %v3977_v7 }
 0x1c1   :  { %v5565_v38 = vpop.xlane.xlu1 %3443  ;;  %4061 = vxpose.xlu0.b32.cont [8/16] (narrow) %v3925_v40, 8  ;;  %v3985_v63 = vsel %vm3811_vm2, %v3984_v37, %v3983_v32  ;;  %v3656_v58 = vsub.f32 %v4981_v47, %v5561_v21 }
 0x1c2   :  { %v3987_v53 = vsel %vm3814_vm3, %v3986_v29, %v3985_v63 }
 0x1c3   :  { %v3996_v36 = vrot.slane %v3656_v58, 7 }
 0x1c4   :  { %v3414_v34 = vpop.xlane.xlu0 %3413 }
 0x1c5   :  { %4062 = vxpose.xlu0.b32.cont [9/16] (narrow) %v3939_v39, 8  ;;  %v3419_v24 = vpop.xlane.xlu1 %3418  ;;  %v3651_v52 = vsub.f32 %v4981_v47, %v3414_v34  ;;  %v3657_v39 = vsub.f32 %v4981_v47, %v5565_v38 }
 0x1c6   :  { %v3652_v30 = vsub.f32 %v4981_v47, %v3419_v24 }
 0x1c7   :  { %v3988_v9 = vrot.slane %v3651_v52, 4  ;;  %v3998_v1 = vrot.slane %v3657_v39, 6 }
 0x1c8   :  { %v3389_v35 = vpop.xlane.xlu0 %3388  ;;  %v3990_v43 = vrot.slane %v3652_v30, 3 }
 0x1c9   :  { %v3646_v3 = vsub.f32 %v4981_v47, %v3389_v35  ;;  %4063 = vxpose.xlu0.b32.cont [10/16] (narrow) %v3953_v8, 8  ;;  %v3989_v44 = vsel %vm3817_vm4, %v3988_v9, %v3987_v53 }
 0x1ca   :  { %v3449_v4 = vpop.xlane.xlu1 %3448  ;;  %v3991_v60 = vsel %vm3820_vm5, %v3990_v43, %v3989_v44 }
 0x1cb   :  { %v3980_v15 = vrot.slane %v3646_v3, 1  ;;  %v3658_v62 = vsub.f32 %v4981_v47, %v3449_v4 }
 0x1cc   :  { %v3434_v11 = vpop.xlane.xlu0 %3433 }
 0x1cd   :  { %4064 = vxpose.xlu0.b32.cont [11/16] (narrow) %v3967_v57, 8  ;;  %v3981_v54 = vsel %vm3826_vm7, %v3980_v15, %v3979_v20  ;;  %v3655_v10 = vsub.f32 %v4981_v47, %v3434_v11  ;;  %v4000_v21 = vrot.slane %v3658_v62, 5 }
 0x1cf   :  { %v3997_v24 = vsel %vm3808_vm1, %v3996_v36, %v3655_v10 }
 0x1d0   :  { %v3424_v42 = vpop.xlane.xlu1 %3423  ;;  %v3999_v46 = vsel %vm3811_vm2, %v3998_v1, %v3997_v24 }
 0x1d1   :  { %4065 = vxpose.xlu0.b32.cont [12/16] (narrow) %v3981_v54, 8  ;;  %v3653_v49 = vsub.f32 %v4981_v47, %v3424_v42  ;;  %v4001_v38 = vsel %vm3814_vm3, %v4000_v21, %v3999_v46 }
 0x1d3   :  { %v3992_v16 = vrot.slane %v3653_v49, 2 }
 0x1d5   :  { %v5599_v27 = vpop.xlane.xlu0 %3478  ;;  %v3993_v61 = vsel %vm3823_vm6, %v3992_v16, %v3991_v60 }
 0x1d6   :  { %v3664_v17 = vsub.f32 %v4981_v47, %v5599_v27 }
 0x1d7   :  { %v3484_v2 = vpop.xlane.xlu1 %3483 }
 0x1d8   :  { %v3665_v54 = vsub.f32 %v4981_v47, %v3484_v2  ;;  %v4010_v28 = vrot.slane %v3664_v17, 7 }
 0x1d9   :  { %v3454_v22 = vpop.xlane.xlu0 %3453 }
 0x1da   :  { %v3659_v13 = vsub.f32 %v4981_v47, %v3454_v22  ;;  %v4012_v30 = vrot.slane %v3665_v54, 6 }
 0x1db   :  { %v3459_v12 = vpop.xlane.xlu1 %3458 }
 0x1dc   :  { %v3660_v55 = vsub.f32 %v4981_v47, %v3459_v12  ;;  %v4002_v51 = vrot.slane %v3659_v13, 4 }
 0x1dd   :  { %v3429_v40 = vpop.xlane.xlu0 %3428 }
 0x1de   :  { %v3654_v33 = vsub.f32 %v4981_v47, %v3429_v40  ;;  %v4004_v35 = vrot.slane %v3660_v55, 3  ;;  %v4003_v45 = vsel %vm3817_vm4, %v4002_v51, %v4001_v38 }
 0x1e0   :  { %v3994_v48 = vrot.slane %v3654_v33, 1  ;;  %v4005_v0 = vsel %vm3820_vm5, %v4004_v35, %v4003_v45 }
 0x1e1   :  { %v3489_v50 = vpop.xlane.xlu1 %3488  ;;  %v3474_v59 = vpop.xlane.xlu0 %3473 }
 0x1e2   :  { %v3995_v5 = vsel %vm3826_vm7, %v3994_v48, %v3993_v61  ;;  %v3663_v20 = vsub.f32 %v4981_v47, %v3474_v59  ;;  %v3666_v11 = vsub.f32 %v4981_v47, %v3489_v50 }
 0x1e3   :  { %4066 = vxpose.xlu0.b32.cont [13/16] (narrow) %v3995_v5, 8 }
 0x1e4   :  { %v4011_v52 = vsel %vm3808_vm1, %v4010_v28, %v3663_v20  ;;  %v4014_v19 = vrot.slane %v3666_v11, 5 }
 0x1e5   :  { %v4013_v29 = vsel %vm3811_vm2, %v4012_v30, %v4011_v52 }
 0x1e6   :  { %v3464_v18 = vpop.xlane.xlu1 %3463  ;;  %v4015_v63 = vsel %vm3814_vm3, %v4014_v19, %v4013_v29 }
 0x1e7   :  { %v3661_v41 = vsub.f32 %v4981_v47, %v3464_v18 }
 0x1e9   :  { %v4006_v14 = vrot.slane %v3661_v41, 2 }
 0x1eb   :  { %v3519_v34 = vpop.xlane.xlu0 %3518  ;;  %v4007_v57 = vsel %vm3823_vm6, %v4006_v14, %v4005_v0 }
 0x1ec   :  { %v3672_v49 = vsub.f32 %v4981_v47, %v3519_v34 }
 0x1ee   :  { %v4024_v33 = vrot.slane %v3672_v49, 7 }
 0x1ef   :  { %v3494_v23 = vpop.xlane.xlu0 %3493 }
 0x1f0   :  { %v3667_v42 = vsub.f32 %v4981_v47, %v3494_v23 }
 0x1f1   :  { %v3524_v56 = vpop.xlane.xlu1 %3523 }
 0x1f2   :  { %v4016_v22 = vrot.slane %v3667_v42, 4  ;;  %v3673_v16 = vsub.f32 %v4981_v47, %v3524_v56 }
 0x1f4   :  { %v3469_v8 = vpop.xlane.xlu0 %3468  ;;  %v4017_v44 = vsel %vm3817_vm4, %v4016_v22, %v4015_v63  ;;  %v4026_v18 = vrot.slane %v3673_v16, 6 }
 0x1f5   :  { %v3662_v3 = vsub.f32 %v4981_v47, %v3469_v8 }
 0x1f7   :  { %v3499_v25 = vpop.xlane.xlu1 %3498  ;;  %v4008_v15 = vrot.slane %v3662_v3, 1 }
 0x1f8   :  { %v3514_v7 = vpop.xlane.xlu0 %3513  ;;  %v3668_v31 = vsub.f32 %v4981_v47, %v3499_v25 }
 0x1f9   :  { %v4009_v4 = vsel %vm3826_vm7, %v4008_v15, %v4007_v57  ;;  %v3671_v2 = vsub.f32 %v4981_v47, %v3514_v7 }
 0x1fa   :  { %4067 = vxpose.xlu0.b32.cont [14/16] (narrow) %v4009_v4, 8  ;;  %v4018_v32 = vrot.slane %v3668_v31, 3 }
 0x1fb   :  { %v3529_v26 = vpop.xlane.xlu1 %3528  ;;  %v4025_v61 = vsel %vm3808_vm1, %v4024_v33, %v3671_v2 }
 0x1fc   :  { %v3504_v6 = vpop.xlane.xlu0 %3503  ;;  %v3674_v37 = vsub.f32 %v4981_v47, %v3529_v26  ;;  %v4019_v60 = vsel %vm3820_vm5, %v4018_v32, %v4017_v44  ;;  %v4027_v13 = vsel %vm3811_vm2, %v4026_v18, %v4025_v61 }
 0x1fd   :  { %v3669_v27 = vsub.f32 %v4981_v47, %v3504_v6 }
 0x1fe   :  { %v4028_v5 = vrot.slane %v3674_v37, 5 }
 0x1ff   :  { %v4020_v9 = vrot.slane %v3669_v27, 2 }
 0x200   :  { %v4029_v55 = vsel %vm3814_vm3, %v4028_v5, %v4027_v13 }
 0x201   :  { %v3509_v43 = vpop.xlane.xlu0 %3508  ;;  %v4021_v59 = vsel %vm3823_vm6, %v4020_v9, %v4019_v60 }
 0x202   :  { %v3534_v40 = vpop.xlane.xlu1 %3533  ;;  %v3670_v53 = vsub.f32 %v4981_v47, %v3509_v43 }
 0x203   :  { %v3675_v12 = vsub.f32 %v4981_v47, %v3534_v40 }
 0x204   :  { %v4022_v48 = vrot.slane %v3670_v53, 1 }
 0x205   :  { %v3544_v50 = vpop.xlane.xlu0 %3543  ;;  %v4030_v58 = vrot.slane %v3675_v12, 4 }
 0x206   :  { %v3539_v34 = vpop.xlane.xlu1 %3538  ;;  %v3677_v10 = vsub.f32 %v4981_v47, %v3544_v50  ;;  %v4023_v62 = vsel %vm3826_vm7, %v4022_v48, %v4021_v59 }
 0x207   :  { %v3676_v39 = vsub.f32 %v4981_v47, %v3539_v34  ;;  %4068 = vxpose.xlu0.b32.cont [15/16] (narrow) %v4023_v62, 8  ;;  %v4031_v23 = vsel %vm3817_vm4, %v4030_v58, %v4029_v55 }
 0x208   :  { %v4034_v36 = vrot.slane %v3677_v10, 2 }
 0x209   :  { %v4032_v41 = vrot.slane %v3676_v39, 3 }
 0x20a   :  { %v3549_v56 = vpop.xlane.xlu1 %3548 }
 0x20b   :  { %v4033_v24 = vsel %vm3820_vm5, %v4032_v41, %v4031_v23  ;;  %v3678_v21 = vsub.f32 %v4981_v47, %v3549_v56 }
 0x20c   :  { %v4035_v1 = vsel %vm3823_vm6, %v4034_v36, %v4033_v24 }
 0x20d   :  { %v4036_v51 = vrot.slane %v3678_v21, 1 }
 0x20f   :  { %v4037_v35 = vsel %vm3826_vm7, %v4036_v51, %v4035_v1 }
 0x210   :  { %4069 = vxpose.xlu0.b32.end [16/16] (narrow) %v4037_v35, 8 }
 0x254   :  { %v4070_v46 = vpop.trf.xlu0 }
 0x255   :  { %4086 = vst [vmem:[#allocation9] sm:$0x1] %v4070_v46 }
 0x256   :  { %4189 = shalt.err (!%p4186_p0)
}
 0x257   :  { %s4190_s7 = scalar_lea.hbm %s5682_s4, 16 }
 0x258   :  { %p4191_p1 = scmp.ne.s32.totalorder %s5682_s4, %s4190_s7  ;;  %p4194_p2 = scmp.lt.u32.totalorder %s4190_s7, %s5682_s4 }
 0x25a   :  { %p4196_p3 = pnand %p4194_p2, %p4191_p1 }
 0x25c   :  { %4199 = shalt.err (!%p4196_p3)
}
 0x25d   :  { %4096 = dma.vmem_to_hbm [thread:$0]  %s4094_s28, 16, %s5682_s4, [#allocation5]  }
 0x25e   :  { %4204 = dma.done.wait [#allocation5], 16  }
 0x25f   :  { %4205 = vsyncadd [#allocation5], 4294967280 }
 0x260   :  { %4100 = vsyncpa [#allocation4], 1 }
 0x261   :  { %4101 = vsyncpa [#allocation7], 1 }
 0x262   :  { %4102 = vsyncpa [#allocation5], 1 }

</bundles_post_ra>
